<compile_context>
chip_gen: v6e
topology: v6e:2x2x1
jax: 0.10.0
libtpu: 0.0.40
codegen_flags: <defaults>
</compile_context>

<pallas_src>
import math

import jax
import jax.numpy as jnp
from jax.experimental import pallas as pl
from jax.experimental.pallas import tpu as pltpu


VMEM_LIMIT_BYTES = 32 * 1024 * 1024  # safe cap on v5e / v6e / v7x (64 MiB physical)
MXU_DTYPE = jnp.bfloat16             # matmul operand dtype; accumulation is always f32


# --------------------------------------------------------------------------------------
# Pallas kernels
# --------------------------------------------------------------------------------------
def bilstm_kernel(gates_ref, whh_f_ref, whh_b_ref, mask_ref, y_ref):
    """Fused bidirectional LSTM recurrence over the full sequence (one grid step / batch block).

    gates_ref : (T, Bb, 8H) f32  precomputed x @ [W_ih_f | W_ih_b] + (b_ih + b_hh)
    whh_*_ref : (H, 4H)          recurrent weights (bf16 or f32), PyTorch gate order i,f,g,o
    mask_ref  : (T, Bb, 1)  f32  1.0 where t < length[b], else 0.0
    y_ref     : (T, Bb, 2H) f32  fwd hidden -> lanes [0,H), bwd hidden -> lanes [H,2H)
    """
    T, Bb, _ = gates_ref.shape
    H = whh_f_ref.shape[0]

    w_f = whh_f_ref[...]          # hoisted: loaded once, resident for the whole loop
    w_b = whh_b_ref[...]
    wdt = w_f.dtype

    def cell(gates_row, h_prev, c_prev, w_hh):
        g = gates_row + jnp.dot(h_prev.astype(wdt), w_hh,
                                preferred_element_type=jnp.float32)     # (Bb, 4H)
        # NOTE: gate slices are lane sub-slices when H < 128; keep H a multiple of 128
        # in production for zero-cost views.
        i = jax.nn.sigmoid(g[:, 0 * H:1 * H])
        f = jax.nn.sigmoid(g[:, 1 * H:2 * H])
        gg = jnp.tanh(g[:, 2 * H:3 * H])
        o = jax.nn.sigmoid(g[:, 3 * H:4 * H])
        c = f * c_prev + i * gg
        h = o * jnp.tanh(c)
        return h, c

    def step(s, carry):
        h_f, c_f, h_b, c_b = carry
        tb = T - 1 - s

        # ---- forward direction, time index s ----
        row_f = gates_ref[s]                              # (Bb, 8H)
        hn_f, cn_f = cell(row_f[:, 0:4 * H], h_f, c_f, w_f)
        m_f = mask_ref[s]                                 # (Bb, 1) validity
        h_f = m_f * hn_f + (1.0 - m_f) * h_f              # packed-sequence gating
        c_f = m_f * cn_f + (1.0 - m_f) * c_f
        y_ref[pl.ds(s, 1), :, 0:H] = (m_f * hn_f)[None]   # zero output at padding

        # ---- backward direction, time index T-1-s ----
        row_b = gates_ref[tb]
        hn_b, cn_b = cell(row_b[:, 4 * H:8 * H], h_b, c_b, w_b)
        m_b = mask_ref[tb]
        h_b = m_b * hn_b + (1.0 - m_b) * h_b              # state stays 0 until t < len[b]
        c_b = m_b * cn_b + (1.0 - m_b) * c_b
        y_ref[pl.ds(tb, 1), :, H:2 * H] = (m_b * hn_b)[None]

        return (h_f, c_f, h_b, c_b)

    zero = jnp.zeros((Bb, H), jnp.float32)
    jax.lax.fori_loop(0, T, step, (zero, zero, zero, zero), unroll=(T <= 32))


def attention_kernel(x_ref, w_ref, len_ref, rep_ref, m_scr, l_scr, acc_scr):
    """Length-masked attention, blocked over T with online (flash-style) accumulation.

    Grid axis 0 = time blocks ("arbitrary").
    x_ref   : (B, Tb, Dh)   LSTM outputs (padding positions are zero)
    w_ref   : (1, Dh)       attention weight vector
    len_ref : (B, 1) int32  valid lengths
    rep_ref : (B, Dh)       output representation (written on the last block)
    scratch : m_scr (B,1,1), l_scr (B,1,1), acc_scr (B,1,Dh)
    """
    kb = pl.program_id(0)
    B, Tb, Dh = x_ref.shape

    @pl.when(kb == 0)
    def _():
        m_scr[...] = jnp.full_like(m_scr, -jnp.inf)
        l_scr[...] = jnp.zeros_like(l_scr)
        acc_scr[...] = jnp.zeros_like(acc_scr)

    x = x_ref[...]                                                     # (B, Tb, Dh)
    w = jnp.broadcast_to(w_ref[...][None, :, :], (B, 1, Dh))           # (B, 1, Dh)

    # scores on the MXU: relu(bmm(x, w^T))  -> (B, 1, Tb)
    s = jnp.einsum("bqd,bkd->bqk", w, x, preferred_element_type=jnp.float32)
    s = jnp.maximum(s, 0.0)

    # Length mask. Because the reference renormalizes after masking, the unmasked
    # softmax denominator cancels — masked online softmax is mathematically identical.
    t_idx = kb * Tb + jax.lax.broadcasted_iota(jnp.int32, s.shape, 2)
    mask = (t_idx < len_ref[...][:, :, None]).astype(jnp.float32)      # (B, 1, Tb)

    m_prev = m_scr[...]
    m_new = jnp.maximum(m_prev, jnp.max(s, axis=-1, keepdims=True))
    alpha = jnp.exp(m_prev - m_new)
    p = jnp.exp(s - m_new) * mask                                      # (B, 1, Tb)

    l_scr[...] = alpha * l_scr[...] + jnp.sum(p, axis=-1, keepdims=True)
    acc_scr[...] = alpha * acc_scr[...] + jnp.einsum(
        "bqk,bkd->bqd", p, x, preferred_element_type=jnp.float32)
    m_scr[...] = m_new

    @pl.when(kb == pl.num_programs(0) - 1)
    def _():
        inv_l = pl.reciprocal(l_scr[...], approx=True)                 # (B, 1, 1)
        rep_ref[...] = (acc_scr[...] * inv_l)[:, 0, :]                 # (B, Dh)


# --------------------------------------------------------------------------------------
# Wrappers / glue
# --------------------------------------------------------------------------------------
def _batch_block(B):
    """Batch tile. When B tiles cleanly, two 'parallel' blocks feed v7x's 2nd TensorCore."""
    if B >= 16 and B % 16 == 0:
        return B // 2
    return B


def bilstm_layer(x_tm, mask_tm, p_fwd, p_bwd, *, mxu_dtype=MXU_DTYPE):
    """One bidirectional LSTM layer. x_tm: (T, B, D) time-major f32 -> (T, B, 2H) f32."""
    T, B, D = x_tm.shape
    H = p_fwd["whh_t"].shape[0]

    # Hoisted input projection for BOTH directions: one big MXU matmul (bf16, f32 acc).
    w_ih = jnp.concatenate([p_fwd["wih_t"], p_bwd["wih_t"]], axis=1).astype(mxu_dtype)  # (D, 8H)
    bias = jnp.concatenate([p_fwd["b"], p_bwd["b"]], axis=1)                            # (1, 8H)
    gates = jnp.einsum("tbd,dg->tbg", x_tm.astype(mxu_dtype), w_ih,
                       preferred_element_type=jnp.float32) + bias                       # (T, B, 8H)

    whh_f = p_fwd["whh_t"].astype(mxu_dtype)
    whh_b = p_bwd["whh_t"].astype(mxu_dtype)

    bb = _batch_block(B)
    grid = (B // bb,)

    # TODO(synk): for very long T that does not fit VMEM, add a time-block grid axis with
    # h/c carried in VMEM scratch (bwd stream via a reversed index_map).
    return pl.pallas_call(
        bilstm_kernel,
        out_shape=jax.ShapeDtypeStruct((T, B, 2 * H), jnp.float32),
        grid=grid,
        in_specs=[
            pl.BlockSpec((T, bb, 8 * H), lambda i: (0, i, 0)),
            pl.BlockSpec((H, 4 * H), lambda i: (0, 0)),
            pl.BlockSpec((H, 4 * H), lambda i: (0, 0)),
            pl.BlockSpec((T, bb, 1), lambda i: (0, i, 0)),
        ],
        out_specs=pl.BlockSpec((T, bb, 2 * H), lambda i: (0, i, 0)),
        compiler_params=pltpu.CompilerParams(
            dimension_semantics=("parallel",),
            vmem_limit_bytes=VMEM_LIMIT_BYTES,
        ),
    )(gates, whh_f, whh_b, mask_tm)


def attention(x_bf, lengths, w, *, t_block=None):
    """x_bf: (B, T, Dh) batch-first LSTM outputs -> (B, Dh) representation."""
    B, T, Dh = x_bf.shape
    if t_block is None:
        t_block = T if T <= 512 else 512
    if T % t_block != 0 or (t_block != T and t_block % 8 != 0):
        t_block = T  # fall back to a single resident block

    return pl.pallas_call(
        attention_kernel,
        out_shape=jax.ShapeDtypeStruct((B, Dh), jnp.float32),
        grid=(T // t_block,),
        in_specs=[
            pl.BlockSpec((B, t_block, Dh), lambda k: (0, k, 0)),
            pl.BlockSpec((1, Dh), lambda k: (0, 0)),
            pl.BlockSpec((B, 1), lambda k: (0, 0)),
        ],
        out_specs=pl.BlockSpec((B, Dh), lambda k: (0, 0)),
        scratch_shapes=[
            pltpu.VMEM((B, 1, 1), jnp.float32),   # running max
            pltpu.VMEM((B, 1, 1), jnp.float32),   # running (masked) denominator
            pltpu.VMEM((B, 1, Dh), jnp.float32),  # running weighted sum
        ],
        compiler_params=pltpu.CompilerParams(
            dimension_semantics=("arbitrary",),
            vmem_limit_bytes=VMEM_LIMIT_BYTES,
        ),
    )(x_bf, w, lengths.reshape(B, 1).astype(jnp.int32))


# --------------------------------------------------------------------------------------
# Parameter init (matches PyTorch nn.LSTM / Attention uniform init, deterministic)
# --------------------------------------------------------------------------------------
def init_lstm_params(key, input_size, hidden, num_layers):
    layers = []
    std = 1.0 / math.sqrt(hidden)
    k = key
    for layer in range(num_layers):
        in_dim = input_size if layer == 0 else 2 * hidden
        dirs = []
        for _ in range(2):  # forward, backward
            k, k1, k2, k3, k4 = jax.random.split(k, 5)
            w_ih = jax.random.uniform(k1, (4 * hidden, in_dim), jnp.float32, -std, std)
            w_hh = jax.random.uniform(k2, (4 * hidden, hidden), jnp.float32, -std, std)
            b_ih = jax.random.uniform(k3, (4 * hidden,), jnp.float32, -std, std)
            b_hh = jax.random.uniform(k4, (4 * hidden,), jnp.float32, -std, std)
            dirs.append({
                "wih_t": w_ih.T,                                # (in_dim, 4H)
                "whh_t": w_hh.T,                                # (H, 4H)
                "b": (b_ih + b_hh).reshape(1, 4 * hidden),      # (1, 4H)
            })
        layers.append(tuple(dirs))
    return layers


def init_mylstm_params(key, n_rnn_dim, h_rnn_layer, n_rnn_layers):
    k1, k2, k3, k4 = jax.random.split(key, 4)
    std_att = 1.0 / math.sqrt(2 * h_rnn_layer)
    return {
        "lstm1": init_lstm_params(k1, n_rnn_dim, h_rnn_layer, n_rnn_layers),
        "lstm2": init_lstm_params(k2, 2 * h_rnn_layer, h_rnn_layer, 1),
        "att1": jax.random.uniform(k3, (1, 2 * h_rnn_layer), jnp.float32, -std_att, std_att),
        "att2": jax.random.uniform(k4, (1, 2 * h_rnn_layer), jnp.float32, -std_att, std_att),
    }


# --------------------------------------------------------------------------------------
# MyLSTM forward
# --------------------------------------------------------------------------------------
@jax.jit
def my_lstm_forward(params, x, lengths):
    """x: (B, T, D) padded input, lengths: (B,) valid lengths. Returns (B, 4H)."""
    B, T, _ = x.shape
    # nn.Dropout(p=0.2): eval-mode identity.
    mask_tm = (jnp.arange(T)[:, None] < lengths[None, :]).astype(jnp.float32)[:, :, None]

    # lstm1: n_rnn_layers bidirectional layers (time-major inside the kernels).
    h_tm = jnp.transpose(x, (1, 0, 2))                               # (T, B, D)
    for p_f, p_b in params["lstm1"]:
        h_tm = bilstm_layer(h_tm, mask_tm, p_f, p_b)
    out1_tm = h_tm                                                   # (T, B, 2H)
    rep1 = attention(jnp.transpose(out1_tm, (1, 0, 2)), lengths, params["att1"])

    # lstm2: single bidirectional layer on lstm1's output.
    h2_tm = out1_tm
    for p_f, p_b in params["lstm2"]:
        h2_tm = bilstm_layer(h2_tm, mask_tm, p_f, p_b)
    rep2 = attention(jnp.transpose(h2_tm, (1, 0, 2)), lengths, params["att2"])

    return jnp.concatenate([rep1, rep2], axis=1)                     # (B, 4H)


# --------------------------------------------------------------------------------------
if __name__ == "__main__":
    B, T = 2, 8
    n_rnn_dim, h_rnn_layer, n_rnn_layers = 16, 32, 2

    key = jax.random.PRNGKey(0)
    kx, kp = jax.random.split(key)
    x = jax.random.normal(kx, (B, T, n_rnn_dim), jnp.float32)
    lengths = jnp.array([T, T - 3], jnp.int32)  # emulated PackedSequence lengths

    params = init_mylstm_params(kp, n_rnn_dim, h_rnn_layer, n_rnn_layers)

    z = my_lstm_forward(params, x, lengths)
    z = jax.block_until_ready(z)
    assert z.shape == (B, 4 * h_rnn_layer), z.shape
    assert bool(jnp.all(jnp.isfinite(z)))
    print("KERNEL_OK")
</pallas_src>

<mosaic_0001>
module attributes {stable_mosaic.version = 11 : i64} {
  func.func @attention_kernel(%arg0: i32, %arg1: memref<2x8x64xf32, #tpu.memory_space<vmem>>, %arg2: memref<1x64xf32, #tpu.memory_space<vmem>>, %arg3: memref<2x1xi32, #tpu.memory_space<vmem>>, %arg4: memref<2x64xf32, #tpu.memory_space<vmem>>, %arg5: memref<2x1x1xf32, #tpu.memory_space<vmem>>, %arg6: memref<2x1x1xf32, #tpu.memory_space<vmem>>, %arg7: memref<2x1x64xf32, #tpu.memory_space<vmem>>) attributes {dimension_semantics = [#tpu.dimension_semantics<arbitrary>], iteration_bounds = array<i64: 1>, scalar_prefetch = 0 : i64, scratch_operands = 3 : i64, tpu.core_type = #tpu.core_type<tc>, window_params = [{transform_indices = @transform_0, window_bounds = array<i64: 2, 8, 64>}, {pipeline_mode = #tpu.pipeline_mode<synchronous>, transform_indices = @transform_1, window_bounds = array<i64: 1, 64>}, {pipeline_mode = #tpu.pipeline_mode<synchronous>, transform_indices = @transform_2, window_bounds = array<i64: 2, 1>}, {pipeline_mode = #tpu.pipeline_mode<synchronous>, transform_indices = @transform_3, window_bounds = array<i64: 2, 64>}]} {
    %c0_i32 = arith.constant 0 : i32
    %0 = arith.cmpi eq, %arg0, %c0_i32 : i32
    %1 = arith.extui %0 : i1 to i32
    %c0_i32_0 = arith.constant 0 : i32
    %2 = arith.cmpi ne, %1, %c0_i32_0 : i32
    scf.if %2 {
      %cst_31 = arith.constant 0xFF800000 : f32
      %47 = vector.broadcast %cst_31 : f32 to vector<2x1x1xf32>
      %c0_32 = arith.constant 0 : index
      %c0_33 = arith.constant 0 : index
      %c0_34 = arith.constant 0 : index
      %48 = vector.load %arg5[%c0_32, %c0_33, %c0_34] : memref<2x1x1xf32, #tpu.memory_space<vmem>>, vector<2x1x1xf32>
      tpu.vector_store %arg5[%c0_32, %c0_33, %c0_34], %47 {strides = array<i32>} : memref<2x1x1xf32, #tpu.memory_space<vmem>>, vector<2x1x1xf32>,
      %cst_35 = arith.constant 0.000000e+00 : f32
      %49 = vector.broadcast %cst_35 : f32 to vector<2x1x1xf32>
      %c0_36 = arith.constant 0 : index
      %c0_37 = arith.constant 0 : index
      %c0_38 = arith.constant 0 : index
      %50 = vector.load %arg6[%c0_36, %c0_37, %c0_38] : memref<2x1x1xf32, #tpu.memory_space<vmem>>, vector<2x1x1xf32>
      tpu.vector_store %arg6[%c0_36, %c0_37, %c0_38], %49 {strides = array<i32>} : memref<2x1x1xf32, #tpu.memory_space<vmem>>, vector<2x1x1xf32>,
      %cst_39 = arith.constant 0.000000e+00 : f32
      %51 = vector.broadcast %cst_39 : f32 to vector<2x1x64xf32>
      %c0_40 = arith.constant 0 : index
      %c0_41 = arith.constant 0 : index
      %c0_42 = arith.constant 0 : index
      %52 = vector.load %arg7[%c0_40, %c0_41, %c0_42] : memref<2x1x64xf32, #tpu.memory_space<vmem>>, vector<2x1x64xf32>
      tpu.vector_store %arg7[%c0_40, %c0_41, %c0_42], %51 {strides = array<i32>} : memref<2x1x64xf32, #tpu.memory_space<vmem>>, vector<2x1x64xf32>,
    } else {
    }
    %c0 = arith.constant 0 : index
    %c0_1 = arith.constant 0 : index
    %c0_2 = arith.constant 0 : index
    %3 = vector.load %arg1[%c0, %c0_1, %c0_2] : memref<2x8x64xf32, #tpu.memory_space<vmem>>, vector<2x8x64xf32>
    %c0_3 = arith.constant 0 : index
    %c0_4 = arith.constant 0 : index
    %4 = vector.load %arg2[%c0_3, %c0_4] : memref<1x64xf32, #tpu.memory_space<vmem>>, vector<1x64xf32>
    %5 = vector.shape_cast %4 : vector<1x64xf32> to vector<1x1x64xf32>
    %6 = vector.shape_cast %5 : vector<1x1x64xf32> to vector<1x1x64xf32>
    %7 = vector.broadcast %6 : vector<1x1x64xf32> to vector<2x1x64xf32>
    "tpu.trace_start"() <{level = 10 : i32, message = "bqd,bkd->bqk"}> : () -> ()
    %cst = arith.constant dense<0.000000e+00> : vector<2x1x8xf32>
    %8 = tpu.matmul %7, %3, %cst {dimension_numbers = #tpu.dot_dimension_numbers<[2], [2], [1], [1], [0, 0, 0, 1, 1, 1], [0], [0]>} : vector<2x1x64xf32>, vector<2x8x64xf32>, vector<2x1x8xf32> -> vector<2x1x8xf32>
    "tpu.trace_stop"() : () -> ()
    %cst_5 = arith.constant 0.000000e+00 : f32
    %9 = vector.broadcast %cst_5 : f32 to vector<2x1x8xf32>
    %10 = arith.maximumf %8, %9 : vector<2x1x8xf32>
    %c8_i32 = arith.constant 8 : i32
    %11 = arith.muli %arg0, %c8_i32 : i32
    %12 = tpu.iota {dimensions = array<i32: 2>} : vector<2x1x8xi32>
    %13 = vector.broadcast %11 : i32 to vector<2x1x8xi32>
    %14 = arith.addi %13, %12 : vector<2x1x8xi32>
    %c0_6 = arith.constant 0 : index
    %c0_7 = arith.constant 0 : index
    %15 = vector.load %arg3[%c0_6, %c0_7] : memref<2x1xi32, #tpu.memory_space<vmem>>, vector<2x1xi32>
    %16 = vector.shape_cast %15 : vector<2x1xi32> to vector<2x1x1xi32>
    %17 = vector.broadcast %16 : vector<2x1x1xi32> to vector<2x1x8xi32>
    %18 = arith.cmpi slt, %14, %17 : vector<2x1x8xi32>
    %19 = arith.extui %18 : vector<2x1x8xi1> to vector<2x1x8xi32>
    %20 = arith.sitofp %19 : vector<2x1x8xi32> to vector<2x1x8xf32>
    %c0_8 = arith.constant 0 : index
    %c0_9 = arith.constant 0 : index
    %c0_10 = arith.constant 0 : index
    %21 = vector.load %arg5[%c0_8, %c0_9, %c0_10] : memref<2x1x1xf32, #tpu.memory_space<vmem>>, vector<2x1x1xf32>
    %cst_11 = arith.constant dense<0xFF800000> : vector<2x1xf32>
    %22 = vector.multi_reduction <maximumf>, %10, %cst_11 [2] : vector<2x1x8xf32> to vector<2x1xf32>
    %23 = vector.shape_cast %22 : vector<2x1xf32> to vector<2x1x1xf32>
    %24 = arith.maximumf %21, %23 : vector<2x1x1xf32>
    %25 = arith.subf %21, %24 : vector<2x1x1xf32>
    %26 = math.exp %25 : vector<2x1x1xf32>
    %27 = vector.broadcast %24 : vector<2x1x1xf32> to vector<2x1x8xf32>
    %28 = arith.subf %10, %27 : vector<2x1x8xf32>
    %29 = math.exp %28 : vector<2x1x8xf32>
    %30 = arith.mulf %29, %20 : vector<2x1x8xf32>
    %c0_12 = arith.constant 0 : index
    %c0_13 = arith.constant 0 : index
    %c0_14 = arith.constant 0 : index
    %31 = vector.load %arg6[%c0_12, %c0_13, %c0_14] : memref<2x1x1xf32, #tpu.memory_space<vmem>>, vector<2x1x1xf32>
    %32 = arith.mulf %26, %31 : vector<2x1x1xf32>
    %cst_15 = arith.constant dense<0.000000e+00> : vector<2x1xf32>
    %33 = vector.multi_reduction <add>, %30, %cst_15 [2] : vector<2x1x8xf32> to vector<2x1xf32>
    %34 = vector.shape_cast %33 : vector<2x1xf32> to vector<2x1x1xf32>
    %35 = arith.addf %32, %34 : vector<2x1x1xf32>
    %c0_16 = arith.constant 0 : index
    %c0_17 = arith.constant 0 : index
    %c0_18 = arith.constant 0 : index
    %36 = vector.load %arg6[%c0_16, %c0_17, %c0_18] : memref<2x1x1xf32, #tpu.memory_space<vmem>>, vector<2x1x1xf32>
    tpu.vector_store %arg6[%c0_16, %c0_17, %c0_18], %35 {strides = array<i32>} : memref<2x1x1xf32, #tpu.memory_space<vmem>>, vector<2x1x1xf32>,
    %c0_19 = arith.constant 0 : index
    %c0_20 = arith.constant 0 : index
    %c0_21 = arith.constant 0 : index
    %37 = vector.load %arg7[%c0_19, %c0_20, %c0_21] : memref<2x1x64xf32, #tpu.memory_space<vmem>>, vector<2x1x64xf32>
    %38 = vector.broadcast %26 : vector<2x1x1xf32> to vector<2x1x64xf32>
    %39 = arith.mulf %38, %37 : vector<2x1x64xf32>
    "tpu.trace_start"() <{level = 10 : i32, message = "bqk,bkd->bqd"}> : () -> ()
    %cst_22 = arith.constant dense<0.000000e+00> : vector<2x1x64xf32>
    %40 = tpu.matmul %30, %3, %cst_22 {dimension_numbers = #tpu.dot_dimension_numbers<[2], [1], [1], [2], [0, 0, 0, 1, 1, 2], [0], [0]>} : vector<2x1x8xf32>, vector<2x8x64xf32>, vector<2x1x64xf32> -> vector<2x1x64xf32>
    "tpu.trace_stop"() : () -> ()
    %41 = arith.addf %39, %40 : vector<2x1x64xf32>
    %c0_23 = arith.constant 0 : index
    %c0_24 = arith.constant 0 : index
    %c0_25 = arith.constant 0 : index
    %42 = vector.load %arg7[%c0_23, %c0_24, %c0_25] : memref<2x1x64xf32, #tpu.memory_space<vmem>>, vector<2x1x64xf32>
    tpu.vector_store %arg7[%c0_23, %c0_24, %c0_25], %41 {strides = array<i32>} : memref<2x1x64xf32, #tpu.memory_space<vmem>>, vector<2x1x64xf32>,
    %c0_26 = arith.constant 0 : index
    %c0_27 = arith.constant 0 : index
    %c0_28 = arith.constant 0 : index
    %43 = vector.load %arg5[%c0_26, %c0_27, %c0_28] : memref<2x1x1xf32, #tpu.memory_space<vmem>>, vector<2x1x1xf32>
    tpu.vector_store %arg5[%c0_26, %c0_27, %c0_28], %24 {strides = array<i32>} : memref<2x1x1xf32, #tpu.memory_space<vmem>>, vector<2x1x1xf32>,
    %c0_i32_29 = arith.constant 0 : i32
    %44 = arith.cmpi eq, %arg0, %c0_i32_29 : i32
    %45 = arith.extui %44 : i1 to i32
    %c0_i32_30 = arith.constant 0 : i32
    %46 = arith.cmpi ne, %45, %c0_i32_30 : i32
    scf.if %46 {
      %c0_31 = arith.constant 0 : index
      %c0_32 = arith.constant 0 : index
      %c0_33 = arith.constant 0 : index
      %47 = vector.load %arg6[%c0_31, %c0_32, %c0_33] : memref<2x1x1xf32, #tpu.memory_space<vmem>>, vector<2x1x1xf32>
      %48 = tpu.reciprocal %47 {approx = true} : vector<2x1x1xf32> -> vector<2x1x1xf32>
      %c0_34 = arith.constant 0 : index
      %c0_35 = arith.constant 0 : index
      %c0_36 = arith.constant 0 : index
      %49 = vector.load %arg7[%c0_34, %c0_35, %c0_36] : memref<2x1x64xf32, #tpu.memory_space<vmem>>, vector<2x1x64xf32>
      %50 = vector.broadcast %48 : vector<2x1x1xf32> to vector<2x1x64xf32>
      %51 = arith.mulf %49, %50 : vector<2x1x64xf32>
      %52 = vector.shape_cast %51 : vector<2x1x64xf32> to vector<2x64xf32>
      %c0_37 = arith.constant 0 : index
      %c0_38 = arith.constant 0 : index
      %53 = vector.load %arg4[%c0_37, %c0_38] : memref<2x64xf32, #tpu.memory_space<vmem>>, vector<2x64xf32>
      tpu.vector_store %arg4[%c0_37, %c0_38], %52 {strides = array<i32>} : memref<2x64xf32, #tpu.memory_space<vmem>>, vector<2x64xf32>,
    } else {
    }
    return
  }
  func.func @transform_0(%arg0: i32) -> (i32, i32, i32) {
    %c0_i32 = arith.constant 0 : i32
    %c0_i32_0 = arith.constant 0 : i32
    %c0_i32_1 = arith.constant 0 : i32
    return %c0_i32, %arg0, %c0_i32_0 : i32, i32, i32
  }
  func.func @transform_1(%arg0: i32) -> (i32, i32) {
    %c0_i32 = arith.constant 0 : i32
    %c0_i32_0 = arith.constant 0 : i32
    %c0_i32_1 = arith.constant 0 : i32
    return %c0_i32, %c0_i32_0 : i32, i32
  }
  func.func @transform_2(%arg0: i32) -> (i32, i32) {
    %c0_i32 = arith.constant 0 : i32
    %c0_i32_0 = arith.constant 0 : i32
    %c0_i32_1 = arith.constant 0 : i32
    return %c0_i32, %c0_i32_0 : i32, i32
  }
  func.func @transform_3(%arg0: i32) -> (i32, i32) {
    %c0_i32 = arith.constant 0 : i32
    %c0_i32_0 = arith.constant 0 : i32
    %c0_i32_1 = arith.constant 0 : i32
    return %c0_i32, %c0_i32_0 : i32, i32
  }
}

module attributes {stable_mosaic.version = 11 : i64} {
  func.func @bilstm_kernel(%arg0: i32, %arg1: memref<8x2x256xf32, #tpu.memory_space<vmem>>, %arg2: memref<32x128xbf16, #tpu.memory_space<vmem>>, %arg3: memref<32x128xbf16, #tpu.memory_space<vmem>>, %arg4: memref<8x2x1xf32, #tpu.memory_space<vmem>>, %arg5: memref<8x2x64xf32, #tpu.memory_space<vmem>>) attributes {dimension_semantics = [#tpu.dimension_semantics<parallel>], iteration_bounds = array<i64: 1>, scalar_prefetch = 0 : i64, scratch_operands = 0 : i64, tpu.core_type = #tpu.core_type<tc>, window_params = [{transform_indices = @transform_0, window_bounds = array<i64: 8, 2, 256>}, {pipeline_mode = #tpu.pipeline_mode<synchronous>, transform_indices = @transform_1, window_bounds = array<i64: 32, 128>}, {pipeline_mode = #tpu.pipeline_mode<synchronous>, transform_indices = @transform_2, window_bounds = array<i64: 32, 128>}, {transform_indices = @transform_3, window_bounds = array<i64: 8, 2, 1>}, {transform_indices = @transform_4, window_bounds = array<i64: 8, 2, 64>}]} {
    %c0 = arith.constant 0 : index
    %c0_0 = arith.constant 0 : index
    %0 = vector.load %arg2[%c0, %c0_0] : memref<32x128xbf16, #tpu.memory_space<vmem>>, vector<32x128xbf16>
    %c0_1 = arith.constant 0 : index
    %c0_2 = arith.constant 0 : index
    %1 = vector.load %arg3[%c0_1, %c0_2] : memref<32x128xbf16, #tpu.memory_space<vmem>>, vector<32x128xbf16>
    %cst = arith.constant 0.000000e+00 : f32
    %2 = vector.broadcast %cst : f32 to vector<2x32xf32>
    %c0_i32 = arith.constant 0 : i32
    %c7_i32 = arith.constant 7 : i32
    %3 = arith.subi %c7_i32, %c0_i32 : i32
    %4 = arith.index_cast %c0_i32 : i32 to index
    %c0_3 = arith.constant 0 : index
    %c0_4 = arith.constant 0 : index
    %5 = vector.load %arg1[%4, %c0_3, %c0_4] : memref<8x2x256xf32, #tpu.memory_space<vmem>>, vector<1x2x256xf32>
    %6 = vector.shape_cast %5 : vector<1x2x256xf32> to vector<2x256xf32>
    %7 = vector.extract_strided_slice %6 {offsets = [0, 0], sizes = [2, 128], strides = [1, 1]} : vector<2x256xf32> to vector<2x128xf32>
    %8 = arith.truncf %2 : vector<2x32xf32> to vector<2x32xbf16>
    %cst_5 = arith.constant dense<0.000000e+00> : vector<2x128xf32>
    %9 = tpu.matmul %8, %0, %cst_5 {dimension_numbers = #tpu.dot_dimension_numbers<[1], [0], [0], [1], [0, 0, 1, 1], [], []>} : vector<2x32xbf16>, vector<32x128xbf16>, vector<2x128xf32> -> vector<2x128xf32>
    %10 = arith.addf %7, %9 : vector<2x128xf32>
    %11 = vector.extract_strided_slice %10 {offsets = [0, 0], sizes = [2, 32], strides = [1, 1]} : vector<2x128xf32> to vector<2x32xf32>
    %12 = arith.negf %11 : vector<2x32xf32>
    %13 = math.exp %12 : vector<2x32xf32>
    %cst_6 = arith.constant 1.000000e+00 : f32
    %14 = vector.broadcast %cst_6 : f32 to vector<2x32xf32>
    %15 = arith.addf %14, %13 : vector<2x32xf32>
    %16 = arith.divf %14, %15 : vector<2x32xf32>
    %17 = vector.extract_strided_slice %10 {offsets = [0, 32], sizes = [2, 32], strides = [1, 1]} : vector<2x128xf32> to vector<2x32xf32>
    %18 = arith.negf %17 : vector<2x32xf32>
    %19 = math.exp %18 : vector<2x32xf32>
    %cst_7 = arith.constant 1.000000e+00 : f32
    %20 = vector.broadcast %cst_7 : f32 to vector<2x32xf32>
    %21 = arith.addf %20, %19 : vector<2x32xf32>
    %22 = arith.divf %20, %21 : vector<2x32xf32>
    %23 = vector.extract_strided_slice %10 {offsets = [0, 64], sizes = [2, 32], strides = [1, 1]} : vector<2x128xf32> to vector<2x32xf32>
    %24 = math.tanh %23 : vector<2x32xf32>
    %25 = vector.extract_strided_slice %10 {offsets = [0, 96], sizes = [2, 32], strides = [1, 1]} : vector<2x128xf32> to vector<2x32xf32>
    %26 = arith.negf %25 : vector<2x32xf32>
    %27 = math.exp %26 : vector<2x32xf32>
    %cst_8 = arith.constant 1.000000e+00 : f32
    %28 = vector.broadcast %cst_8 : f32 to vector<2x32xf32>
    %29 = arith.addf %28, %27 : vector<2x32xf32>
    %30 = arith.divf %28, %29 : vector<2x32xf32>
    %31 = arith.mulf %22, %2 : vector<2x32xf32>
    %32 = arith.mulf %16, %24 : vector<2x32xf32>
    %33 = arith.addf %31, %32 : vector<2x32xf32>
    %34 = math.tanh %33 : vector<2x32xf32>
    %35 = arith.mulf %30, %34 : vector<2x32xf32>
    %36 = arith.index_cast %c0_i32 : i32 to index
    %c0_9 = arith.constant 0 : index
    %c0_10 = arith.constant 0 : index
    %37 = vector.load %arg4[%36, %c0_9, %c0_10] : memref<8x2x1xf32, #tpu.memory_space<vmem>>, vector<1x2x1xf32>
    %38 = vector.shape_cast %37 : vector<1x2x1xf32> to vector<2x1xf32>
    %39 = vector.broadcast %38 : vector<2x1xf32> to vector<2x32xf32>
    %40 = arith.mulf %39, %35 : vector<2x32xf32>
    %cst_11 = arith.constant 1.000000e+00 : f32
    %41 = vector.broadcast %cst_11 : f32 to vector<2x1xf32>
    %42 = arith.subf %41, %38 : vector<2x1xf32>
    %43 = vector.broadcast %42 : vector<2x1xf32> to vector<2x32xf32>
    %44 = arith.mulf %43, %2 : vector<2x32xf32>
    %45 = arith.addf %40, %44 : vector<2x32xf32>
    %46 = vector.broadcast %38 : vector<2x1xf32> to vector<2x32xf32>
    %47 = arith.mulf %46, %33 : vector<2x32xf32>
    %cst_12 = arith.constant 1.000000e+00 : f32
    %48 = vector.broadcast %cst_12 : f32 to vector<2x1xf32>
    %49 = arith.subf %48, %38 : vector<2x1xf32>
    %50 = vector.broadcast %49 : vector<2x1xf32> to vector<2x32xf32>
    %51 = arith.mulf %50, %2 : vector<2x32xf32>
    %52 = arith.addf %47, %51 : vector<2x32xf32>
    %53 = vector.broadcast %38 : vector<2x1xf32> to vector<2x32xf32>
    %54 = arith.mulf %53, %35 : vector<2x32xf32>
    %55 = vector.shape_cast %54 : vector<2x32xf32> to vector<1x2x32xf32>
    %56 = arith.index_cast %c0_i32 : i32 to index
    %c0_13 = arith.constant 0 : index
    %c0_14 = arith.constant 0 : index
    %57 = vector.load %arg5[%56, %c0_13, %c0_14] : memref<8x2x64xf32, #tpu.memory_space<vmem>>, vector<1x2x32xf32>
    tpu.vector_store %arg5[%56, %c0_13, %c0_14], %55 {strides = array<i32>} : memref<8x2x64xf32, #tpu.memory_space<vmem>>, vector<1x2x32xf32>,
    %58 = arith.index_cast %3 : i32 to index
    %c0_15 = arith.constant 0 : index
    %c0_16 = arith.constant 0 : index
    %59 = vector.load %arg1[%58, %c0_15, %c0_16] : memref<8x2x256xf32, #tpu.memory_space<vmem>>, vector<1x2x256xf32>
    %60 = vector.shape_cast %59 : vector<1x2x256xf32> to vector<2x256xf32>
    %61 = vector.extract_strided_slice %60 {offsets = [0, 128], sizes = [2, 128], strides = [1, 1]} : vector<2x256xf32> to vector<2x128xf32>
    %62 = arith.truncf %2 : vector<2x32xf32> to vector<2x32xbf16>
    %cst_17 = arith.constant dense<0.000000e+00> : vector<2x128xf32>
    %63 = tpu.matmul %62, %1, %cst_17 {dimension_numbers = #tpu.dot_dimension_numbers<[1], [0], [0], [1], [0, 0, 1, 1], [], []>} : vector<2x32xbf16>, vector<32x128xbf16>, vector<2x128xf32> -> vector<2x128xf32>
    %64 = arith.addf %61, %63 : vector<2x128xf32>
    %65 = vector.extract_strided_slice %64 {offsets = [0, 0], sizes = [2, 32], strides = [1, 1]} : vector<2x128xf32> to vector<2x32xf32>
    %66 = arith.negf %65 : vector<2x32xf32>
    %67 = math.exp %66 : vector<2x32xf32>
    %cst_18 = arith.constant 1.000000e+00 : f32
    %68 = vector.broadcast %cst_18 : f32 to vector<2x32xf32>
    %69 = arith.addf %68, %67 : vector<2x32xf32>
    %70 = arith.divf %68, %69 : vector<2x32xf32>
    %71 = vector.extract_strided_slice %64 {offsets = [0, 32], sizes = [2, 32], strides = [1, 1]} : vector<2x128xf32> to vector<2x32xf32>
    %72 = arith.negf %71 : vector<2x32xf32>
    %73 = math.exp %72 : vector<2x32xf32>
    %cst_19 = arith.constant 1.000000e+00 : f32
    %74 = vector.broadcast %cst_19 : f32 to vector<2x32xf32>
    %75 = arith.addf %74, %73 : vector<2x32xf32>
    %76 = arith.divf %74, %75 : vector<2x32xf32>
    %77 = vector.extract_strided_slice %64 {offsets = [0, 64], sizes = [2, 32], strides = [1, 1]} : vector<2x128xf32> to vector<2x32xf32>
    %78 = math.tanh %77 : vector<2x32xf32>
    %79 = vector.extract_strided_slice %64 {offsets = [0, 96], sizes = [2, 32], strides = [1, 1]} : vector<2x128xf32> to vector<2x32xf32>
    %80 = arith.negf %79 : vector<2x32xf32>
    %81 = math.exp %80 : vector<2x32xf32>
    %cst_20 = arith.constant 1.000000e+00 : f32
    %82 = vector.broadcast %cst_20 : f32 to vector<2x32xf32>
    %83 = arith.addf %82, %81 : vector<2x32xf32>
    %84 = arith.divf %82, %83 : vector<2x32xf32>
    %85 = arith.mulf %76, %2 : vector<2x32xf32>
    %86 = arith.mulf %70, %78 : vector<2x32xf32>
    %87 = arith.addf %85, %86 : vector<2x32xf32>
    %88 = math.tanh %87 : vector<2x32xf32>
    %89 = arith.mulf %84, %88 : vector<2x32xf32>
    %90 = arith.index_cast %3 : i32 to index
    %c0_21 = arith.constant 0 : index
    %c0_22 = arith.constant 0 : index
    %91 = vector.load %arg4[%90, %c0_21, %c0_22] : memref<8x2x1xf32, #tpu.memory_space<vmem>>, vector<1x2x1xf32>
    %92 = vector.shape_cast %91 : vector<1x2x1xf32> to vector<2x1xf32>
    %93 = vector.broadcast %92 : vector<2x1xf32> to vector<2x32xf32>
    %94 = arith.mulf %93, %89 : vector<2x32xf32>
    %cst_23 = arith.constant 1.000000e+00 : f32
    %95 = vector.broadcast %cst_23 : f32 to vector<2x1xf32>
    %96 = arith.subf %95, %92 : vector<2x1xf32>
    %97 = vector.broadcast %96 : vector<2x1xf32> to vector<2x32xf32>
    %98 = arith.mulf %97, %2 : vector<2x32xf32>
    %99 = arith.addf %94, %98 : vector<2x32xf32>
    %100 = vector.broadcast %92 : vector<2x1xf32> to vector<2x32xf32>
    %101 = arith.mulf %100, %87 : vector<2x32xf32>
    %cst_24 = arith.constant 1.000000e+00 : f32
    %102 = vector.broadcast %cst_24 : f32 to vector<2x1xf32>
    %103 = arith.subf %102, %92 : vector<2x1xf32>
    %104 = vector.broadcast %103 : vector<2x1xf32> to vector<2x32xf32>
    %105 = arith.mulf %104, %2 : vector<2x32xf32>
    %106 = arith.addf %101, %105 : vector<2x32xf32>
    %107 = vector.broadcast %92 : vector<2x1xf32> to vector<2x32xf32>
    %108 = arith.mulf %107, %89 : vector<2x32xf32>
    %109 = vector.shape_cast %108 : vector<2x32xf32> to vector<1x2x32xf32>
    %110 = arith.index_cast %3 : i32 to index
    %c0_25 = arith.constant 0 : index
    %c32 = arith.constant 32 : index
    %111 = vector.load %arg5[%110, %c0_25, %c32] : memref<8x2x64xf32, #tpu.memory_space<vmem>>, vector<1x2x32xf32>
    tpu.vector_store %arg5[%110, %c0_25, %c32], %109 {strides = array<i32>} : memref<8x2x64xf32, #tpu.memory_space<vmem>>, vector<1x2x32xf32>,
    %c1_i32 = arith.constant 1 : i32
    %c7_i32_26 = arith.constant 7 : i32
    %112 = arith.subi %c7_i32_26, %c1_i32 : i32
    %113 = arith.index_cast %c1_i32 : i32 to index
    %c0_27 = arith.constant 0 : index
    %c0_28 = arith.constant 0 : index
    %114 = vector.load %arg1[%113, %c0_27, %c0_28] : memref<8x2x256xf32, #tpu.memory_space<vmem>>, vector<1x2x256xf32>
    %115 = vector.shape_cast %114 : vector<1x2x256xf32> to vector<2x256xf32>
    %116 = vector.extract_strided_slice %115 {offsets = [0, 0], sizes = [2, 128], strides = [1, 1]} : vector<2x256xf32> to vector<2x128xf32>
    %117 = arith.truncf %45 : vector<2x32xf32> to vector<2x32xbf16>
    %cst_29 = arith.constant dense<0.000000e+00> : vector<2x128xf32>
    %118 = tpu.matmul %117, %0, %cst_29 {dimension_numbers = #tpu.dot_dimension_numbers<[1], [0], [0], [1], [0, 0, 1, 1], [], []>} : vector<2x32xbf16>, vector<32x128xbf16>, vector<2x128xf32> -> vector<2x128xf32>
    %119 = arith.addf %116, %118 : vector<2x128xf32>
    %120 = vector.extract_strided_slice %119 {offsets = [0, 0], sizes = [2, 32], strides = [1, 1]} : vector<2x128xf32> to vector<2x32xf32>
    %121 = arith.negf %120 : vector<2x32xf32>
    %122 = math.exp %121 : vector<2x32xf32>
    %cst_30 = arith.constant 1.000000e+00 : f32
    %123 = vector.broadcast %cst_30 : f32 to vector<2x32xf32>
    %124 = arith.addf %123, %122 : vector<2x32xf32>
    %125 = arith.divf %123, %124 : vector<2x32xf32>
    %126 = vector.extract_strided_slice %119 {offsets = [0, 32], sizes = [2, 32], strides = [1, 1]} : vector<2x128xf32> to vector<2x32xf32>
    %127 = arith.negf %126 : vector<2x32xf32>
    %128 = math.exp %127 : vector<2x32xf32>
    %cst_31 = arith.constant 1.000000e+00 : f32
    %129 = vector.broadcast %cst_31 : f32 to vector<2x32xf32>
    %130 = arith.addf %129, %128 : vector<2x32xf32>
    %131 = arith.divf %129, %130 : vector<2x32xf32>
    %132 = vector.extract_strided_slice %119 {offsets = [0, 64], sizes = [2, 32], strides = [1, 1]} : vector<2x128xf32> to vector<2x32xf32>
    %133 = math.tanh %132 : vector<2x32xf32>
    %134 = vector.extract_strided_slice %119 {offsets = [0, 96], sizes = [2, 32], strides = [1, 1]} : vector<2x128xf32> to vector<2x32xf32>
    %135 = arith.negf %134 : vector<2x32xf32>
    %136 = math.exp %135 : vector<2x32xf32>
    %cst_32 = arith.constant 1.000000e+00 : f32
    %137 = vector.broadcast %cst_32 : f32 to vector<2x32xf32>
    %138 = arith.addf %137, %136 : vector<2x32xf32>
    %139 = arith.divf %137, %138 : vector<2x32xf32>
    %140 = arith.mulf %131, %52 : vector<2x32xf32>
    %141 = arith.mulf %125, %133 : vector<2x32xf32>
    %142 = arith.addf %140, %141 : vector<2x32xf32>
    %143 = math.tanh %142 : vector<2x32xf32>
    %144 = arith.mulf %139, %143 : vector<2x32xf32>
    %145 = arith.index_cast %c1_i32 : i32 to index
    %c0_33 = arith.constant 0 : index
    %c0_34 = arith.constant 0 : index
    %146 = vector.load %arg4[%145, %c0_33, %c0_34] : memref<8x2x1xf32, #tpu.memory_space<vmem>>, vector<1x2x1xf32>
    %147 = vector.shape_cast %146 : vector<1x2x1xf32> to vector<2x1xf32>
    %148 = vector.broadcast %147 : vector<2x1xf32> to vector<2x32xf32>
    %149 = arith.mulf %148, %144 : vector<2x32xf32>
    %cst_35 = arith.constant 1.000000e+00 : f32
    %150 = vector.broadcast %cst_35 : f32 to vector<2x1xf32>
    %151 = arith.subf %150, %147 : vector<2x1xf32>
    %152 = vector.broadcast %151 : vector<2x1xf32> to vector<2x32xf32>
    %153 = arith.mulf %152, %45 : vector<2x32xf32>
    %154 = arith.addf %149, %153 : vector<2x32xf32>
    %155 = vector.broadcast %147 : vector<2x1xf32> to vector<2x32xf32>
    %156 = arith.mulf %155, %142 : vector<2x32xf32>
    %cst_36 = arith.constant 1.000000e+00 : f32
    %157 = vector.broadcast %cst_36 : f32 to vector<2x1xf32>
    %158 = arith.subf %157, %147 : vector<2x1xf32>
    %159 = vector.broadcast %158 : vector<2x1xf32> to vector<2x32xf32>
    %160 = arith.mulf %159, %52 : vector<2x32xf32>
    %161 = arith.addf %156, %160 : vector<2x32xf32>
    %162 = vector.broadcast %147 : vector<2x1xf32> to vector<2x32xf32>
    %163 = arith.mulf %162, %144 : vector<2x32xf32>
    %164 = vector.shape_cast %163 : vector<2x32xf32> to vector<1x2x32xf32>
    %165 = arith.index_cast %c1_i32 : i32 to index
    %c0_37 = arith.constant 0 : index
    %c0_38 = arith.constant 0 : index
    %166 = vector.load %arg5[%165, %c0_37, %c0_38] : memref<8x2x64xf32, #tpu.memory_space<vmem>>, vector<1x2x32xf32>
    tpu.vector_store %arg5[%165, %c0_37, %c0_38], %164 {strides = array<i32>} : memref<8x2x64xf32, #tpu.memory_space<vmem>>, vector<1x2x32xf32>,
    %167 = arith.index_cast %112 : i32 to index
    %c0_39 = arith.constant 0 : index
    %c0_40 = arith.constant 0 : index
    %168 = vector.load %arg1[%167, %c0_39, %c0_40] : memref<8x2x256xf32, #tpu.memory_space<vmem>>, vector<1x2x256xf32>
    %169 = vector.shape_cast %168 : vector<1x2x256xf32> to vector<2x256xf32>
    %170 = vector.extract_strided_slice %169 {offsets = [0, 128], sizes = [2, 128], strides = [1, 1]} : vector<2x256xf32> to vector<2x128xf32>
    %171 = arith.truncf %99 : vector<2x32xf32> to vector<2x32xbf16>
    %cst_41 = arith.constant dense<0.000000e+00> : vector<2x128xf32>
    %172 = tpu.matmul %171, %1, %cst_41 {dimension_numbers = #tpu.dot_dimension_numbers<[1], [0], [0], [1], [0, 0, 1, 1], [], []>} : vector<2x32xbf16>, vector<32x128xbf16>, vector<2x128xf32> -> vector<2x128xf32>
    %173 = arith.addf %170, %172 : vector<2x128xf32>
    %174 = vector.extract_strided_slice %173 {offsets = [0, 0], sizes = [2, 32], strides = [1, 1]} : vector<2x128xf32> to vector<2x32xf32>
    %175 = arith.negf %174 : vector<2x32xf32>
    %176 = math.exp %175 : vector<2x32xf32>
    %cst_42 = arith.constant 1.000000e+00 : f32
    %177 = vector.broadcast %cst_42 : f32 to vector<2x32xf32>
    %178 = arith.addf %177, %176 : vector<2x32xf32>
    %179 = arith.divf %177, %178 : vector<2x32xf32>
    %180 = vector.extract_strided_slice %173 {offsets = [0, 32], sizes = [2, 32], strides = [1, 1]} : vector<2x128xf32> to vector<2x32xf32>
    %181 = arith.negf %180 : vector<2x32xf32>
    %182 = math.exp %181 : vector<2x32xf32>
    %cst_43 = arith.constant 1.000000e+00 : f32
    %183 = vector.broadcast %cst_43 : f32 to vector<2x32xf32>
    %184 = arith.addf %183, %182 : vector<2x32xf32>
    %185 = arith.divf %183, %184 : vector<2x32xf32>
    %186 = vector.extract_strided_slice %173 {offsets = [0, 64], sizes = [2, 32], strides = [1, 1]} : vector<2x128xf32> to vector<2x32xf32>
    %187 = math.tanh %186 : vector<2x32xf32>
    %188 = vector.extract_strided_slice %173 {offsets = [0, 96], sizes = [2, 32], strides = [1, 1]} : vector<2x128xf32> to vector<2x32xf32>
    %189 = arith.negf %188 : vector<2x32xf32>
    %190 = math.exp %189 : vector<2x32xf32>
    %cst_44 = arith.constant 1.000000e+00 : f32
    %191 = vector.broadcast %cst_44 : f32 to vector<2x32xf32>
    %192 = arith.addf %191, %190 : vector<2x32xf32>
    %193 = arith.divf %191, %192 : vector<2x32xf32>
    %194 = arith.mulf %185, %106 : vector<2x32xf32>
    %195 = arith.mulf %179, %187 : vector<2x32xf32>
    %196 = arith.addf %194, %195 : vector<2x32xf32>
    %197 = math.tanh %196 : vector<2x32xf32>
    %198 = arith.mulf %193, %197 : vector<2x32xf32>
    %199 = arith.index_cast %112 : i32 to index
    %c0_45 = arith.constant 0 : index
    %c0_46 = arith.constant 0 : index
    %200 = vector.load %arg4[%199, %c0_45, %c0_46] : memref<8x2x1xf32, #tpu.memory_space<vmem>>, vector<1x2x1xf32>
    %201 = vector.shape_cast %200 : vector<1x2x1xf32> to vector<2x1xf32>
    %202 = vector.broadcast %201 : vector<2x1xf32> to vector<2x32xf32>
    %203 = arith.mulf %202, %198 : vector<2x32xf32>
    %cst_47 = arith.constant 1.000000e+00 : f32
    %204 = vector.broadcast %cst_47 : f32 to vector<2x1xf32>
    %205 = arith.subf %204, %201 : vector<2x1xf32>
    %206 = vector.broadcast %205 : vector<2x1xf32> to vector<2x32xf32>
    %207 = arith.mulf %206, %99 : vector<2x32xf32>
    %208 = arith.addf %203, %207 : vector<2x32xf32>
    %209 = vector.broadcast %201 : vector<2x1xf32> to vector<2x32xf32>
    %210 = arith.mulf %209, %196 : vector<2x32xf32>
    %cst_48 = arith.constant 1.000000e+00 : f32
    %211 = vector.broadcast %cst_48 : f32 to vector<2x1xf32>
    %212 = arith.subf %211, %201 : vector<2x1xf32>
    %213 = vector.broadcast %212 : vector<2x1xf32> to vector<2x32xf32>
    %214 = arith.mulf %213, %106 : vector<2x32xf32>
    %215 = arith.addf %210, %214 : vector<2x32xf32>
    %216 = vector.broadcast %201 : vector<2x1xf32> to vector<2x32xf32>
    %217 = arith.mulf %216, %198 : vector<2x32xf32>
    %218 = vector.shape_cast %217 : vector<2x32xf32> to vector<1x2x32xf32>
    %219 = arith.index_cast %112 : i32 to index
    %c0_49 = arith.constant 0 : index
    %c32_50 = arith.constant 32 : index
    %220 = vector.load %arg5[%219, %c0_49, %c32_50] : memref<8x2x64xf32, #tpu.memory_space<vmem>>, vector<1x2x32xf32>
    tpu.vector_store %arg5[%219, %c0_49, %c32_50], %218 {strides = array<i32>} : memref<8x2x64xf32, #tpu.memory_space<vmem>>, vector<1x2x32xf32>,
    %c2_i32 = arith.constant 2 : i32
    %c7_i32_51 = arith.constant 7 : i32
    %221 = arith.subi %c7_i32_51, %c2_i32 : i32
    %222 = arith.index_cast %c2_i32 : i32 to index
    %c0_52 = arith.constant 0 : index
    %c0_53 = arith.constant 0 : index
    %223 = vector.load %arg1[%222, %c0_52, %c0_53] : memref<8x2x256xf32, #tpu.memory_space<vmem>>, vector<1x2x256xf32>
    %224 = vector.shape_cast %223 : vector<1x2x256xf32> to vector<2x256xf32>
    %225 = vector.extract_strided_slice %224 {offsets = [0, 0], sizes = [2, 128], strides = [1, 1]} : vector<2x256xf32> to vector<2x128xf32>
    %226 = arith.truncf %154 : vector<2x32xf32> to vector<2x32xbf16>
    %cst_54 = arith.constant dense<0.000000e+00> : vector<2x128xf32>
    %227 = tpu.matmul %226, %0, %cst_54 {dimension_numbers = #tpu.dot_dimension_numbers<[1], [0], [0], [1], [0, 0, 1, 1], [], []>} : vector<2x32xbf16>, vector<32x128xbf16>, vector<2x128xf32> -> vector<2x128xf32>
    %228 = arith.addf %225, %227 : vector<2x128xf32>
    %229 = vector.extract_strided_slice %228 {offsets = [0, 0], sizes = [2, 32], strides = [1, 1]} : vector<2x128xf32> to vector<2x32xf32>
    %230 = arith.negf %229 : vector<2x32xf32>
    %231 = math.exp %230 : vector<2x32xf32>
    %cst_55 = arith.constant 1.000000e+00 : f32
    %232 = vector.broadcast %cst_55 : f32 to vector<2x32xf32>
    %233 = arith.addf %232, %231 : vector<2x32xf32>
    %234 = arith.divf %232, %233 : vector<2x32xf32>
    %235 = vector.extract_strided_slice %228 {offsets = [0, 32], sizes = [2, 32], strides = [1, 1]} : vector<2x128xf32> to vector<2x32xf32>
    %236 = arith.negf %235 : vector<2x32xf32>
    %237 = math.exp %236 : vector<2x32xf32>
    %cst_56 = arith.constant 1.000000e+00 : f32
    %238 = vector.broadcast %cst_56 : f32 to vector<2x32xf32>
    %239 = arith.addf %238, %237 : vector<2x32xf32>
    %240 = arith.divf %238, %239 : vector<2x32xf32>
    %241 = vector.extract_strided_slice %228 {offsets = [0, 64], sizes = [2, 32], strides = [1, 1]} : vector<2x128xf32> to vector<2x32xf32>
    %242 = math.tanh %241 : vector<2x32xf32>
    %243 = vector.extract_strided_slice %228 {offsets = [0, 96], sizes = [2, 32], strides = [1, 1]} : vector<2x128xf32> to vector<2x32xf32>
    %244 = arith.negf %243 : vector<2x32xf32>
    %245 = math.exp %244 : vector<2x32xf32>
    %cst_57 = arith.constant 1.000000e+00 : f32
    %246 = vector.broadcast %cst_57 : f32 to vector<2x32xf32>
    %247 = arith.addf %246, %245 : vector<2x32xf32>
    %248 = arith.divf %246, %247 : vector<2x32xf32>
    %249 = arith.mulf %240, %161 : vector<2x32xf32>
    %250 = arith.mulf %234, %242 : vector<2x32xf32>
    %251 = arith.addf %249, %250 : vector<2x32xf32>
    %252 = math.tanh %251 : vector<2x32xf32>
    %253 = arith.mulf %248, %252 : vector<2x32xf32>
    %254 = arith.index_cast %c2_i32 : i32 to index
    %c0_58 = arith.constant 0 : index
    %c0_59 = arith.constant 0 : index
    %255 = vector.load %arg4[%254, %c0_58, %c0_59] : memref<8x2x1xf32, #tpu.memory_space<vmem>>, vector<1x2x1xf32>
    %256 = vector.shape_cast %255 : vector<1x2x1xf32> to vector<2x1xf32>
    %257 = vector.broadcast %256 : vector<2x1xf32> to vector<2x32xf32>
    %258 = arith.mulf %257, %253 : vector<2x32xf32>
    %cst_60 = arith.constant 1.000000e+00 : f32
    %259 = vector.broadcast %cst_60 : f32 to vector<2x1xf32>
    %260 = arith.subf %259, %256 : vector<2x1xf32>
    %261 = vector.broadcast %260 : vector<2x1xf32> to vector<2x32xf32>
    %262 = arith.mulf %261, %154 : vector<2x32xf32>
    %263 = arith.addf %258, %262 : vector<2x32xf32>
    %264 = vector.broadcast %256 : vector<2x1xf32> to vector<2x32xf32>
    %265 = arith.mulf %264, %251 : vector<2x32xf32>
    %cst_61 = arith.constant 1.000000e+00 : f32
    %266 = vector.broadcast %cst_61 : f32 to vector<2x1xf32>
    %267 = arith.subf %266, %256 : vector<2x1xf32>
    %268 = vector.broadcast %267 : vector<2x1xf32> to vector<2x32xf32>
    %269 = arith.mulf %268, %161 : vector<2x32xf32>
    %270 = arith.addf %265, %269 : vector<2x32xf32>
    %271 = vector.broadcast %256 : vector<2x1xf32> to vector<2x32xf32>
    %272 = arith.mulf %271, %253 : vector<2x32xf32>
    %273 = vector.shape_cast %272 : vector<2x32xf32> to vector<1x2x32xf32>
    %274 = arith.index_cast %c2_i32 : i32 to index
    %c0_62 = arith.constant 0 : index
    %c0_63 = arith.constant 0 : index
    %275 = vector.load %arg5[%274, %c0_62, %c0_63] : memref<8x2x64xf32, #tpu.memory_space<vmem>>, vector<1x2x32xf32>
    tpu.vector_store %arg5[%274, %c0_62, %c0_63], %273 {strides = array<i32>} : memref<8x2x64xf32, #tpu.memory_space<vmem>>, vector<1x2x32xf32>,
    %276 = arith.index_cast %221 : i32 to index
    %c0_64 = arith.constant 0 : index
    %c0_65 = arith.constant 0 : index
    %277 = vector.load %arg1[%276, %c0_64, %c0_65] : memref<8x2x256xf32, #tpu.memory_space<vmem>>, vector<1x2x256xf32>
    %278 = vector.shape_cast %277 : vector<1x2x256xf32> to vector<2x256xf32>
    %279 = vector.extract_strided_slice %278 {offsets = [0, 128], sizes = [2, 128], strides = [1, 1]} : vector<2x256xf32> to vector<2x128xf32>
    %280 = arith.truncf %208 : vector<2x32xf32> to vector<2x32xbf16>
    %cst_66 = arith.constant dense<0.000000e+00> : vector<2x128xf32>
    %281 = tpu.matmul %280, %1, %cst_66 {dimension_numbers = #tpu.dot_dimension_numbers<[1], [0], [0], [1], [0, 0, 1, 1], [], []>} : vector<2x32xbf16>, vector<32x128xbf16>, vector<2x128xf32> -> vector<2x128xf32>
    %282 = arith.addf %279, %281 : vector<2x128xf32>
    %283 = vector.extract_strided_slice %282 {offsets = [0, 0], sizes = [2, 32], strides = [1, 1]} : vector<2x128xf32> to vector<2x32xf32>
    %284 = arith.negf %283 : vector<2x32xf32>
    %285 = math.exp %284 : vector<2x32xf32>
    %cst_67 = arith.constant 1.000000e+00 : f32
    %286 = vector.broadcast %cst_67 : f32 to vector<2x32xf32>
    %287 = arith.addf %286, %285 : vector<2x32xf32>
    %288 = arith.divf %286, %287 : vector<2x32xf32>
    %289 = vector.extract_strided_slice %282 {offsets = [0, 32], sizes = [2, 32], strides = [1, 1]} : vector<2x128xf32> to vector<2x32xf32>
    %290 = arith.negf %289 : vector<2x32xf32>
    %291 = math.exp %290 : vector<2x32xf32>
    %cst_68 = arith.constant 1.000000e+00 : f32
    %292 = vector.broadcast %cst_68 : f32 to vector<2x32xf32>
    %293 = arith.addf %292, %291 : vector<2x32xf32>
    %294 = arith.divf %292, %293 : vector<2x32xf32>
    %295 = vector.extract_strided_slice %282 {offsets = [0, 64], sizes = [2, 32], strides = [1, 1]} : vector<2x128xf32> to vector<2x32xf32>
    %296 = math.tanh %295 : vector<2x32xf32>
    %297 = vector.extract_strided_slice %282 {offsets = [0, 96], sizes = [2, 32], strides = [1, 1]} : vector<2x128xf32> to vector<2x32xf32>
    %298 = arith.negf %297 : vector<2x32xf32>
    %299 = math.exp %298 : vector<2x32xf32>
    %cst_69 = arith.constant 1.000000e+00 : f32
    %300 = vector.broadcast %cst_69 : f32 to vector<2x32xf32>
    %301 = arith.addf %300, %299 : vector<2x32xf32>
    %302 = arith.divf %300, %301 : vector<2x32xf32>
    %303 = arith.mulf %294, %215 : vector<2x32xf32>
    %304 = arith.mulf %288, %296 : vector<2x32xf32>
    %305 = arith.addf %303, %304 : vector<2x32xf32>
    %306 = math.tanh %305 : vector<2x32xf32>
    %307 = arith.mulf %302, %306 : vector<2x32xf32>
    %308 = arith.index_cast %221 : i32 to index
    %c0_70 = arith.constant 0 : index
    %c0_71 = arith.constant 0 : index
    %309 = vector.load %arg4[%308, %c0_70, %c0_71] : memref<8x2x1xf32, #tpu.memory_space<vmem>>, vector<1x2x1xf32>
    %310 = vector.shape_cast %309 : vector<1x2x1xf32> to vector<2x1xf32>
    %311 = vector.broadcast %310 : vector<2x1xf32> to vector<2x32xf32>
    %312 = arith.mulf %311, %307 : vector<2x32xf32>
    %cst_72 = arith.constant 1.000000e+00 : f32
    %313 = vector.broadcast %cst_72 : f32 to vector<2x1xf32>
    %314 = arith.subf %313, %310 : vector<2x1xf32>
    %315 = vector.broadcast %314 : vector<2x1xf32> to vector<2x32xf32>
    %316 = arith.mulf %315, %208 : vector<2x32xf32>
    %317 = arith.addf %312, %316 : vector<2x32xf32>
    %318 = vector.broadcast %310 : vector<2x1xf32> to vector<2x32xf32>
    %319 = arith.mulf %318, %305 : vector<2x32xf32>
    %cst_73 = arith.constant 1.000000e+00 : f32
    %320 = vector.broadcast %cst_73 : f32 to vector<2x1xf32>
    %321 = arith.subf %320, %310 : vector<2x1xf32>
    %322 = vector.broadcast %321 : vector<2x1xf32> to vector<2x32xf32>
    %323 = arith.mulf %322, %215 : vector<2x32xf32>
    %324 = arith.addf %319, %323 : vector<2x32xf32>
    %325 = vector.broadcast %310 : vector<2x1xf32> to vector<2x32xf32>
    %326 = arith.mulf %325, %307 : vector<2x32xf32>
    %327 = vector.shape_cast %326 : vector<2x32xf32> to vector<1x2x32xf32>
    %328 = arith.index_cast %221 : i32 to index
    %c0_74 = arith.constant 0 : index
    %c32_75 = arith.constant 32 : index
    %329 = vector.load %arg5[%328, %c0_74, %c32_75] : memref<8x2x64xf32, #tpu.memory_space<vmem>>, vector<1x2x32xf32>
    tpu.vector_store %arg5[%328, %c0_74, %c32_75], %327 {strides = array<i32>} : memref<8x2x64xf32, #tpu.memory_space<vmem>>, vector<1x2x32xf32>,
    %c3_i32 = arith.constant 3 : i32
    %c7_i32_76 = arith.constant 7 : i32
    %330 = arith.subi %c7_i32_76, %c3_i32 : i32
    %331 = arith.index_cast %c3_i32 : i32 to index
    %c0_77 = arith.constant 0 : index
    %c0_78 = arith.constant 0 : index
    %332 = vector.load %arg1[%331, %c0_77, %c0_78] : memref<8x2x256xf32, #tpu.memory_space<vmem>>, vector<1x2x256xf32>
    %333 = vector.shape_cast %332 : vector<1x2x256xf32> to vector<2x256xf32>
    %334 = vector.extract_strided_slice %333 {offsets = [0, 0], sizes = [2, 128], strides = [1, 1]} : vector<2x256xf32> to vector<2x128xf32>
    %335 = arith.truncf %263 : vector<2x32xf32> to vector<2x32xbf16>
    %cst_79 = arith.constant dense<0.000000e+00> : vector<2x128xf32>
    %336 = tpu.matmul %335, %0, %cst_79 {dimension_numbers = #tpu.dot_dimension_numbers<[1], [0], [0], [1], [0, 0, 1, 1], [], []>} : vector<2x32xbf16>, vector<32x128xbf16>, vector<2x128xf32> -> vector<2x128xf32>
    %337 = arith.addf %334, %336 : vector<2x128xf32>
    %338 = vector.extract_strided_slice %337 {offsets = [0, 0], sizes = [2, 32], strides = [1, 1]} : vector<2x128xf32> to vector<2x32xf32>
    %339 = arith.negf %338 : vector<2x32xf32>
    %340 = math.exp %339 : vector<2x32xf32>
    %cst_80 = arith.constant 1.000000e+00 : f32
    %341 = vector.broadcast %cst_80 : f32 to vector<2x32xf32>
    %342 = arith.addf %341, %340 : vector<2x32xf32>
    %343 = arith.divf %341, %342 : vector<2x32xf32>
    %344 = vector.extract_strided_slice %337 {offsets = [0, 32], sizes = [2, 32], strides = [1, 1]} : vector<2x128xf32> to vector<2x32xf32>
    %345 = arith.negf %344 : vector<2x32xf32>
    %346 = math.exp %345 : vector<2x32xf32>
    %cst_81 = arith.constant 1.000000e+00 : f32
    %347 = vector.broadcast %cst_81 : f32 to vector<2x32xf32>
    %348 = arith.addf %347, %346 : vector<2x32xf32>
    %349 = arith.divf %347, %348 : vector<2x32xf32>
    %350 = vector.extract_strided_slice %337 {offsets = [0, 64], sizes = [2, 32], strides = [1, 1]} : vector<2x128xf32> to vector<2x32xf32>
    %351 = math.tanh %350 : vector<2x32xf32>
    %352 = vector.extract_strided_slice %337 {offsets = [0, 96], sizes = [2, 32], strides = [1, 1]} : vector<2x128xf32> to vector<2x32xf32>
    %353 = arith.negf %352 : vector<2x32xf32>
    %354 = math.exp %353 : vector<2x32xf32>
    %cst_82 = arith.constant 1.000000e+00 : f32
    %355 = vector.broadcast %cst_82 : f32 to vector<2x32xf32>
    %356 = arith.addf %355, %354 : vector<2x32xf32>
    %357 = arith.divf %355, %356 : vector<2x32xf32>
    %358 = arith.mulf %349, %270 : vector<2x32xf32>
    %359 = arith.mulf %343, %351 : vector<2x32xf32>
    %360 = arith.addf %358, %359 : vector<2x32xf32>
    %361 = math.tanh %360 : vector<2x32xf32>
    %362 = arith.mulf %357, %361 : vector<2x32xf32>
    %363 = arith.index_cast %c3_i32 : i32 to index
    %c0_83 = arith.constant 0 : index
    %c0_84 = arith.constant 0 : index
    %364 = vector.load %arg4[%363, %c0_83, %c0_84] : memref<8x2x1xf32, #tpu.memory_space<vmem>>, vector<1x2x1xf32>
    %365 = vector.shape_cast %364 : vector<1x2x1xf32> to vector<2x1xf32>
    %366 = vector.broadcast %365 : vector<2x1xf32> to vector<2x32xf32>
    %367 = arith.mulf %366, %362 : vector<2x32xf32>
    %cst_85 = arith.constant 1.000000e+00 : f32
    %368 = vector.broadcast %cst_85 : f32 to vector<2x1xf32>
    %369 = arith.subf %368, %365 : vector<2x1xf32>
    %370 = vector.broadcast %369 : vector<2x1xf32> to vector<2x32xf32>
    %371 = arith.mulf %370, %263 : vector<2x32xf32>
    %372 = arith.addf %367, %371 : vector<2x32xf32>
    %373 = vector.broadcast %365 : vector<2x1xf32> to vector<2x32xf32>
    %374 = arith.mulf %373, %360 : vector<2x32xf32>
    %cst_86 = arith.constant 1.000000e+00 : f32
    %375 = vector.broadcast %cst_86 : f32 to vector<2x1xf32>
    %376 = arith.subf %375, %365 : vector<2x1xf32>
    %377 = vector.broadcast %376 : vector<2x1xf32> to vector<2x32xf32>
    %378 = arith.mulf %377, %270 : vector<2x32xf32>
    %379 = arith.addf %374, %378 : vector<2x32xf32>
    %380 = vector.broadcast %365 : vector<2x1xf32> to vector<2x32xf32>
    %381 = arith.mulf %380, %362 : vector<2x32xf32>
    %382 = vector.shape_cast %381 : vector<2x32xf32> to vector<1x2x32xf32>
    %383 = arith.index_cast %c3_i32 : i32 to index
    %c0_87 = arith.constant 0 : index
    %c0_88 = arith.constant 0 : index
    %384 = vector.load %arg5[%383, %c0_87, %c0_88] : memref<8x2x64xf32, #tpu.memory_space<vmem>>, vector<1x2x32xf32>
    tpu.vector_store %arg5[%383, %c0_87, %c0_88], %382 {strides = array<i32>} : memref<8x2x64xf32, #tpu.memory_space<vmem>>, vector<1x2x32xf32>,
    %385 = arith.index_cast %330 : i32 to index
    %c0_89 = arith.constant 0 : index
    %c0_90 = arith.constant 0 : index
    %386 = vector.load %arg1[%385, %c0_89, %c0_90] : memref<8x2x256xf32, #tpu.memory_space<vmem>>, vector<1x2x256xf32>
    %387 = vector.shape_cast %386 : vector<1x2x256xf32> to vector<2x256xf32>
    %388 = vector.extract_strided_slice %387 {offsets = [0, 128], sizes = [2, 128], strides = [1, 1]} : vector<2x256xf32> to vector<2x128xf32>
    %389 = arith.truncf %317 : vector<2x32xf32> to vector<2x32xbf16>
    %cst_91 = arith.constant dense<0.000000e+00> : vector<2x128xf32>
    %390 = tpu.matmul %389, %1, %cst_91 {dimension_numbers = #tpu.dot_dimension_numbers<[1], [0], [0], [1], [0, 0, 1, 1], [], []>} : vector<2x32xbf16>, vector<32x128xbf16>, vector<2x128xf32> -> vector<2x128xf32>
    %391 = arith.addf %388, %390 : vector<2x128xf32>
    %392 = vector.extract_strided_slice %391 {offsets = [0, 0], sizes = [2, 32], strides = [1, 1]} : vector<2x128xf32> to vector<2x32xf32>
    %393 = arith.negf %392 : vector<2x32xf32>
    %394 = math.exp %393 : vector<2x32xf32>
    %cst_92 = arith.constant 1.000000e+00 : f32
    %395 = vector.broadcast %cst_92 : f32 to vector<2x32xf32>
    %396 = arith.addf %395, %394 : vector<2x32xf32>
    %397 = arith.divf %395, %396 : vector<2x32xf32>
    %398 = vector.extract_strided_slice %391 {offsets = [0, 32], sizes = [2, 32], strides = [1, 1]} : vector<2x128xf32> to vector<2x32xf32>
    %399 = arith.negf %398 : vector<2x32xf32>
    %400 = math.exp %399 : vector<2x32xf32>
    %cst_93 = arith.constant 1.000000e+00 : f32
    %401 = vector.broadcast %cst_93 : f32 to vector<2x32xf32>
    %402 = arith.addf %401, %400 : vector<2x32xf32>
    %403 = arith.divf %401, %402 : vector<2x32xf32>
    %404 = vector.extract_strided_slice %391 {offsets = [0, 64], sizes = [2, 32], strides = [1, 1]} : vector<2x128xf32> to vector<2x32xf32>
    %405 = math.tanh %404 : vector<2x32xf32>
    %406 = vector.extract_strided_slice %391 {offsets = [0, 96], sizes = [2, 32], strides = [1, 1]} : vector<2x128xf32> to vector<2x32xf32>
    %407 = arith.negf %406 : vector<2x32xf32>
    %408 = math.exp %407 : vector<2x32xf32>
    %cst_94 = arith.constant 1.000000e+00 : f32
    %409 = vector.broadcast %cst_94 : f32 to vector<2x32xf32>
    %410 = arith.addf %409, %408 : vector<2x32xf32>
    %411 = arith.divf %409, %410 : vector<2x32xf32>
    %412 = arith.mulf %403, %324 : vector<2x32xf32>
    %413 = arith.mulf %397, %405 : vector<2x32xf32>
    %414 = arith.addf %412, %413 : vector<2x32xf32>
    %415 = math.tanh %414 : vector<2x32xf32>
    %416 = arith.mulf %411, %415 : vector<2x32xf32>
    %417 = arith.index_cast %330 : i32 to index
    %c0_95 = arith.constant 0 : index
    %c0_96 = arith.constant 0 : index
    %418 = vector.load %arg4[%417, %c0_95, %c0_96] : memref<8x2x1xf32, #tpu.memory_space<vmem>>, vector<1x2x1xf32>
    %419 = vector.shape_cast %418 : vector<1x2x1xf32> to vector<2x1xf32>
    %420 = vector.broadcast %419 : vector<2x1xf32> to vector<2x32xf32>
    %421 = arith.mulf %420, %416 : vector<2x32xf32>
    %cst_97 = arith.constant 1.000000e+00 : f32
    %422 = vector.broadcast %cst_97 : f32 to vector<2x1xf32>
    %423 = arith.subf %422, %419 : vector<2x1xf32>
    %424 = vector.broadcast %423 : vector<2x1xf32> to vector<2x32xf32>
    %425 = arith.mulf %424, %317 : vector<2x32xf32>
    %426 = arith.addf %421, %425 : vector<2x32xf32>
    %427 = vector.broadcast %419 : vector<2x1xf32> to vector<2x32xf32>
    %428 = arith.mulf %427, %414 : vector<2x32xf32>
    %cst_98 = arith.constant 1.000000e+00 : f32
    %429 = vector.broadcast %cst_98 : f32 to vector<2x1xf32>
    %430 = arith.subf %429, %419 : vector<2x1xf32>
    %431 = vector.broadcast %430 : vector<2x1xf32> to vector<2x32xf32>
    %432 = arith.mulf %431, %324 : vector<2x32xf32>
    %433 = arith.addf %428, %432 : vector<2x32xf32>
    %434 = vector.broadcast %419 : vector<2x1xf32> to vector<2x32xf32>
    %435 = arith.mulf %434, %416 : vector<2x32xf32>
    %436 = vector.shape_cast %435 : vector<2x32xf32> to vector<1x2x32xf32>
    %437 = arith.index_cast %330 : i32 to index
    %c0_99 = arith.constant 0 : index
    %c32_100 = arith.constant 32 : index
    %438 = vector.load %arg5[%437, %c0_99, %c32_100] : memref<8x2x64xf32, #tpu.memory_space<vmem>>, vector<1x2x32xf32>
    tpu.vector_store %arg5[%437, %c0_99, %c32_100], %436 {strides = array<i32>} : memref<8x2x64xf32, #tpu.memory_space<vmem>>, vector<1x2x32xf32>,
    %c4_i32 = arith.constant 4 : i32
    %c7_i32_101 = arith.constant 7 : i32
    %439 = arith.subi %c7_i32_101, %c4_i32 : i32
    %440 = arith.index_cast %c4_i32 : i32 to index
    %c0_102 = arith.constant 0 : index
    %c0_103 = arith.constant 0 : index
    %441 = vector.load %arg1[%440, %c0_102, %c0_103] : memref<8x2x256xf32, #tpu.memory_space<vmem>>, vector<1x2x256xf32>
    %442 = vector.shape_cast %441 : vector<1x2x256xf32> to vector<2x256xf32>
    %443 = vector.extract_strided_slice %442 {offsets = [0, 0], sizes = [2, 128], strides = [1, 1]} : vector<2x256xf32> to vector<2x128xf32>
    %444 = arith.truncf %372 : vector<2x32xf32> to vector<2x32xbf16>
    %cst_104 = arith.constant dense<0.000000e+00> : vector<2x128xf32>
    %445 = tpu.matmul %444, %0, %cst_104 {dimension_numbers = #tpu.dot_dimension_numbers<[1], [0], [0], [1], [0, 0, 1, 1], [], []>} : vector<2x32xbf16>, vector<32x128xbf16>, vector<2x128xf32> -> vector<2x128xf32>
    %446 = arith.addf %443, %445 : vector<2x128xf32>
    %447 = vector.extract_strided_slice %446 {offsets = [0, 0], sizes = [2, 32], strides = [1, 1]} : vector<2x128xf32> to vector<2x32xf32>
    %448 = arith.negf %447 : vector<2x32xf32>
    %449 = math.exp %448 : vector<2x32xf32>
    %cst_105 = arith.constant 1.000000e+00 : f32
    %450 = vector.broadcast %cst_105 : f32 to vector<2x32xf32>
    %451 = arith.addf %450, %449 : vector<2x32xf32>
    %452 = arith.divf %450, %451 : vector<2x32xf32>
    %453 = vector.extract_strided_slice %446 {offsets = [0, 32], sizes = [2, 32], strides = [1, 1]} : vector<2x128xf32> to vector<2x32xf32>
    %454 = arith.negf %453 : vector<2x32xf32>
    %455 = math.exp %454 : vector<2x32xf32>
    %cst_106 = arith.constant 1.000000e+00 : f32
    %456 = vector.broadcast %cst_106 : f32 to vector<2x32xf32>
    %457 = arith.addf %456, %455 : vector<2x32xf32>
    %458 = arith.divf %456, %457 : vector<2x32xf32>
    %459 = vector.extract_strided_slice %446 {offsets = [0, 64], sizes = [2, 32], strides = [1, 1]} : vector<2x128xf32> to vector<2x32xf32>
    %460 = math.tanh %459 : vector<2x32xf32>
    %461 = vector.extract_strided_slice %446 {offsets = [0, 96], sizes = [2, 32], strides = [1, 1]} : vector<2x128xf32> to vector<2x32xf32>
    %462 = arith.negf %461 : vector<2x32xf32>
    %463 = math.exp %462 : vector<2x32xf32>
    %cst_107 = arith.constant 1.000000e+00 : f32
    %464 = vector.broadcast %cst_107 : f32 to vector<2x32xf32>
    %465 = arith.addf %464, %463 : vector<2x32xf32>
    %466 = arith.divf %464, %465 : vector<2x32xf32>
    %467 = arith.mulf %458, %379 : vector<2x32xf32>
    %468 = arith.mulf %452, %460 : vector<2x32xf32>
    %469 = arith.addf %467, %468 : vector<2x32xf32>
    %470 = math.tanh %469 : vector<2x32xf32>
    %471 = arith.mulf %466, %470 : vector<2x32xf32>
    %472 = arith.index_cast %c4_i32 : i32 to index
    %c0_108 = arith.constant 0 : index
    %c0_109 = arith.constant 0 : index
    %473 = vector.load %arg4[%472, %c0_108, %c0_109] : memref<8x2x1xf32, #tpu.memory_space<vmem>>, vector<1x2x1xf32>
    %474 = vector.shape_cast %473 : vector<1x2x1xf32> to vector<2x1xf32>
    %475 = vector.broadcast %474 : vector<2x1xf32> to vector<2x32xf32>
    %476 = arith.mulf %475, %471 : vector<2x32xf32>
    %cst_110 = arith.constant 1.000000e+00 : f32
    %477 = vector.broadcast %cst_110 : f32 to vector<2x1xf32>
    %478 = arith.subf %477, %474 : vector<2x1xf32>
    %479 = vector.broadcast %478 : vector<2x1xf32> to vector<2x32xf32>
    %480 = arith.mulf %479, %372 : vector<2x32xf32>
    %481 = arith.addf %476, %480 : vector<2x32xf32>
    %482 = vector.broadcast %474 : vector<2x1xf32> to vector<2x32xf32>
    %483 = arith.mulf %482, %469 : vector<2x32xf32>
    %cst_111 = arith.constant 1.000000e+00 : f32
    %484 = vector.broadcast %cst_111 : f32 to vector<2x1xf32>
    %485 = arith.subf %484, %474 : vector<2x1xf32>
    %486 = vector.broadcast %485 : vector<2x1xf32> to vector<2x32xf32>
    %487 = arith.mulf %486, %379 : vector<2x32xf32>
    %488 = arith.addf %483, %487 : vector<2x32xf32>
    %489 = vector.broadcast %474 : vector<2x1xf32> to vector<2x32xf32>
    %490 = arith.mulf %489, %471 : vector<2x32xf32>
    %491 = vector.shape_cast %490 : vector<2x32xf32> to vector<1x2x32xf32>
    %492 = arith.index_cast %c4_i32 : i32 to index
    %c0_112 = arith.constant 0 : index
    %c0_113 = arith.constant 0 : index
    %493 = vector.load %arg5[%492, %c0_112, %c0_113] : memref<8x2x64xf32, #tpu.memory_space<vmem>>, vector<1x2x32xf32>
    tpu.vector_store %arg5[%492, %c0_112, %c0_113], %491 {strides = array<i32>} : memref<8x2x64xf32, #tpu.memory_space<vmem>>, vector<1x2x32xf32>,
    %494 = arith.index_cast %439 : i32 to index
    %c0_114 = arith.constant 0 : index
    %c0_115 = arith.constant 0 : index
    %495 = vector.load %arg1[%494, %c0_114, %c0_115] : memref<8x2x256xf32, #tpu.memory_space<vmem>>, vector<1x2x256xf32>
    %496 = vector.shape_cast %495 : vector<1x2x256xf32> to vector<2x256xf32>
    %497 = vector.extract_strided_slice %496 {offsets = [0, 128], sizes = [2, 128], strides = [1, 1]} : vector<2x256xf32> to vector<2x128xf32>
    %498 = arith.truncf %426 : vector<2x32xf32> to vector<2x32xbf16>
    %cst_116 = arith.constant dense<0.000000e+00> : vector<2x128xf32>
    %499 = tpu.matmul %498, %1, %cst_116 {dimension_numbers = #tpu.dot_dimension_numbers<[1], [0], [0], [1], [0, 0, 1, 1], [], []>} : vector<2x32xbf16>, vector<32x128xbf16>, vector<2x128xf32> -> vector<2x128xf32>
    %500 = arith.addf %497, %499 : vector<2x128xf32>
    %501 = vector.extract_strided_slice %500 {offsets = [0, 0], sizes = [2, 32], strides = [1, 1]} : vector<2x128xf32> to vector<2x32xf32>
    %502 = arith.negf %501 : vector<2x32xf32>
    %503 = math.exp %502 : vector<2x32xf32>
    %cst_117 = arith.constant 1.000000e+00 : f32
    %504 = vector.broadcast %cst_117 : f32 to vector<2x32xf32>
    %505 = arith.addf %504, %503 : vector<2x32xf32>
    %506 = arith.divf %504, %505 : vector<2x32xf32>
    %507 = vector.extract_strided_slice %500 {offsets = [0, 32], sizes = [2, 32], strides = [1, 1]} : vector<2x128xf32> to vector<2x32xf32>
    %508 = arith.negf %507 : vector<2x32xf32>
    %509 = math.exp %508 : vector<2x32xf32>
    %cst_118 = arith.constant 1.000000e+00 : f32
    %510 = vector.broadcast %cst_118 : f32 to vector<2x32xf32>
    %511 = arith.addf %510, %509 : vector<2x32xf32>
    %512 = arith.divf %510, %511 : vector<2x32xf32>
    %513 = vector.extract_strided_slice %500 {offsets = [0, 64], sizes = [2, 32], strides = [1, 1]} : vector<2x128xf32> to vector<2x32xf32>
    %514 = math.tanh %513 : vector<2x32xf32>
    %515 = vector.extract_strided_slice %500 {offsets = [0, 96], sizes = [2, 32], strides = [1, 1]} : vector<2x128xf32> to vector<2x32xf32>
    %516 = arith.negf %515 : vector<2x32xf32>
    %517 = math.exp %516 : vector<2x32xf32>
    %cst_119 = arith.constant 1.000000e+00 : f32
    %518 = vector.broadcast %cst_119 : f32 to vector<2x32xf32>
    %519 = arith.addf %518, %517 : vector<2x32xf32>
    %520 = arith.divf %518, %519 : vector<2x32xf32>
    %521 = arith.mulf %512, %433 : vector<2x32xf32>
    %522 = arith.mulf %506, %514 : vector<2x32xf32>
    %523 = arith.addf %521, %522 : vector<2x32xf32>
    %524 = math.tanh %523 : vector<2x32xf32>
    %525 = arith.mulf %520, %524 : vector<2x32xf32>
    %526 = arith.index_cast %439 : i32 to index
    %c0_120 = arith.constant 0 : index
    %c0_121 = arith.constant 0 : index
    %527 = vector.load %arg4[%526, %c0_120, %c0_121] : memref<8x2x1xf32, #tpu.memory_space<vmem>>, vector<1x2x1xf32>
    %528 = vector.shape_cast %527 : vector<1x2x1xf32> to vector<2x1xf32>
    %529 = vector.broadcast %528 : vector<2x1xf32> to vector<2x32xf32>
    %530 = arith.mulf %529, %525 : vector<2x32xf32>
    %cst_122 = arith.constant 1.000000e+00 : f32
    %531 = vector.broadcast %cst_122 : f32 to vector<2x1xf32>
    %532 = arith.subf %531, %528 : vector<2x1xf32>
    %533 = vector.broadcast %532 : vector<2x1xf32> to vector<2x32xf32>
    %534 = arith.mulf %533, %426 : vector<2x32xf32>
    %535 = arith.addf %530, %534 : vector<2x32xf32>
    %536 = vector.broadcast %528 : vector<2x1xf32> to vector<2x32xf32>
    %537 = arith.mulf %536, %523 : vector<2x32xf32>
    %cst_123 = arith.constant 1.000000e+00 : f32
    %538 = vector.broadcast %cst_123 : f32 to vector<2x1xf32>
    %539 = arith.subf %538, %528 : vector<2x1xf32>
    %540 = vector.broadcast %539 : vector<2x1xf32> to vector<2x32xf32>
    %541 = arith.mulf %540, %433 : vector<2x32xf32>
    %542 = arith.addf %537, %541 : vector<2x32xf32>
    %543 = vector.broadcast %528 : vector<2x1xf32> to vector<2x32xf32>
    %544 = arith.mulf %543, %525 : vector<2x32xf32>
    %545 = vector.shape_cast %544 : vector<2x32xf32> to vector<1x2x32xf32>
    %546 = arith.index_cast %439 : i32 to index
    %c0_124 = arith.constant 0 : index
    %c32_125 = arith.constant 32 : index
    %547 = vector.load %arg5[%546, %c0_124, %c32_125] : memref<8x2x64xf32, #tpu.memory_space<vmem>>, vector<1x2x32xf32>
    tpu.vector_store %arg5[%546, %c0_124, %c32_125], %545 {strides = array<i32>} : memref<8x2x64xf32, #tpu.memory_space<vmem>>, vector<1x2x32xf32>,
    %c5_i32 = arith.constant 5 : i32
    %c7_i32_126 = arith.constant 7 : i32
    %548 = arith.subi %c7_i32_126, %c5_i32 : i32
    %549 = arith.index_cast %c5_i32 : i32 to index
    %c0_127 = arith.constant 0 : index
    %c0_128 = arith.constant 0 : index
    %550 = vector.load %arg1[%549, %c0_127, %c0_128] : memref<8x2x256xf32, #tpu.memory_space<vmem>>, vector<1x2x256xf32>
    %551 = vector.shape_cast %550 : vector<1x2x256xf32> to vector<2x256xf32>
    %552 = vector.extract_strided_slice %551 {offsets = [0, 0], sizes = [2, 128], strides = [1, 1]} : vector<2x256xf32> to vector<2x128xf32>
    %553 = arith.truncf %481 : vector<2x32xf32> to vector<2x32xbf16>
    %cst_129 = arith.constant dense<0.000000e+00> : vector<2x128xf32>
    %554 = tpu.matmul %553, %0, %cst_129 {dimension_numbers = #tpu.dot_dimension_numbers<[1], [0], [0], [1], [0, 0, 1, 1], [], []>} : vector<2x32xbf16>, vector<32x128xbf16>, vector<2x128xf32> -> vector<2x128xf32>
    %555 = arith.addf %552, %554 : vector<2x128xf32>
    %556 = vector.extract_strided_slice %555 {offsets = [0, 0], sizes = [2, 32], strides = [1, 1]} : vector<2x128xf32> to vector<2x32xf32>
    %557 = arith.negf %556 : vector<2x32xf32>
    %558 = math.exp %557 : vector<2x32xf32>
    %cst_130 = arith.constant 1.000000e+00 : f32
    %559 = vector.broadcast %cst_130 : f32 to vector<2x32xf32>
    %560 = arith.addf %559, %558 : vector<2x32xf32>
    %561 = arith.divf %559, %560 : vector<2x32xf32>
    %562 = vector.extract_strided_slice %555 {offsets = [0, 32], sizes = [2, 32], strides = [1, 1]} : vector<2x128xf32> to vector<2x32xf32>
    %563 = arith.negf %562 : vector<2x32xf32>
    %564 = math.exp %563 : vector<2x32xf32>
    %cst_131 = arith.constant 1.000000e+00 : f32
    %565 = vector.broadcast %cst_131 : f32 to vector<2x32xf32>
    %566 = arith.addf %565, %564 : vector<2x32xf32>
    %567 = arith.divf %565, %566 : vector<2x32xf32>
    %568 = vector.extract_strided_slice %555 {offsets = [0, 64], sizes = [2, 32], strides = [1, 1]} : vector<2x128xf32> to vector<2x32xf32>
    %569 = math.tanh %568 : vector<2x32xf32>
    %570 = vector.extract_strided_slice %555 {offsets = [0, 96], sizes = [2, 32], strides = [1, 1]} : vector<2x128xf32> to vector<2x32xf32>
    %571 = arith.negf %570 : vector<2x32xf32>
    %572 = math.exp %571 : vector<2x32xf32>
    %cst_132 = arith.constant 1.000000e+00 : f32
    %573 = vector.broadcast %cst_132 : f32 to vector<2x32xf32>
    %574 = arith.addf %573, %572 : vector<2x32xf32>
    %575 = arith.divf %573, %574 : vector<2x32xf32>
    %576 = arith.mulf %567, %488 : vector<2x32xf32>
    %577 = arith.mulf %561, %569 : vector<2x32xf32>
    %578 = arith.addf %576, %577 : vector<2x32xf32>
    %579 = math.tanh %578 : vector<2x32xf32>
    %580 = arith.mulf %575, %579 : vector<2x32xf32>
    %581 = arith.index_cast %c5_i32 : i32 to index
    %c0_133 = arith.constant 0 : index
    %c0_134 = arith.constant 0 : index
    %582 = vector.load %arg4[%581, %c0_133, %c0_134] : memref<8x2x1xf32, #tpu.memory_space<vmem>>, vector<1x2x1xf32>
    %583 = vector.shape_cast %582 : vector<1x2x1xf32> to vector<2x1xf32>
    %584 = vector.broadcast %583 : vector<2x1xf32> to vector<2x32xf32>
    %585 = arith.mulf %584, %580 : vector<2x32xf32>
    %cst_135 = arith.constant 1.000000e+00 : f32
    %586 = vector.broadcast %cst_135 : f32 to vector<2x1xf32>
    %587 = arith.subf %586, %583 : vector<2x1xf32>
    %588 = vector.broadcast %587 : vector<2x1xf32> to vector<2x32xf32>
    %589 = arith.mulf %588, %481 : vector<2x32xf32>
    %590 = arith.addf %585, %589 : vector<2x32xf32>
    %591 = vector.broadcast %583 : vector<2x1xf32> to vector<2x32xf32>
    %592 = arith.mulf %591, %578 : vector<2x32xf32>
    %cst_136 = arith.constant 1.000000e+00 : f32
    %593 = vector.broadcast %cst_136 : f32 to vector<2x1xf32>
    %594 = arith.subf %593, %583 : vector<2x1xf32>
    %595 = vector.broadcast %594 : vector<2x1xf32> to vector<2x32xf32>
    %596 = arith.mulf %595, %488 : vector<2x32xf32>
    %597 = arith.addf %592, %596 : vector<2x32xf32>
    %598 = vector.broadcast %583 : vector<2x1xf32> to vector<2x32xf32>
    %599 = arith.mulf %598, %580 : vector<2x32xf32>
    %600 = vector.shape_cast %599 : vector<2x32xf32> to vector<1x2x32xf32>
    %601 = arith.index_cast %c5_i32 : i32 to index
    %c0_137 = arith.constant 0 : index
    %c0_138 = arith.constant 0 : index
    %602 = vector.load %arg5[%601, %c0_137, %c0_138] : memref<8x2x64xf32, #tpu.memory_space<vmem>>, vector<1x2x32xf32>
    tpu.vector_store %arg5[%601, %c0_137, %c0_138], %600 {strides = array<i32>} : memref<8x2x64xf32, #tpu.memory_space<vmem>>, vector<1x2x32xf32>,
    %603 = arith.index_cast %548 : i32 to index
    %c0_139 = arith.constant 0 : index
    %c0_140 = arith.constant 0 : index
    %604 = vector.load %arg1[%603, %c0_139, %c0_140] : memref<8x2x256xf32, #tpu.memory_space<vmem>>, vector<1x2x256xf32>
    %605 = vector.shape_cast %604 : vector<1x2x256xf32> to vector<2x256xf32>
    %606 = vector.extract_strided_slice %605 {offsets = [0, 128], sizes = [2, 128], strides = [1, 1]} : vector<2x256xf32> to vector<2x128xf32>
    %607 = arith.truncf %535 : vector<2x32xf32> to vector<2x32xbf16>
    %cst_141 = arith.constant dense<0.000000e+00> : vector<2x128xf32>
    %608 = tpu.matmul %607, %1, %cst_141 {dimension_numbers = #tpu.dot_dimension_numbers<[1], [0], [0], [1], [0, 0, 1, 1], [], []>} : vector<2x32xbf16>, vector<32x128xbf16>, vector<2x128xf32> -> vector<2x128xf32>
    %609 = arith.addf %606, %608 : vector<2x128xf32>
    %610 = vector.extract_strided_slice %609 {offsets = [0, 0], sizes = [2, 32], strides = [1, 1]} : vector<2x128xf32> to vector<2x32xf32>
    %611 = arith.negf %610 : vector<2x32xf32>
    %612 = math.exp %611 : vector<2x32xf32>
    %cst_142 = arith.constant 1.000000e+00 : f32
    %613 = vector.broadcast %cst_142 : f32 to vector<2x32xf32>
    %614 = arith.addf %613, %612 : vector<2x32xf32>
    %615 = arith.divf %613, %614 : vector<2x32xf32>
    %616 = vector.extract_strided_slice %609 {offsets = [0, 32], sizes = [2, 32], strides = [1, 1]} : vector<2x128xf32> to vector<2x32xf32>
    %617 = arith.negf %616 : vector<2x32xf32>
    %618 = math.exp %617 : vector<2x32xf32>
    %cst_143 = arith.constant 1.000000e+00 : f32
    %619 = vector.broadcast %cst_143 : f32 to vector<2x32xf32>
    %620 = arith.addf %619, %618 : vector<2x32xf32>
    %621 = arith.divf %619, %620 : vector<2x32xf32>
    %622 = vector.extract_strided_slice %609 {offsets = [0, 64], sizes = [2, 32], strides = [1, 1]} : vector<2x128xf32> to vector<2x32xf32>
    %623 = math.tanh %622 : vector<2x32xf32>
    %624 = vector.extract_strided_slice %609 {offsets = [0, 96], sizes = [2, 32], strides = [1, 1]} : vector<2x128xf32> to vector<2x32xf32>
    %625 = arith.negf %624 : vector<2x32xf32>
    %626 = math.exp %625 : vector<2x32xf32>
    %cst_144 = arith.constant 1.000000e+00 : f32
    %627 = vector.broadcast %cst_144 : f32 to vector<2x32xf32>
    %628 = arith.addf %627, %626 : vector<2x32xf32>
    %629 = arith.divf %627, %628 : vector<2x32xf32>
    %630 = arith.mulf %621, %542 : vector<2x32xf32>
    %631 = arith.mulf %615, %623 : vector<2x32xf32>
    %632 = arith.addf %630, %631 : vector<2x32xf32>
    %633 = math.tanh %632 : vector<2x32xf32>
    %634 = arith.mulf %629, %633 : vector<2x32xf32>
    %635 = arith.index_cast %548 : i32 to index
    %c0_145 = arith.constant 0 : index
    %c0_146 = arith.constant 0 : index
    %636 = vector.load %arg4[%635, %c0_145, %c0_146] : memref<8x2x1xf32, #tpu.memory_space<vmem>>, vector<1x2x1xf32>
    %637 = vector.shape_cast %636 : vector<1x2x1xf32> to vector<2x1xf32>
    %638 = vector.broadcast %637 : vector<2x1xf32> to vector<2x32xf32>
    %639 = arith.mulf %638, %634 : vector<2x32xf32>
    %cst_147 = arith.constant 1.000000e+00 : f32
    %640 = vector.broadcast %cst_147 : f32 to vector<2x1xf32>
    %641 = arith.subf %640, %637 : vector<2x1xf32>
    %642 = vector.broadcast %641 : vector<2x1xf32> to vector<2x32xf32>
    %643 = arith.mulf %642, %535 : vector<2x32xf32>
    %644 = arith.addf %639, %643 : vector<2x32xf32>
    %645 = vector.broadcast %637 : vector<2x1xf32> to vector<2x32xf32>
    %646 = arith.mulf %645, %632 : vector<2x32xf32>
    %cst_148 = arith.constant 1.000000e+00 : f32
    %647 = vector.broadcast %cst_148 : f32 to vector<2x1xf32>
    %648 = arith.subf %647, %637 : vector<2x1xf32>
    %649 = vector.broadcast %648 : vector<2x1xf32> to vector<2x32xf32>
    %650 = arith.mulf %649, %542 : vector<2x32xf32>
    %651 = arith.addf %646, %650 : vector<2x32xf32>
    %652 = vector.broadcast %637 : vector<2x1xf32> to vector<2x32xf32>
    %653 = arith.mulf %652, %634 : vector<2x32xf32>
    %654 = vector.shape_cast %653 : vector<2x32xf32> to vector<1x2x32xf32>
    %655 = arith.index_cast %548 : i32 to index
    %c0_149 = arith.constant 0 : index
    %c32_150 = arith.constant 32 : index
    %656 = vector.load %arg5[%655, %c0_149, %c32_150] : memref<8x2x64xf32, #tpu.memory_space<vmem>>, vector<1x2x32xf32>
    tpu.vector_store %arg5[%655, %c0_149, %c32_150], %654 {strides = array<i32>} : memref<8x2x64xf32, #tpu.memory_space<vmem>>, vector<1x2x32xf32>,
    %c6_i32 = arith.constant 6 : i32
    %c7_i32_151 = arith.constant 7 : i32
    %657 = arith.subi %c7_i32_151, %c6_i32 : i32
    %658 = arith.index_cast %c6_i32 : i32 to index
    %c0_152 = arith.constant 0 : index
    %c0_153 = arith.constant 0 : index
    %659 = vector.load %arg1[%658, %c0_152, %c0_153] : memref<8x2x256xf32, #tpu.memory_space<vmem>>, vector<1x2x256xf32>
    %660 = vector.shape_cast %659 : vector<1x2x256xf32> to vector<2x256xf32>
    %661 = vector.extract_strided_slice %660 {offsets = [0, 0], sizes = [2, 128], strides = [1, 1]} : vector<2x256xf32> to vector<2x128xf32>
    %662 = arith.truncf %590 : vector<2x32xf32> to vector<2x32xbf16>
    %cst_154 = arith.constant dense<0.000000e+00> : vector<2x128xf32>
    %663 = tpu.matmul %662, %0, %cst_154 {dimension_numbers = #tpu.dot_dimension_numbers<[1], [0], [0], [1], [0, 0, 1, 1], [], []>} : vector<2x32xbf16>, vector<32x128xbf16>, vector<2x128xf32> -> vector<2x128xf32>
    %664 = arith.addf %661, %663 : vector<2x128xf32>
    %665 = vector.extract_strided_slice %664 {offsets = [0, 0], sizes = [2, 32], strides = [1, 1]} : vector<2x128xf32> to vector<2x32xf32>
    %666 = arith.negf %665 : vector<2x32xf32>
    %667 = math.exp %666 : vector<2x32xf32>
    %cst_155 = arith.constant 1.000000e+00 : f32
    %668 = vector.broadcast %cst_155 : f32 to vector<2x32xf32>
    %669 = arith.addf %668, %667 : vector<2x32xf32>
    %670 = arith.divf %668, %669 : vector<2x32xf32>
    %671 = vector.extract_strided_slice %664 {offsets = [0, 32], sizes = [2, 32], strides = [1, 1]} : vector<2x128xf32> to vector<2x32xf32>
    %672 = arith.negf %671 : vector<2x32xf32>
    %673 = math.exp %672 : vector<2x32xf32>
    %cst_156 = arith.constant 1.000000e+00 : f32
    %674 = vector.broadcast %cst_156 : f32 to vector<2x32xf32>
    %675 = arith.addf %674, %673 : vector<2x32xf32>
    %676 = arith.divf %674, %675 : vector<2x32xf32>
    %677 = vector.extract_strided_slice %664 {offsets = [0, 64], sizes = [2, 32], strides = [1, 1]} : vector<2x128xf32> to vector<2x32xf32>
    %678 = math.tanh %677 : vector<2x32xf32>
    %679 = vector.extract_strided_slice %664 {offsets = [0, 96], sizes = [2, 32], strides = [1, 1]} : vector<2x128xf32> to vector<2x32xf32>
    %680 = arith.negf %679 : vector<2x32xf32>
    %681 = math.exp %680 : vector<2x32xf32>
    %cst_157 = arith.constant 1.000000e+00 : f32
    %682 = vector.broadcast %cst_157 : f32 to vector<2x32xf32>
    %683 = arith.addf %682, %681 : vector<2x32xf32>
    %684 = arith.divf %682, %683 : vector<2x32xf32>
    %685 = arith.mulf %676, %597 : vector<2x32xf32>
    %686 = arith.mulf %670, %678 : vector<2x32xf32>
    %687 = arith.addf %685, %686 : vector<2x32xf32>
    %688 = math.tanh %687 : vector<2x32xf32>
    %689 = arith.mulf %684, %688 : vector<2x32xf32>
    %690 = arith.index_cast %c6_i32 : i32 to index
    %c0_158 = arith.constant 0 : index
    %c0_159 = arith.constant 0 : index
    %691 = vector.load %arg4[%690, %c0_158, %c0_159] : memref<8x2x1xf32, #tpu.memory_space<vmem>>, vector<1x2x1xf32>
    %692 = vector.shape_cast %691 : vector<1x2x1xf32> to vector<2x1xf32>
    %693 = vector.broadcast %692 : vector<2x1xf32> to vector<2x32xf32>
    %694 = arith.mulf %693, %689 : vector<2x32xf32>
    %cst_160 = arith.constant 1.000000e+00 : f32
    %695 = vector.broadcast %cst_160 : f32 to vector<2x1xf32>
    %696 = arith.subf %695, %692 : vector<2x1xf32>
    %697 = vector.broadcast %696 : vector<2x1xf32> to vector<2x32xf32>
    %698 = arith.mulf %697, %590 : vector<2x32xf32>
    %699 = arith.addf %694, %698 : vector<2x32xf32>
    %700 = vector.broadcast %692 : vector<2x1xf32> to vector<2x32xf32>
    %701 = arith.mulf %700, %687 : vector<2x32xf32>
    %cst_161 = arith.constant 1.000000e+00 : f32
    %702 = vector.broadcast %cst_161 : f32 to vector<2x1xf32>
    %703 = arith.subf %702, %692 : vector<2x1xf32>
    %704 = vector.broadcast %703 : vector<2x1xf32> to vector<2x32xf32>
    %705 = arith.mulf %704, %597 : vector<2x32xf32>
    %706 = arith.addf %701, %705 : vector<2x32xf32>
    %707 = vector.broadcast %692 : vector<2x1xf32> to vector<2x32xf32>
    %708 = arith.mulf %707, %689 : vector<2x32xf32>
    %709 = vector.shape_cast %708 : vector<2x32xf32> to vector<1x2x32xf32>
    %710 = arith.index_cast %c6_i32 : i32 to index
    %c0_162 = arith.constant 0 : index
    %c0_163 = arith.constant 0 : index
    %711 = vector.load %arg5[%710, %c0_162, %c0_163] : memref<8x2x64xf32, #tpu.memory_space<vmem>>, vector<1x2x32xf32>
    tpu.vector_store %arg5[%710, %c0_162, %c0_163], %709 {strides = array<i32>} : memref<8x2x64xf32, #tpu.memory_space<vmem>>, vector<1x2x32xf32>,
    %712 = arith.index_cast %657 : i32 to index
    %c0_164 = arith.constant 0 : index
    %c0_165 = arith.constant 0 : index
    %713 = vector.load %arg1[%712, %c0_164, %c0_165] : memref<8x2x256xf32, #tpu.memory_space<vmem>>, vector<1x2x256xf32>
    %714 = vector.shape_cast %713 : vector<1x2x256xf32> to vector<2x256xf32>
    %715 = vector.extract_strided_slice %714 {offsets = [0, 128], sizes = [2, 128], strides = [1, 1]} : vector<2x256xf32> to vector<2x128xf32>
    %716 = arith.truncf %644 : vector<2x32xf32> to vector<2x32xbf16>
    %cst_166 = arith.constant dense<0.000000e+00> : vector<2x128xf32>
    %717 = tpu.matmul %716, %1, %cst_166 {dimension_numbers = #tpu.dot_dimension_numbers<[1], [0], [0], [1], [0, 0, 1, 1], [], []>} : vector<2x32xbf16>, vector<32x128xbf16>, vector<2x128xf32> -> vector<2x128xf32>
    %718 = arith.addf %715, %717 : vector<2x128xf32>
    %719 = vector.extract_strided_slice %718 {offsets = [0, 0], sizes = [2, 32], strides = [1, 1]} : vector<2x128xf32> to vector<2x32xf32>
    %720 = arith.negf %719 : vector<2x32xf32>
    %721 = math.exp %720 : vector<2x32xf32>
    %cst_167 = arith.constant 1.000000e+00 : f32
    %722 = vector.broadcast %cst_167 : f32 to vector<2x32xf32>
    %723 = arith.addf %722, %721 : vector<2x32xf32>
    %724 = arith.divf %722, %723 : vector<2x32xf32>
    %725 = vector.extract_strided_slice %718 {offsets = [0, 32], sizes = [2, 32], strides = [1, 1]} : vector<2x128xf32> to vector<2x32xf32>
    %726 = arith.negf %725 : vector<2x32xf32>
    %727 = math.exp %726 : vector<2x32xf32>
    %cst_168 = arith.constant 1.000000e+00 : f32
    %728 = vector.broadcast %cst_168 : f32 to vector<2x32xf32>
    %729 = arith.addf %728, %727 : vector<2x32xf32>
    %730 = arith.divf %728, %729 : vector<2x32xf32>
    %731 = vector.extract_strided_slice %718 {offsets = [0, 64], sizes = [2, 32], strides = [1, 1]} : vector<2x128xf32> to vector<2x32xf32>
    %732 = math.tanh %731 : vector<2x32xf32>
    %733 = vector.extract_strided_slice %718 {offsets = [0, 96], sizes = [2, 32], strides = [1, 1]} : vector<2x128xf32> to vector<2x32xf32>
    %734 = arith.negf %733 : vector<2x32xf32>
    %735 = math.exp %734 : vector<2x32xf32>
    %cst_169 = arith.constant 1.000000e+00 : f32
    %736 = vector.broadcast %cst_169 : f32 to vector<2x32xf32>
    %737 = arith.addf %736, %735 : vector<2x32xf32>
    %738 = arith.divf %736, %737 : vector<2x32xf32>
    %739 = arith.mulf %730, %651 : vector<2x32xf32>
    %740 = arith.mulf %724, %732 : vector<2x32xf32>
    %741 = arith.addf %739, %740 : vector<2x32xf32>
    %742 = math.tanh %741 : vector<2x32xf32>
    %743 = arith.mulf %738, %742 : vector<2x32xf32>
    %744 = arith.index_cast %657 : i32 to index
    %c0_170 = arith.constant 0 : index
    %c0_171 = arith.constant 0 : index
    %745 = vector.load %arg4[%744, %c0_170, %c0_171] : memref<8x2x1xf32, #tpu.memory_space<vmem>>, vector<1x2x1xf32>
    %746 = vector.shape_cast %745 : vector<1x2x1xf32> to vector<2x1xf32>
    %747 = vector.broadcast %746 : vector<2x1xf32> to vector<2x32xf32>
    %748 = arith.mulf %747, %743 : vector<2x32xf32>
    %cst_172 = arith.constant 1.000000e+00 : f32
    %749 = vector.broadcast %cst_172 : f32 to vector<2x1xf32>
    %750 = arith.subf %749, %746 : vector<2x1xf32>
    %751 = vector.broadcast %750 : vector<2x1xf32> to vector<2x32xf32>
    %752 = arith.mulf %751, %644 : vector<2x32xf32>
    %753 = arith.addf %748, %752 : vector<2x32xf32>
    %754 = vector.broadcast %746 : vector<2x1xf32> to vector<2x32xf32>
    %755 = arith.mulf %754, %741 : vector<2x32xf32>
    %cst_173 = arith.constant 1.000000e+00 : f32
    %756 = vector.broadcast %cst_173 : f32 to vector<2x1xf32>
    %757 = arith.subf %756, %746 : vector<2x1xf32>
    %758 = vector.broadcast %757 : vector<2x1xf32> to vector<2x32xf32>
    %759 = arith.mulf %758, %651 : vector<2x32xf32>
    %760 = arith.addf %755, %759 : vector<2x32xf32>
    %761 = vector.broadcast %746 : vector<2x1xf32> to vector<2x32xf32>
    %762 = arith.mulf %761, %743 : vector<2x32xf32>
    %763 = vector.shape_cast %762 : vector<2x32xf32> to vector<1x2x32xf32>
    %764 = arith.index_cast %657 : i32 to index
    %c0_174 = arith.constant 0 : index
    %c32_175 = arith.constant 32 : index
    %765 = vector.load %arg5[%764, %c0_174, %c32_175] : memref<8x2x64xf32, #tpu.memory_space<vmem>>, vector<1x2x32xf32>
    tpu.vector_store %arg5[%764, %c0_174, %c32_175], %763 {strides = array<i32>} : memref<8x2x64xf32, #tpu.memory_space<vmem>>, vector<1x2x32xf32>,
    %c7_i32_176 = arith.constant 7 : i32
    %c7_i32_177 = arith.constant 7 : i32
    %766 = arith.subi %c7_i32_177, %c7_i32_176 : i32
    %767 = arith.index_cast %c7_i32_176 : i32 to index
    %c0_178 = arith.constant 0 : index
    %c0_179 = arith.constant 0 : index
    %768 = vector.load %arg1[%767, %c0_178, %c0_179] : memref<8x2x256xf32, #tpu.memory_space<vmem>>, vector<1x2x256xf32>
    %769 = vector.shape_cast %768 : vector<1x2x256xf32> to vector<2x256xf32>
    %770 = vector.extract_strided_slice %769 {offsets = [0, 0], sizes = [2, 128], strides = [1, 1]} : vector<2x256xf32> to vector<2x128xf32>
    %771 = arith.truncf %699 : vector<2x32xf32> to vector<2x32xbf16>
    %cst_180 = arith.constant dense<0.000000e+00> : vector<2x128xf32>
    %772 = tpu.matmul %771, %0, %cst_180 {dimension_numbers = #tpu.dot_dimension_numbers<[1], [0], [0], [1], [0, 0, 1, 1], [], []>} : vector<2x32xbf16>, vector<32x128xbf16>, vector<2x128xf32> -> vector<2x128xf32>
    %773 = arith.addf %770, %772 : vector<2x128xf32>
    %774 = vector.extract_strided_slice %773 {offsets = [0, 0], sizes = [2, 32], strides = [1, 1]} : vector<2x128xf32> to vector<2x32xf32>
    %775 = arith.negf %774 : vector<2x32xf32>
    %776 = math.exp %775 : vector<2x32xf32>
    %cst_181 = arith.constant 1.000000e+00 : f32
    %777 = vector.broadcast %cst_181 : f32 to vector<2x32xf32>
    %778 = arith.addf %777, %776 : vector<2x32xf32>
    %779 = arith.divf %777, %778 : vector<2x32xf32>
    %780 = vector.extract_strided_slice %773 {offsets = [0, 32], sizes = [2, 32], strides = [1, 1]} : vector<2x128xf32> to vector<2x32xf32>
    %781 = arith.negf %780 : vector<2x32xf32>
    %782 = math.exp %781 : vector<2x32xf32>
    %cst_182 = arith.constant 1.000000e+00 : f32
    %783 = vector.broadcast %cst_182 : f32 to vector<2x32xf32>
    %784 = arith.addf %783, %782 : vector<2x32xf32>
    %785 = arith.divf %783, %784 : vector<2x32xf32>
    %786 = vector.extract_strided_slice %773 {offsets = [0, 64], sizes = [2, 32], strides = [1, 1]} : vector<2x128xf32> to vector<2x32xf32>
    %787 = math.tanh %786 : vector<2x32xf32>
    %788 = vector.extract_strided_slice %773 {offsets = [0, 96], sizes = [2, 32], strides = [1, 1]} : vector<2x128xf32> to vector<2x32xf32>
    %789 = arith.negf %788 : vector<2x32xf32>
    %790 = math.exp %789 : vector<2x32xf32>
    %cst_183 = arith.constant 1.000000e+00 : f32
    %791 = vector.broadcast %cst_183 : f32 to vector<2x32xf32>
    %792 = arith.addf %791, %790 : vector<2x32xf32>
    %793 = arith.divf %791, %792 : vector<2x32xf32>
    %794 = arith.mulf %785, %706 : vector<2x32xf32>
    %795 = arith.mulf %779, %787 : vector<2x32xf32>
    %796 = arith.addf %794, %795 : vector<2x32xf32>
    %797 = math.tanh %796 : vector<2x32xf32>
    %798 = arith.mulf %793, %797 : vector<2x32xf32>
    %799 = arith.index_cast %c7_i32_176 : i32 to index
    %c0_184 = arith.constant 0 : index
    %c0_185 = arith.constant 0 : index
    %800 = vector.load %arg4[%799, %c0_184, %c0_185] : memref<8x2x1xf32, #tpu.memory_space<vmem>>, vector<1x2x1xf32>
    %801 = vector.shape_cast %800 : vector<1x2x1xf32> to vector<2x1xf32>
    %802 = vector.broadcast %801 : vector<2x1xf32> to vector<2x32xf32>
    %803 = arith.mulf %802, %798 : vector<2x32xf32>
    %cst_186 = arith.constant 1.000000e+00 : f32
    %804 = vector.broadcast %cst_186 : f32 to vector<2x1xf32>
    %805 = arith.subf %804, %801 : vector<2x1xf32>
    %806 = vector.broadcast %805 : vector<2x1xf32> to vector<2x32xf32>
    %807 = arith.mulf %806, %699 : vector<2x32xf32>
    %808 = arith.addf %803, %807 : vector<2x32xf32>
    %809 = vector.broadcast %801 : vector<2x1xf32> to vector<2x32xf32>
    %810 = arith.mulf %809, %796 : vector<2x32xf32>
    %cst_187 = arith.constant 1.000000e+00 : f32
    %811 = vector.broadcast %cst_187 : f32 to vector<2x1xf32>
    %812 = arith.subf %811, %801 : vector<2x1xf32>
    %813 = vector.broadcast %812 : vector<2x1xf32> to vector<2x32xf32>
    %814 = arith.mulf %813, %706 : vector<2x32xf32>
    %815 = arith.addf %810, %814 : vector<2x32xf32>
    %816 = vector.broadcast %801 : vector<2x1xf32> to vector<2x32xf32>
    %817 = arith.mulf %816, %798 : vector<2x32xf32>
    %818 = vector.shape_cast %817 : vector<2x32xf32> to vector<1x2x32xf32>
    %819 = arith.index_cast %c7_i32_176 : i32 to index
    %c0_188 = arith.constant 0 : index
    %c0_189 = arith.constant 0 : index
    %820 = vector.load %arg5[%819, %c0_188, %c0_189] : memref<8x2x64xf32, #tpu.memory_space<vmem>>, vector<1x2x32xf32>
    tpu.vector_store %arg5[%819, %c0_188, %c0_189], %818 {strides = array<i32>} : memref<8x2x64xf32, #tpu.memory_space<vmem>>, vector<1x2x32xf32>,
    %821 = arith.index_cast %766 : i32 to index
    %c0_190 = arith.constant 0 : index
    %c0_191 = arith.constant 0 : index
    %822 = vector.load %arg1[%821, %c0_190, %c0_191] : memref<8x2x256xf32, #tpu.memory_space<vmem>>, vector<1x2x256xf32>
    %823 = vector.shape_cast %822 : vector<1x2x256xf32> to vector<2x256xf32>
    %824 = vector.extract_strided_slice %823 {offsets = [0, 128], sizes = [2, 128], strides = [1, 1]} : vector<2x256xf32> to vector<2x128xf32>
    %825 = arith.truncf %753 : vector<2x32xf32> to vector<2x32xbf16>
    %cst_192 = arith.constant dense<0.000000e+00> : vector<2x128xf32>
    %826 = tpu.matmul %825, %1, %cst_192 {dimension_numbers = #tpu.dot_dimension_numbers<[1], [0], [0], [1], [0, 0, 1, 1], [], []>} : vector<2x32xbf16>, vector<32x128xbf16>, vector<2x128xf32> -> vector<2x128xf32>
    %827 = arith.addf %824, %826 : vector<2x128xf32>
    %828 = vector.extract_strided_slice %827 {offsets = [0, 0], sizes = [2, 32], strides = [1, 1]} : vector<2x128xf32> to vector<2x32xf32>
    %829 = arith.negf %828 : vector<2x32xf32>
    %830 = math.exp %829 : vector<2x32xf32>
    %cst_193 = arith.constant 1.000000e+00 : f32
    %831 = vector.broadcast %cst_193 : f32 to vector<2x32xf32>
    %832 = arith.addf %831, %830 : vector<2x32xf32>
    %833 = arith.divf %831, %832 : vector<2x32xf32>
    %834 = vector.extract_strided_slice %827 {offsets = [0, 32], sizes = [2, 32], strides = [1, 1]} : vector<2x128xf32> to vector<2x32xf32>
    %835 = arith.negf %834 : vector<2x32xf32>
    %836 = math.exp %835 : vector<2x32xf32>
    %cst_194 = arith.constant 1.000000e+00 : f32
    %837 = vector.broadcast %cst_194 : f32 to vector<2x32xf32>
    %838 = arith.addf %837, %836 : vector<2x32xf32>
    %839 = arith.divf %837, %838 : vector<2x32xf32>
    %840 = vector.extract_strided_slice %827 {offsets = [0, 64], sizes = [2, 32], strides = [1, 1]} : vector<2x128xf32> to vector<2x32xf32>
    %841 = math.tanh %840 : vector<2x32xf32>
    %842 = vector.extract_strided_slice %827 {offsets = [0, 96], sizes = [2, 32], strides = [1, 1]} : vector<2x128xf32> to vector<2x32xf32>
    %843 = arith.negf %842 : vector<2x32xf32>
    %844 = math.exp %843 : vector<2x32xf32>
    %cst_195 = arith.constant 1.000000e+00 : f32
    %845 = vector.broadcast %cst_195 : f32 to vector<2x32xf32>
    %846 = arith.addf %845, %844 : vector<2x32xf32>
    %847 = arith.divf %845, %846 : vector<2x32xf32>
    %848 = arith.mulf %839, %760 : vector<2x32xf32>
    %849 = arith.mulf %833, %841 : vector<2x32xf32>
    %850 = arith.addf %848, %849 : vector<2x32xf32>
    %851 = math.tanh %850 : vector<2x32xf32>
    %852 = arith.mulf %847, %851 : vector<2x32xf32>
    %853 = arith.index_cast %766 : i32 to index
    %c0_196 = arith.constant 0 : index
    %c0_197 = arith.constant 0 : index
    %854 = vector.load %arg4[%853, %c0_196, %c0_197] : memref<8x2x1xf32, #tpu.memory_space<vmem>>, vector<1x2x1xf32>
    %855 = vector.shape_cast %854 : vector<1x2x1xf32> to vector<2x1xf32>
    %856 = vector.broadcast %855 : vector<2x1xf32> to vector<2x32xf32>
    %857 = arith.mulf %856, %852 : vector<2x32xf32>
    %cst_198 = arith.constant 1.000000e+00 : f32
    %858 = vector.broadcast %cst_198 : f32 to vector<2x1xf32>
    %859 = arith.subf %858, %855 : vector<2x1xf32>
    %860 = vector.broadcast %859 : vector<2x1xf32> to vector<2x32xf32>
    %861 = arith.mulf %860, %753 : vector<2x32xf32>
    %862 = arith.addf %857, %861 : vector<2x32xf32>
    %863 = vector.broadcast %855 : vector<2x1xf32> to vector<2x32xf32>
    %864 = arith.mulf %863, %850 : vector<2x32xf32>
    %cst_199 = arith.constant 1.000000e+00 : f32
    %865 = vector.broadcast %cst_199 : f32 to vector<2x1xf32>
    %866 = arith.subf %865, %855 : vector<2x1xf32>
    %867 = vector.broadcast %866 : vector<2x1xf32> to vector<2x32xf32>
    %868 = arith.mulf %867, %760 : vector<2x32xf32>
    %869 = arith.addf %864, %868 : vector<2x32xf32>
    %870 = vector.broadcast %855 : vector<2x1xf32> to vector<2x32xf32>
    %871 = arith.mulf %870, %852 : vector<2x32xf32>
    %872 = vector.shape_cast %871 : vector<2x32xf32> to vector<1x2x32xf32>
    %873 = arith.index_cast %766 : i32 to index
    %c0_200 = arith.constant 0 : index
    %c32_201 = arith.constant 32 : index
    %874 = vector.load %arg5[%873, %c0_200, %c32_201] : memref<8x2x64xf32, #tpu.memory_space<vmem>>, vector<1x2x32xf32>
    tpu.vector_store %arg5[%873, %c0_200, %c32_201], %872 {strides = array<i32>} : memref<8x2x64xf32, #tpu.memory_space<vmem>>, vector<1x2x32xf32>,
    %c8_i32 = arith.constant 8 : i32
    return
  }
  func.func @transform_0(%arg0: i32) -> (i32, i32, i32) {
    %c0_i32 = arith.constant 0 : i32
    %c0_i32_0 = arith.constant 0 : i32
    %c0_i32_1 = arith.constant 0 : i32
    return %c0_i32, %arg0, %c0_i32_0 : i32, i32, i32
  }
  func.func @transform_1(%arg0: i32) -> (i32, i32) {
    %c0_i32 = arith.constant 0 : i32
    %c0_i32_0 = arith.constant 0 : i32
    %c0_i32_1 = arith.constant 0 : i32
    return %c0_i32, %c0_i32_0 : i32, i32
  }
  func.func @transform_2(%arg0: i32) -> (i32, i32) {
    %c0_i32 = arith.constant 0 : i32
    %c0_i32_0 = arith.constant 0 : i32
    %c0_i32_1 = arith.constant 0 : i32
    return %c0_i32, %c0_i32_0 : i32, i32
  }
  func.func @transform_3(%arg0: i32) -> (i32, i32, i32) {
    %c0_i32 = arith.constant 0 : i32
    %c0_i32_0 = arith.constant 0 : i32
    %c0_i32_1 = arith.constant 0 : i32
    return %c0_i32, %arg0, %c0_i32_0 : i32, i32, i32
  }
  func.func @transform_4(%arg0: i32) -> (i32, i32, i32) {
    %c0_i32 = arith.constant 0 : i32
    %c0_i32_0 = arith.constant 0 : i32
    %c0_i32_1 = arith.constant 0 : i32
    return %c0_i32, %arg0, %c0_i32_0 : i32, i32, i32
  }
}

</mosaic_0001>

<bundles_post_ra>
// kernel: my_lstm_forward.9
= control target key start
LH: loop header
LB: loop body
LE: loop exit
PB: predicated region body
PF: predicated region fallthrough
CT: control target
= control target key end

     0   :  { %vm29_vm0 = vcmask 523264   ;;  %v572_v0 = vmov 0.0   ;;  %vm573_vm1 = vmmov 0   ;;  %vm18_vm2 = vcmask 0   ;;  %s662_s0 = inlined_call_operand.vmem [shape: f32[2,8,64], index: 0, kind: input, shape index: {}]   ;;  %s663_s1 = inlined_call_operand.vmem [shape: f32[1,64], index: 1, kind: input, shape index: {}]   ;;  %s664_s2 = inlined_call_operand.vmem [shape: s32[2,1], index: 2, kind: input, shape index: {}]   ;;  %s665_s3 = inlined_call_operand.vmem [shape: f32[2,64], index: 3, kind: output, shape index: {}]  }
   0x1   :  { %533 = vmatprep.subr.mxu0 %v572_v0  ;;  %v26_v1 = vld [vmem:[%s662_s0] sm:$0xff]  ;;  %538 = vmatprep.subr.mxu1 %v572_v0  ;;  %v27_v2 = vld [vmem:[%s662_s0 + $0x8] sm:$0xff]  ;;  %v574_v4 = vmov -inf   ;;  %21 = vst.msk [vmem:[#allocation3] sm:$0x1] %vm18_vm2, %v572_v0  ;;  %vm231_vm3 = vcmask 57344   ;;  %v182_v14 = vlaneseq }
   0x2   :  { %534 = vmatpush3.xpose.msk.msra.mxu0 %vm29_vm0, %v26_v1  ;;  %535 = vmatprep.mubr.msk.f32.mxu0 %vm573_vm1, %v572_v0  ;;  %v28_v3 = vld [vmem:[%s663_s1] sm:$0x1]  ;;  %19 = vst.msk [vmem:[#allocation2] sm:$0x1] %vm18_vm2, %v574_v4  ;;  %20 = vst.msk [vmem:[#allocation2 + $0x1] sm:$0x1] %vm18_vm2, %v574_v4 }
   0x3   :  { %539 = vmatpush3.xpose.msk.msra.mxu1 %vm29_vm0, %v27_v2  ;;  %540 = vmatprep.mubr.msk.f32.mxu1 %vm573_vm1, %v572_v0  ;;  %22 = vst.msk [vmem:[#allocation3 + $0x1] sm:$0x1] %vm18_vm2, %v572_v0  ;;  %v575_v13 = vmov 0   ;;  %v576_v15 = vmov 1966171168   ;;  %v199_v18 = vshrl.u32 %v182_v14, 7 }
   0x4   :  { %543 = vmatprep.subr.mxu0 %v572_v0  ;;  %548 = vmatprep.subr.mxu1 %v572_v0  ;;  %v196_v16 = vunpack.c.l.s4 %v576_v15  ;;  %v520_v20 = vld.sshfl [vmem:[%s664_s2] sm:$0x11 pattern:$0x75316420]  ;;  %vm23_vm4 = vcmask 516096   ;;  %v183_v45 = vand.u32 127, %v182_v14 }
   0x5   :  { %536 = vmatmul.mubr.msk.f32.vlgmr.msra.gmra.mxu0 %vm29_vm0, %v28_v3  ;;  %558 = vset.pattern.permute.xlu1 %v575_v13  ;;  %v194_v27 = vcombine.high %v520_v20, %v520_v20  ;;  %24 = vst.msk [vmem:[#allocation4] sm:$0x1] %vm23_vm4, %v572_v0  ;;  %25 = vst.msk [vmem:[#allocation4 + $0x1] sm:$0x1] %vm23_vm4, %v572_v0  ;;  %v639_v34 = vsub.s32 0, %v199_v18  ;;  %vm309_vm6 = vcmask 64512  }
   0x6   :  { %541 = vmatmul.mubr.msk.f32.vlgmr.msra.gmra.mxu1 %vm29_vm0, %v28_v3  ;;  %544 = vmatpush3.msra.mxu0 %v26_v1  ;;  %v197_v17 = vunpack.c.0.s8 %v196_v16  ;;  %vm510_vm8 = vcmask 517120  }
   0x7   :  { %545 = vmatprep.mubr.msk.f32.mxu0 %vm573_vm1, %v572_v0  ;;  %549 = vmatpush3.msra.mxu1 %v27_v2 }
   0x8   :  { %550 = vmatprep.mubr.msk.f32.mxu1 %vm573_vm1, %v572_v0  ;;  %559 = vset.pattern.permute.xlu0 %v575_v13  ;;  %v626_v19 = vsub.s32 %v197_v17, %v199_v18  ;;  %v272_v58 = vld [vmem:[#allocation3] sm:$0x1] }
   0x9   :  { %v229_v22 = vld [vmem:[#allocation2] sm:$0x1]  ;;  %v230_v25 = vld [vmem:[#allocation2 + $0x1] sm:$0x1] }
   0xa   :  { %v201_v21 = vrot.slane %v520_v20, %v626_v19  ;;  %v208_v32 = vrot.slane %v194_v27, %v626_v19  ;;  %v273_v61 = vld [vmem:[#allocation3 + $0x1] sm:$0x1] }
   0xc   :  { %v288_v13 = vld [vmem:[#allocation4 + $0x1] sm:$0x1] }
  0xc5   :  { %v102_v5 = vpop.f32.mrf.mxu0 }
  0xc6   :  { %v179_v6 = vmax.f32 %v102_v5, 0.0  ;;  %v175_v7 = vpop.f32.mrf.mxu1 }
  0xc7   :  { %v537_v8 = vpop.f32.mrf.mxu0  ;;  %v180_v9 = vmax.f32 %v175_v7, 0.0 }
  0xc8   :  { %v542_v10 = vpop.f32.mrf.mxu1  ;;  %v232_v11 = vsel %vm231_vm3, %v179_v6, -inf }
  0xc9   :  { %233 = vmax.xlane.f32.xlu0 %v232_v11  ;;  %v235_v12 = vsel %vm231_vm3, %v180_v9, -inf }
  0xcd   :  { %236 = vmax.xlane.f32.xlu0 %v235_v12 }
  0xe3   :  { %210 = vperm.xlu0 %559, %v201_v21  }
 0x152   :  { %v234_v23 = vpop.xlane.xlu0 %233 }
 0x153   :  { %v238_v24 = vmax.f32 %v229_v22, %v234_v23 }
 0x155   :  { %v240_v26 = vsub.f32 %v229_v22, %v238_v24  ;;  %461 = vst.msk [vmem:[#allocation2] sm:$0x1] %vm18_vm2, %v238_v24  ;;  %248 = vperm.xlu1 %558, %v238_v24  }
 0x156   :  { %v237_v28 = vpop.xlane.xlu0 %236 }
 0x157   :  { %v242_v29 = vmul.f32 1.442695, %v240_v26  ;;  %v239_v30 = vmax.f32 %v230_v25, %v237_v28 }
 0x159   :  { %560 = vpow2.f32 %v242_v29  ;;  %v241_v31 = vsub.f32 %v230_v25, %v239_v30  ;;  %462 = vst.msk [vmem:[#allocation2 + $0x1] sm:$0x1] %vm18_vm2, %v239_v30  ;;  %257 = vperm.xlu1 %558, %v239_v30  }
 0x15b   :  { %v244_v55 = vmul.f32 1.442695, %v241_v31 }
 0x15d   :  { %217 = vperm.xlu1 %558, %v208_v32  }
 0x15e   :  { %v211_v43 = vpop.permute.xlu0 %210 }
 0x15f   :  { %v215_v44 = vrot.slane %v211_v43, %v639_v34 }
 0x161   :  { %vm223_vm5 = vcmp.lt.s32.totalorder %v183_v45, %v215_v44 }
 0x162   :  { %v521_v48 = vsel %vm223_vm5, 1.0, %v572_v0 }
 0x166   :  { %v561_v33 = vpop.eup %560 }
 0x167   :  { %291 = vperm.xlu0 %559, %v561_v33   ;;  %v274_v59 = vmul.f32 %v561_v33, %v272_v58 }
 0x1d0   :  { %v249_v35 = vpop.permute.xlu1 %248 }
 0x1d1   :  { %v254_v36 = vrot.slane %v249_v35, %v639_v34 }
 0x1d3   :  { %v264_v37 = vsub.f32 %v179_v6, %v254_v36 }
 0x1d4   :  { %v258_v38 = vpop.permute.xlu1 %257 }
 0x1d5   :  { %v266_v39 = vmul.f32 1.442695, %v264_v37  ;;  %v263_v40 = vrot.slane %v258_v38, %v639_v34 }
 0x1d7   :  { %562 = vpow2.f32 %v266_v39  ;;  %v265_v41 = vsub.f32 %v180_v9, %v263_v40  ;;  %v287_v9 = vld [vmem:[#allocation4] sm:$0x1] }
 0x1d8   :  { %v218_v46 = vpop.permute.xlu1 %217 }
 0x1d9   :  { %v268_v42 = vmul.f32 1.442695, %v265_v41  ;;  %v222_v47 = vrot.slane %v218_v46, %v639_v34 }
 0x1db   :  { %564 = vpow2.f32 %v268_v42  ;;  %vm224_vm7 = vcmp.lt.s32.totalorder %v183_v45, %v222_v47 }
 0x1dc   :  { %v522_v53 = vsel %vm224_vm7, 1.0, %v572_v0  ;;  %566 = vpow2.f32 %v244_v55 }
 0x1e2   :  { %v292_v6 = vpop.permute.xlu0 %291 }
 0x1e3   :  { %v297_v7 = vrot.slane %v292_v6, %v639_v34 }
 0x1e4   :  { %v563_v49 = vpop.eup %562 }
 0x1e5   :  { %v270_v50 = vmul.f32 %v563_v49, %v521_v48  ;;  %v307_v11 = vmul.f32 %v297_v7, %v287_v9 }
 0x1e7   :  { %546 = vmatmul.mubr.msk.f32.vlgmr.msra.gmra.mxu0 %vm309_vm6, %v270_v50  ;;  %v276_v51 = vsel %vm231_vm3, %v270_v50, 0.0 }
 0x1e8   :  { %v565_v52 = vpop.eup %564  ;;  %277 = vadd.xlane.f32.xlu1 %v276_v51 }
 0x1e9   :  { %v271_v54 = vmul.f32 %v565_v52, %v522_v53  ;;  %v567_v57 = vpop.eup %566 }
 0x1ea   :  { %v275_v63 = vmul.f32 %v567_v57, %v273_v61 }
 0x1eb   :  { %551 = vmatmul.mubr.msk.f32.vlgmr.msra.gmra.mxu1 %vm309_vm6, %v271_v54  ;;  %v279_v56 = vsel %vm231_vm3, %v271_v54, 0.0 }
 0x1ec   :  { %280 = vadd.xlane.f32.xlu1 %v279_v56 }
 0x1fd   :  { %300 = vperm.xlu1 %558, %v567_v57  }
 0x271   :  { %v278_v60 = vpop.xlane.xlu1 %277 }
 0x272   :  { %v282_v62 = vadd.f32 %v278_v60, %v274_v59 }
 0x274   :  { %285 = vst.msk [vmem:[#allocation3] sm:$0x1] %vm18_vm2, %v282_v62 }
 0x275   :  { %v281_v1 = vpop.xlane.xlu1 %280 }
 0x276   :  { %v283_v0 = vadd.f32 %v281_v1, %v275_v63 }
 0x278   :  { %286 = vst.msk [vmem:[#allocation3 + $0x1] sm:$0x1] %vm18_vm2, %v283_v0 }
 0x279   :  { %v301_v8 = vpop.permute.xlu1 %300 }
 0x27a   :  { %v306_v10 = vrot.slane %v301_v8, %v639_v34 }
 0x27b   :  { %v466_v2 = vld [vmem:[#allocation3] sm:$0x1] }
 0x27c   :  { %568 = vrcp.f32 %v466_v2  ;;  %v308_v16 = vmul.f32 %v306_v10, %v288_v13 }
 0x27f   :  { %v467_v3 = vld [vmem:[#allocation3 + $0x1] sm:$0x1] }
 0x280   :  { %570 = vrcp.f32 %v467_v3 }
 0x289   :  { %v569_v4 = vpop.eup %568 }
 0x28a   :  { %474 = vperm.xlu0 %559, %v569_v4  }
 0x28d   :  { %v571_v5 = vpop.eup %570 }
 0x28e   :  { %483 = vperm.xlu0 %559, %v571_v5  }
 0x2a7   :  { %v379_v12 = vpop.f32.mrf.mxu0 }
 0x2a8   :  { %v456_v14 = vadd.f32 %v379_v12, %v307_v11 }
 0x2a9   :  { %v547_v15 = vpop.f32.mrf.mxu0 }
 0x2aa   :  { %459 = vst.msk [vmem:[#allocation4] sm:$0x1] %vm23_vm4, %v456_v14 }
 0x2ab   :  { %v452_v17 = vpop.f32.mrf.mxu1 }
 0x2ac   :  { %v457_v18 = vadd.f32 %v452_v17, %v308_v16 }
 0x2ad   :  { %v552_v20 = vpop.f32.mrf.mxu1 }
 0x2ae   :  { %460 = vst.msk [vmem:[#allocation4 + $0x1] sm:$0x1] %vm23_vm4, %v457_v18 }
 0x2b1   :  { %v470_v25 = vld [vmem:[#allocation4] sm:$0x1] }
 0x2b5   :  { %v471_v26 = vld [vmem:[#allocation4 + $0x1] sm:$0x1] }
 0x305   :  { %v475_v21 = vpop.permute.xlu0 %474 }
 0x306   :  { %v480_v22 = vrot.slane %v475_v21, %v639_v34 }
 0x308   :  { %v490_v27 = vmul.f32 %v480_v22, %v470_v25 }
 0x309   :  { %v484_v23 = vpop.permute.xlu0 %483 }
 0x30a   :  { %v489_v24 = vrot.slane %v484_v23, %v639_v34 }
 0x30c   :  { %v491_v28 = vmul.f32 %v489_v24, %v471_v26 }
 0x30e   :  { %v494_v29 = vcombine.low %v490_v27, %v491_v28 }
 0x310   :  { %v501_v30 = vrot.slane %v494_v29, %v626_v19 }
 0x312   :  { %v508_v31 = vrot.slane %v501_v30, %v626_v19 }
 0x314   :  { %511 = vst.msk [vmem:[%s665_s3] sm:$0x3] %vm510_vm8, %v508_v31 }

// kernel: my_lstm_forward.5
= control target key start
LH: loop header
LB: loop body
LE: loop exit
PB: predicated region body
PF: predicated region fallthrough
CT: control target
= control target key end

     0   :  { %v2410_v0 = vmov 0.0   ;;  %vm2411_vm0 = vmmov 0   ;;  %v2412_v4 = vmov 0   ;;  %s2413_s27 = smov 64   ;;  %s2414_s28 = smov 32   ;;  %v118_v46 = vlaneseq  ;;  %s3046_s2 = inlined_call_operand.vmem [shape: bf16[32,128], index: 2, kind: input, shape index: {}]   ;;  %s3047_s1 = inlined_call_operand.vmem [shape: bf16[32,128], index: 1, kind: input, shape index: {}]   ;;  %s3048_s0 = inlined_call_operand.vmem [shape: f32[8,2,256], index: 0, kind: input, shape index: {}]   ;;  %s3049_s3 = inlined_call_operand.vmem [shape: f32[8,2,1], index: 3, kind: input, shape index: {}]   ;;  %s3050_s4 = inlined_call_operand.vmem [shape: f32[8,2,64], index: 4, kind: output, shape index: {}]  }
   0x1   :  { %2145 = vmatprep.subr.bf16.mxu1 %v2410_v0  ;;  %v2446_v1 = vld [vmem:[%s3046_s2 + $0x8] sm:$0xff]   ;;  %2137 = vmatprep.subr.bf16.mxu0 %v2410_v0  ;;  %v2462_v3 = vld [vmem:[%s3046_s2] sm:$0xff]   ;;  %v2016_v6 = vld [vmem:[%s3048_s0 + $0x1c] sm:$0xf]  ;;  %v2415_v44 = vmov 1983009808  }
   0x2   :  { %v2452_v2 = vld [vmem:[%s3047_s1 + $0x8] sm:$0xff]   ;;  %2149 = vmatprep.mubr.msk.bf16.mxu1 %vm2411_vm0, %v2410_v0  ;;  %2141 = vmatprep.mubr.msk.bf16.mxu0 %vm2411_vm0, %v2410_v0  ;;  %v2469_v5 = vld [vmem:[%s3047_s1] sm:$0xff]   ;;  %v204_v7 = vrot.slane %v2016_v6, 2  ;;  %v116_v45 = vunpack.c.l.s4 %v2415_v44  ;;  %v119_v48 = vshrl.u32 %v118_v46, 7  ;;  %s2416_s7 = smov 96   ;;  %vm147_vm1 = vcmask 254976  }
   0x3   :  { %2146 = vmatpush3.bf16.msra.mxu1 %v2446_v1  ;;  %2272 = vset.pattern.permute.xlu1 %v2412_v4  ;;  %v26_v8 = vld [vmem:[%s3048_s0] sm:$0xf]  ;;  %v2020_v33 = vld [vmem:[%s3049_s3 + $0xe] sm:$0x3]  ;;  %vm39_vm2 = vcmask 261120   ;;  %vm276_vm3 = vcmask 517376  }
   0x4   :  { %2147 = vmatprep.subr.bf16.mxu1 %v2410_v0  ;;  %2138 = vmatpush3.bf16.msra.mxu0 %v2452_v2  ;;  %v250_v41 = vsub.f32 1.0, %v2020_v33  ;;  %v108_v43 = vld [vmem:[%s3049_s3] sm:$0x3]  ;;  %v117_v47 = vunpack.c.0.s8 %v116_v45 }
   0x5   :  { %2139 = vmatprep.subr.bf16.mxu0 %v2410_v0  ;;  %2273 = vset.pattern.permute.xlu0 %v2412_v4  ;;  %v126_v55 = vsub.f32 1.0, %v108_v43 }
   0x6   :  { %v2506_v51 = vsub.s32 %v117_v47, %v119_v48 }
   0x7   :  { %2148 = vmatpush3.bf16.msra.mxu1 %v2462_v3 }
   0x8   :  { %2140 = vmatpush3.bf16.msra.mxu0 %v2469_v5  ;;  %2161 = vmatprep.subr.bf16.mxu1 %v2410_v0 }
   0x9   :  { %2153 = vmatprep.subr.bf16.mxu0 %v2410_v0 }
   0xa   :  { %2150 = vmatmul.mubr.bf16.vlgmr.msra.gmra.mxu1 %v2412_v4 }
   0xb   :  { %2142 = vmatmul.mubr.bf16.vlgmr.msra.gmra.mxu0 %v2412_v4  ;;  %2162 = vmatpush3.bf16.msra.mxu1 %v2446_v1 }
   0xc   :  { %2163 = vmatprep.subr.bf16.mxu1 %v2410_v0  ;;  %2165 = vmatprep.mubr.msk.bf16.mxu1 %vm2411_vm0, %v2410_v0 }
   0xd   :  { %2154 = vmatpush3.bf16.msra.mxu0 %v2452_v2  ;;  %2157 = vmatprep.mubr.msk.bf16.mxu0 %vm2411_vm0, %v2410_v0 }
   0xe   :  { %2155 = vmatprep.subr.bf16.mxu0 %v2410_v0 }
   0xf   :  { %2164 = vmatpush3.bf16.msra.mxu1 %v2462_v3 }
  0x10   :  { %2177 = vmatprep.subr.bf16.mxu1 %v2410_v0 }
  0x11   :  { %2156 = vmatpush3.bf16.msra.mxu0 %v2469_v5 }
  0x12   :  { %2169 = vmatprep.subr.bf16.mxu0 %v2410_v0 }
  0xca   :  { %v197_v9 = vpop.f32.mrf.mxu1 }
  0xcb   :  { %v206_v10 = vadd.f32 %v204_v7, %v197_v9  ;;  %v77_v11 = vpop.f32.mrf.mxu0 }
  0xcc   :  { %v2151_v12 = vpop.f32.mrf.mxu1  ;;  %v83_v13 = vadd.f32 %v77_v11, %v26_v8 }
  0xcd   :  { %2278 = vtanh.f32 %v206_v10  ;;  %v2143_v14 = vpop.f32.mrf.mxu0  ;;  %v2019_v21 = vmul.f32 -1.442695, %v206_v10 }
  0xce   :  { %v200_v15 = vpop.f32.mrf.mxu1  ;;  %2280 = vtanh.f32 %v83_v13  ;;  %v2015_v22 = vmul.f32 -1.442695, %v83_v13 }
  0xcf   :  { %v80_v16 = vpop.f32.mrf.mxu0  ;;  %2282 = vpow2.f32 %v2019_v21 }
  0xd0   :  { %v2152_v17 = vpop.f32.mrf.mxu1  ;;  %2284 = vpow2.f32 %v2015_v22  ;;  %v2027_v22 = vld [vmem:[%s3048_s0 + $0x18] sm:$0xf] }
  0xd1   :  { %v2144_v18 = vpop.f32.mrf.mxu0 }
  0xda   :  { %v2279_v19 = vpop.eup %2278 }
  0xdb   :  { %216 = vrot.lane.b32.xlu0 %v2279_v19, %s2413_s27  ;;  %v2281_v20 = vpop.eup %2280 }
  0xdc   :  { %v2283_v23 = vpop.eup %2282 }
  0xdd   :  { %v2285_v24 = vpop.eup %2284  ;;  %v210_v25 = vadd.f32 1.0, %v2283_v23  ;;  %v450_v23 = vrot.slane %v2027_v22, 2 }
  0xde   :  { %v87_v26 = vadd.f32 1.0, %v2285_v24 }
  0xdf   :  { %93 = vrot.lane.b32.xlu0 %v2281_v20, %s2413_s27  ;;  %2286 = vrcp.f32 %v210_v25 }
  0xe0   :  { %2288 = vrcp.f32 %v87_v26 }
  0xec   :  { %v2287_v27 = vpop.eup %2286 }
  0xed   :  { %v2289_v30 = vpop.eup %2288  ;;  %v214_v34 = vmul.f32 0.0, %v2287_v27 }
  0xee   :  { %v91_v37 = vmul.f32 0.0, %v2289_v30 }
 0x14d   :  { %v217_v28 = vpop.permute.xlu0 %216 }
 0x14e   :  { %v219_v29 = vmul.f32 %v2287_v27, %v217_v28 }
 0x150   :  { %221 = vrot.lane.b32.xlu1 %v219_v29, %s2414_s28  ;;  %v2022_v29 = vld [vmem:[%s3048_s0 + $0x4] sm:$0xf] }
 0x151   :  { %v94_v31 = vpop.permute.xlu0 %93 }
 0x152   :  { %v96_v32 = vmul.f32 %v2289_v30, %v94_v31 }
 0x154   :  { %98 = vrot.lane.b32.xlu1 %v96_v32, %s2414_s28 }
 0x158   :  { %235 = vperm.xlu1 %2272, %v2020_v33  }
 0x1c2   :  { %v222_v35 = vpop.permute.xlu1 %221 }
 0x1c3   :  { %v224_v36 = vadd.f32 %v222_v35, %v214_v34 }
 0x1c5   :  { %2290 = vtanh.f32 %v224_v36  ;;  %v265_v58 = vrot.slane %v224_v36, %v2506_v51 }
 0x1c6   :  { %v99_v38 = vpop.permute.xlu1 %98 }
 0x1c7   :  { %v101_v39 = vadd.f32 %v99_v38, %v91_v37 }
 0x1c9   :  { %2292 = vtanh.f32 %v101_v39  ;;  %v141_v59 = vrot.slane %v101_v39, %v2506_v51 }
 0x1d2   :  { %v2291_v40 = vpop.eup %2290 }
 0x1d3   :  { %227 = vrot.lane.b32.xlu0 %v2291_v40, %s2413_s27  ;;  %v236_v49 = vpop.permute.xlu1 %235 }
 0x1d6   :  { %v2293_v42 = vpop.eup %2292 }
 0x1d7   :  { %104 = vrot.lane.b32.xlu1 %v2293_v42, %s2413_s27  ;;  %253 = vperm.xlu0 %2273, %v250_v41  }
 0x1db   :  { %111 = vperm.xlu0 %2273, %v108_v43  }
 0x245   :  { %v228_v50 = vpop.permute.xlu0 %227 }
 0x246   :  { %v230_v52 = vmul.f32 %v2287_v27, %v228_v50 }
 0x248   :  { %v245_v53 = vrot.slane %v230_v52, %v2506_v51 }
 0x249   :  { %v105_v54 = vpop.permute.xlu1 %104 }
 0x24a   :  { %v107_v56 = vmul.f32 %v2289_v30, %v105_v54  ;;  %246 = vrot.lane.b32.xlu1 %v245_v53, %s2414_s28 }
 0x24c   :  { %v121_v57 = vrot.slane %v107_v56, %v2506_v51 }
 0x24e   :  { %129 = vperm.xlu1 %2272, %v126_v55   ;;  %122 = vrot.lane.b32.xlu0 %v121_v57, %s2414_s28 }
 0x252   :  { %266 = vrot.lane.b32.xlu1 %v265_v58, %s2416_s7  ;;  %v254_v60 = vpop.permute.xlu0 %253 }
 0x253   :  { %v256_v62 = vmul.f32 0.0, %v254_v60 }
 0x256   :  { %142 = vrot.lane.b32.xlu1 %v141_v59, %s2416_s7  ;;  %v112_v61 = vpop.permute.xlu0 %111 }
 0x2bc   :  { %v247_v63 = vpop.permute.xlu1 %246 }
 0x2bd   :  { %v2516_v4 = vmul.f32 %v247_v63, %v236_v49 }
 0x2bf   :  { %v2519_v6 = vadd.f32 %v256_v62, %v2516_v4 }
 0x2c0   :  { %v123_v7 = vpop.permute.xlu0 %122 }
 0x2c1   :  { %v405_v8 = vpack.c.bf16 %v2519_v6, %v2519_v6  ;;  %v125_v9 = vmul.f32 %v123_v7, %v112_v61 }
 0x2c3   :  { %148 = vst.msk [vmem:[%s3050_s4] sm:$0x3] %vm147_vm1, %v125_v9  ;;  %2166 = vmatmul.mubr.msk.bf16.vlgmr.msra.gmra.mxu1 %vm39_vm2, %v405_v8 }
 0x2c4   :  { %2178 = vmatpush3.bf16.msra.mxu1 %v2446_v1  ;;  %2181 = vmatprep.mubr.msk.bf16.mxu1 %vm2411_vm0, %v2410_v0 }
 0x2c5   :  { %2179 = vmatprep.subr.bf16.mxu1 %v2410_v0 }
 0x2c8   :  { %2180 = vmatpush3.bf16.msra.mxu1 %v2462_v3 }
 0x2c9   :  { %v130_v10 = vpop.permute.xlu1 %129  ;;  %2193 = vmatprep.subr.bf16.mxu1 %v2410_v0 }
 0x2ca   :  { %v132_v11 = vmul.f32 0.0, %v130_v10 }
 0x2cc   :  { %v2534_v12 = vadd.f32 %v132_v11, %v125_v9 }
 0x2cd   :  { %v267_v13 = vpop.permute.xlu1 %266 }
 0x2ce   :  { %v280_v14 = vpack.c.bf16 %v2534_v12, %v2534_v12  ;;  %v269_v15 = vmul.f32 %v267_v13, %v236_v49  ;;  %v2030_v49 = vld [vmem:[%s3049_s3 + $0xc] sm:$0x3] }
 0x2cf   :  { %v507_v60 = vsub.f32 1.0, %v2030_v49 }
 0x2d0   :  { %v2538_v16 = vadd.f32 %v269_v15, %v256_v62  ;;  %2158 = vmatmul.mubr.msk.bf16.vlgmr.msra.gmra.mxu0 %vm39_vm2, %v280_v14  ;;  %v2025_v62 = vld [vmem:[%s3049_s3 + $0x2] sm:$0x3] }
 0x2d1   :  { %v143_v17 = vpop.permute.xlu1 %142  ;;  %2170 = vmatpush3.bf16.msra.mxu0 %v2452_v2  ;;  %2173 = vmatprep.mubr.msk.bf16.mxu0 %vm2411_vm0, %v2410_v0  ;;  %v379_v9 = vsub.f32 1.0, %v2025_v62 }
 0x2d2   :  { %v145_v18 = vmul.f32 %v143_v17, %v112_v61  ;;  %v467_v19 = vrot.slane %v2538_v16, %v2506_v51  ;;  %2171 = vmatprep.subr.bf16.mxu0 %v2410_v0 }
 0x2d4   :  { %v2547_v20 = vadd.f32 %v145_v18, %v132_v11  ;;  %468 = vrot.lane.b32.xlu1 %v467_v19, %s2414_s28 }
 0x2d5   :  { %2172 = vmatpush3.bf16.msra.mxu0 %v2469_v5 }
 0x2d6   :  { %v339_v21 = vrot.slane %v2547_v20, %v2506_v51  ;;  %2185 = vmatprep.subr.bf16.mxu0 %v2410_v0 }
 0x2d8   :  { %340 = vrot.lane.b32.xlu1 %v339_v21, %s2414_s28 }
 0x346   :  { %v469_v50 = vpop.permute.xlu1 %468 }
 0x34a   :  { %v341_v55 = vpop.permute.xlu1 %340 }
 0x383   :  { %v443_v24 = vpop.f32.mrf.mxu1 }
 0x384   :  { %v452_v25 = vadd.f32 %v450_v23, %v443_v24 }
 0x385   :  { %v2167_v26 = vpop.f32.mrf.mxu1 }
 0x386   :  { %2294 = vtanh.f32 %v452_v25  ;;  %v2029_v37 = vmul.f32 -1.442695, %v452_v25 }
 0x387   :  { %v446_v27 = vpop.f32.mrf.mxu1 }
 0x389   :  { %v2168_v28 = vpop.f32.mrf.mxu1 }
 0x390   :  { %v318_v30 = vpop.f32.mrf.mxu0 }
 0x391   :  { %v324_v31 = vadd.f32 %v2022_v29, %v318_v30 }
 0x392   :  { %v2159_v32 = vpop.f32.mrf.mxu0 }
 0x393   :  { %v2295_v33 = vpop.eup %2294  ;;  %2296 = vtanh.f32 %v324_v31  ;;  %v2024_v38 = vmul.f32 -1.442695, %v324_v31 }
 0x394   :  { %473 = vrot.lane.b32.xlu0 %v2295_v33, %s2413_s27  ;;  %v321_v34 = vpop.f32.mrf.mxu0  ;;  %2298 = vpow2.f32 %v2029_v37 }
 0x395   :  { %2300 = vpow2.f32 %v2024_v38 }
 0x396   :  { %v2160_v35 = vpop.f32.mrf.mxu0 }
 0x3a0   :  { %v2297_v36 = vpop.eup %2296 }
 0x3a1   :  { %345 = vrot.lane.b32.xlu0 %v2297_v36, %s2413_s27  ;;  %v2299_v39 = vpop.eup %2298 }
 0x3a2   :  { %v456_v40 = vadd.f32 1.0, %v2299_v39  ;;  %v2301_v41 = vpop.eup %2300 }
 0x3a3   :  { %v328_v42 = vadd.f32 1.0, %v2301_v41 }
 0x3a4   :  { %2302 = vrcp.f32 %v456_v40 }
 0x3a5   :  { %2304 = vrcp.f32 %v328_v42 }
 0x3b1   :  { %v2303_v43 = vpop.eup %2302 }
 0x3b2   :  { %v2305_v46 = vpop.eup %2304  ;;  %v471_v52 = vmul.f32 %v2303_v43, %v469_v50 }
 0x3b3   :  { %v343_v56 = vmul.f32 %v2305_v46, %v341_v55 }
 0x406   :  { %v474_v44 = vpop.permute.xlu0 %473 }
 0x407   :  { %v476_v45 = vmul.f32 %v2303_v43, %v474_v44 }
 0x409   :  { %478 = vrot.lane.b32.xlu0 %v476_v45, %s2414_s28  ;;  %v2032_v45 = vld [vmem:[%s3048_s0 + $0x8] sm:$0xf] }
 0x413   :  { %v346_v47 = vpop.permute.xlu0 %345 }
 0x414   :  { %v348_v48 = vmul.f32 %v2305_v46, %v346_v47 }
 0x416   :  { %350 = vrot.lane.b32.xlu0 %v348_v48, %s2414_s28 }
 0x41a   :  { %492 = vperm.xlu0 %2273, %v2030_v49  }
 0x47b   :  { %v479_v53 = vpop.permute.xlu0 %478 }
 0x47c   :  { %v481_v54 = vadd.f32 %v479_v53, %v471_v52 }
 0x47e   :  { %2306 = vtanh.f32 %v481_v54  ;;  %v522_v11 = vrot.slane %v481_v54, %v2506_v51 }
 0x488   :  { %v351_v57 = vpop.permute.xlu0 %350 }
 0x489   :  { %v353_v58 = vadd.f32 %v351_v57, %v343_v56 }
 0x48b   :  { %v2307_v59 = vpop.eup %2306  ;;  %2308 = vtanh.f32 %v353_v58  ;;  %v394_v15 = vrot.slane %v353_v58, %v2506_v51 }
 0x48c   :  { %484 = vrot.lane.b32.xlu1 %v2307_v59, %s2413_s27 }
 0x490   :  { %510 = vperm.xlu1 %2272, %v507_v60  }
 0x495   :  { %v493_v10 = vpop.permute.xlu0 %492 }
 0x498   :  { %v2309_v61 = vpop.eup %2308 }
 0x499   :  { %356 = vrot.lane.b32.xlu0 %v2309_v61, %s2413_s27 }
 0x49d   :  { %364 = vperm.xlu0 %2273, %v2025_v62  }
 0x4fe   :  { %v485_v63 = vpop.permute.xlu1 %484 }
 0x4ff   :  { %v487_v7 = vmul.f32 %v2303_v43, %v485_v63 }
 0x501   :  { %v502_v8 = vrot.slane %v487_v7, %v2506_v51 }
 0x503   :  { %503 = vrot.lane.b32.xlu1 %v502_v8, %s2414_s28 }
 0x507   :  { %382 = vperm.xlu1 %2272, %v379_v9   ;;  %v2040_v9 = vld [vmem:[%s3049_s3 + $0xa] sm:$0x3] }
 0x50b   :  { %v357_v13 = vpop.permute.xlu0 %356  ;;  %523 = vrot.lane.b32.xlu1 %v522_v11, %s2416_s7  ;;  %v511_v18 = vpop.permute.xlu1 %510 }
 0x50c   :  { %v359_v14 = vmul.f32 %v2305_v46, %v357_v13  ;;  %v513_v21 = vmul.f32 %v511_v18, %v2519_v6  ;;  %v527_v31 = vmul.f32 %v511_v18, %v2538_v16 }
 0x50e   :  { %v374_v17 = vrot.slane %v359_v14, %v2506_v51 }
 0x50f   :  { %395 = vrot.lane.b32.xlu1 %v394_v15, %s2416_s7 }
 0x510   :  { %375 = vrot.lane.b32.xlu0 %v374_v17, %s2414_s28 }
 0x518   :  { %v365_v25 = vpop.permute.xlu0 %364 }
 0x575   :  { %v504_v19 = vpop.permute.xlu1 %503 }
 0x576   :  { %v2582_v22 = vmul.f32 %v504_v19, %v493_v10 }
 0x578   :  { %v2585_v23 = vadd.f32 %v513_v21, %v2582_v22 }
 0x57a   :  { %v662_v24 = vpack.c.bf16 %v2585_v23, %v2585_v23 }
 0x57c   :  { %2182 = vmatmul.mubr.msk.bf16.vlgmr.msra.gmra.mxu1 %vm39_vm2, %v662_v24  ;;  %v764_v24 = vsub.f32 1.0, %v2040_v9 }
 0x57d   :  { %2194 = vmatpush3.bf16.msra.mxu1 %v2446_v1  ;;  %2197 = vmatprep.mubr.msk.bf16.mxu1 %vm2411_vm0, %v2410_v0 }
 0x57e   :  { %2195 = vmatprep.subr.bf16.mxu1 %v2410_v0 }
 0x581   :  { %2196 = vmatpush3.bf16.msra.mxu1 %v2462_v3 }
 0x582   :  { %v376_v6 = vpop.permute.xlu0 %375  ;;  %v383_v26 = vpop.permute.xlu1 %382  ;;  %2209 = vmatprep.subr.bf16.mxu1 %v2410_v0 }
 0x583   :  { %v378_v27 = vmul.f32 %v376_v6, %v365_v25  ;;  %v385_v28 = vmul.f32 %v383_v26, %v2534_v12  ;;  %v399_v12 = vmul.f32 %v383_v26, %v2547_v20  ;;  %v2037_v20 = vld [vmem:[%s3048_s0 + $0x14] sm:$0xf]  ;;  %v2035_v6 = vld [vmem:[%s3049_s3 + $0x4] sm:$0x3] }
 0x584   :  { %v707_v39 = vrot.slane %v2037_v20, 2 }
 0x585   :  { %2026 = vst.msk [vmem:[%s3050_s4 + $0x2] sm:$0x3] %vm147_vm1, %v378_v27  ;;  %v2601_v29 = vadd.f32 %v385_v28, %v378_v27 }
 0x586   :  { %v524_v30 = vpop.permute.xlu1 %523 }
 0x587   :  { %v537_v32 = vpack.c.bf16 %v2601_v29, %v2601_v29  ;;  %v526_v33 = vmul.f32 %v524_v30, %v493_v10  ;;  %v636_v30 = vsub.f32 1.0, %v2035_v6 }
 0x589   :  { %v2606_v34 = vadd.f32 %v527_v31, %v526_v33  ;;  %2174 = vmatmul.mubr.msk.bf16.vlgmr.msra.gmra.mxu0 %vm39_vm2, %v537_v32 }
 0x58a   :  { %v396_v35 = vpop.permute.xlu1 %395  ;;  %2186 = vmatpush3.bf16.msra.mxu0 %v2452_v2  ;;  %2189 = vmatprep.mubr.msk.bf16.mxu0 %vm2411_vm0, %v2410_v0 }
 0x58b   :  { %v398_v36 = vmul.f32 %v396_v35, %v365_v25  ;;  %v724_v16 = vrot.slane %v2606_v34, %v2506_v51  ;;  %2187 = vmatprep.subr.bf16.mxu0 %v2410_v0 }
 0x58d   :  { %v2616_v37 = vadd.f32 %v399_v12, %v398_v36  ;;  %725 = vrot.lane.b32.xlu1 %v724_v16, %s2414_s28 }
 0x58e   :  { %2188 = vmatpush3.bf16.msra.mxu0 %v2469_v5 }
 0x58f   :  { %v596_v38 = vrot.slane %v2616_v37, %v2506_v51  ;;  %2201 = vmatprep.subr.bf16.mxu0 %v2410_v0 }
 0x591   :  { %597 = vrot.lane.b32.xlu1 %v596_v38, %s2414_s28 }
 0x5ff   :  { %v726_v10 = vpop.permute.xlu1 %725 }
 0x603   :  { %v598_v15 = vpop.permute.xlu1 %597 }
 0x63c   :  { %v700_v40 = vpop.f32.mrf.mxu1 }
 0x63d   :  { %v709_v41 = vadd.f32 %v707_v39, %v700_v40 }
 0x63e   :  { %v2183_v42 = vpop.f32.mrf.mxu1 }
 0x63f   :  { %2310 = vtanh.f32 %v709_v41  ;;  %v2039_v54 = vmul.f32 -1.442695, %v709_v41 }
 0x640   :  { %v703_v43 = vpop.f32.mrf.mxu1 }
 0x642   :  { %v2184_v44 = vpop.f32.mrf.mxu1 }
 0x649   :  { %v575_v46 = vpop.f32.mrf.mxu0 }
 0x64a   :  { %v581_v47 = vadd.f32 %v2032_v45, %v575_v46 }
 0x64b   :  { %v2175_v48 = vpop.f32.mrf.mxu0 }
 0x64c   :  { %v2311_v49 = vpop.eup %2310  ;;  %2312 = vtanh.f32 %v581_v47  ;;  %v2034_v55 = vmul.f32 -1.442695, %v581_v47 }
 0x64d   :  { %730 = vrot.lane.b32.xlu0 %v2311_v49, %s2413_s27  ;;  %v578_v50 = vpop.f32.mrf.mxu0  ;;  %2314 = vpow2.f32 %v2039_v54 }
 0x64e   :  { %2316 = vpow2.f32 %v2034_v55 }
 0x64f   :  { %v2176_v52 = vpop.f32.mrf.mxu0 }
 0x659   :  { %v2313_v53 = vpop.eup %2312 }
 0x65a   :  { %602 = vrot.lane.b32.xlu0 %v2313_v53, %s2413_s27  ;;  %v2315_v56 = vpop.eup %2314 }
 0x65b   :  { %v713_v57 = vadd.f32 1.0, %v2315_v56  ;;  %v2317_v58 = vpop.eup %2316 }
 0x65c   :  { %v585_v59 = vadd.f32 1.0, %v2317_v58 }
 0x65d   :  { %2318 = vrcp.f32 %v713_v57 }
 0x65e   :  { %2320 = vrcp.f32 %v585_v59 }
 0x66a   :  { %v2319_v60 = vpop.eup %2318 }
 0x66b   :  { %v2321_v63 = vpop.eup %2320  ;;  %v728_v11 = vmul.f32 %v2319_v60, %v726_v10 }
 0x66c   :  { %v600_v17 = vmul.f32 %v2321_v63, %v598_v15 }
 0x6bf   :  { %v731_v61 = vpop.permute.xlu0 %730 }
 0x6c0   :  { %v733_v62 = vmul.f32 %v2319_v60, %v731_v61 }
 0x6c2   :  { %735 = vrot.lane.b32.xlu0 %v733_v62, %s2414_s28 }
 0x6cc   :  { %v603_v7 = vpop.permute.xlu0 %602 }
 0x6cd   :  { %v605_v8 = vmul.f32 %v2321_v63, %v603_v7 }
 0x6cf   :  { %607 = vrot.lane.b32.xlu0 %v605_v8, %s2414_s28 }
 0x6d3   :  { %749 = vperm.xlu0 %2273, %v2040_v9  }
 0x734   :  { %v736_v13 = vpop.permute.xlu0 %735 }
 0x735   :  { %v738_v14 = vadd.f32 %v736_v13, %v728_v11 }
 0x737   :  { %2322 = vtanh.f32 %v738_v14  ;;  %v779_v32 = vrot.slane %v738_v14, %v2506_v51 }
 0x741   :  { %v608_v18 = vpop.permute.xlu0 %607 }
 0x742   :  { %v610_v19 = vadd.f32 %v608_v18, %v600_v17 }
 0x744   :  { %v2323_v21 = vpop.eup %2322  ;;  %2324 = vtanh.f32 %v610_v19  ;;  %v651_v12 = vrot.slane %v610_v19, %v2506_v51 }
 0x745   :  { %741 = vrot.lane.b32.xlu1 %v2323_v21, %s2413_s27 }
 0x749   :  { %767 = vperm.xlu1 %2272, %v764_v24  }
 0x74e   :  { %v750_v31 = vpop.permute.xlu0 %749 }
 0x751   :  { %v2325_v25 = vpop.eup %2324 }
 0x752   :  { %613 = vrot.lane.b32.xlu0 %v2325_v25, %s2413_s27 }
 0x756   :  { %621 = vperm.xlu0 %2273, %v2035_v6  }
 0x7b7   :  { %v742_v26 = vpop.permute.xlu1 %741 }
 0x7b8   :  { %v744_v27 = vmul.f32 %v2319_v60, %v742_v26 }
 0x7ba   :  { %v759_v28 = vrot.slane %v744_v27, %v2506_v51 }
 0x7bc   :  { %760 = vrot.lane.b32.xlu1 %v759_v28, %s2414_s28 }
 0x7c0   :  { %639 = vperm.xlu1 %2272, %v636_v30  }
 0x7c4   :  { %v614_v33 = vpop.permute.xlu0 %613  ;;  %780 = vrot.lane.b32.xlu1 %v779_v32, %s2416_s7  ;;  %v768_v16 = vpop.permute.xlu1 %767 }
 0x7c5   :  { %v616_v35 = vmul.f32 %v2321_v63, %v614_v33  ;;  %v770_v20 = vmul.f32 %v768_v16, %v2585_v23  ;;  %v784_v48 = vmul.f32 %v768_v16, %v2606_v34  ;;  %v2042_v63 = vld [vmem:[%s3048_s0 + $0xc] sm:$0xf] }
 0x7c7   :  { %v631_v36 = vrot.slane %v616_v35, %v2506_v51 }
 0x7c8   :  { %652 = vrot.lane.b32.xlu1 %v651_v12, %s2416_s7 }
 0x7c9   :  { %632 = vrot.lane.b32.xlu0 %v631_v36, %s2414_s28 }
 0x7d1   :  { %v622_v42 = vpop.permute.xlu0 %621 }
 0x82e   :  { %v761_v38 = vpop.permute.xlu1 %760 }
 0x82f   :  { %v2651_v39 = vmul.f32 %v761_v38, %v750_v31 }
 0x831   :  { %v2654_v40 = vadd.f32 %v770_v20, %v2651_v39 }
 0x833   :  { %v919_v41 = vpack.c.bf16 %v2654_v40, %v2654_v40 }
 0x835   :  { %2198 = vmatmul.mubr.msk.bf16.vlgmr.msra.gmra.mxu1 %vm39_vm2, %v919_v41 }
 0x836   :  { %2210 = vmatpush3.bf16.msra.mxu1 %v2446_v1  ;;  %2213 = vmatprep.mubr.msk.bf16.mxu1 %vm2411_vm0, %v2410_v0 }
 0x837   :  { %2211 = vmatprep.subr.bf16.mxu1 %v2410_v0 }
 0x83a   :  { %2212 = vmatpush3.bf16.msra.mxu1 %v2462_v3 }
 0x83b   :  { %v633_v23 = vpop.permute.xlu0 %632  ;;  %v640_v43 = vpop.permute.xlu1 %639  ;;  %2225 = vmatprep.subr.bf16.mxu1 %v2410_v0 }
 0x83c   :  { %v635_v44 = vmul.f32 %v633_v23, %v622_v42  ;;  %v642_v45 = vmul.f32 %v640_v43, %v2601_v29  ;;  %v656_v29 = vmul.f32 %v640_v43, %v2616_v37  ;;  %v2047_v37 = vld [vmem:[%s3048_s0 + $0x10] sm:$0xf]  ;;  %v2045_v43 = vld [vmem:[%s3049_s3 + $0x6] sm:$0x3] }
 0x83d   :  { %v964_v57 = vrot.slane %v2047_v37, 2 }
 0x83e   :  { %2036 = vst.msk [vmem:[%s3050_s4 + $0x4] sm:$0x3] %vm147_vm1, %v635_v44  ;;  %v2670_v46 = vadd.f32 %v642_v45, %v635_v44 }
 0x83f   :  { %v781_v47 = vpop.permute.xlu1 %780 }
 0x840   :  { %v794_v49 = vpack.c.bf16 %v2670_v46, %v2670_v46  ;;  %v783_v50 = vmul.f32 %v781_v47, %v750_v31  ;;  %v2050_v31 = vld [vmem:[%s3049_s3 + $0x8] sm:$0x3] }
 0x842   :  { %v2675_v52 = vadd.f32 %v784_v48, %v783_v50  ;;  %2190 = vmatmul.mubr.msk.bf16.vlgmr.msra.gmra.mxu0 %vm39_vm2, %v794_v49  ;;  %v893_v48 = vsub.f32 1.0, %v2045_v43 }
 0x843   :  { %v653_v53 = vpop.permute.xlu1 %652  ;;  %2202 = vmatpush3.bf16.msra.mxu0 %v2452_v2  ;;  %2205 = vmatprep.mubr.msk.bf16.mxu0 %vm2411_vm0, %v2410_v0 }
 0x844   :  { %v655_v54 = vmul.f32 %v653_v53, %v622_v42  ;;  %v981_v34 = vrot.slane %v2675_v52, %v2506_v51  ;;  %2203 = vmatprep.subr.bf16.mxu0 %v2410_v0  ;;  %v1021_v42 = vsub.f32 1.0, %v2050_v31 }
 0x846   :  { %v2685_v55 = vadd.f32 %v656_v29, %v655_v54  ;;  %982 = vrot.lane.b32.xlu1 %v981_v34, %s2414_s28 }
 0x847   :  { %2204 = vmatpush3.bf16.msra.mxu0 %v2469_v5 }
 0x848   :  { %v853_v56 = vrot.slane %v2685_v55, %v2506_v51  ;;  %2217 = vmatprep.subr.bf16.mxu0 %v2410_v0 }
 0x84a   :  { %854 = vrot.lane.b32.xlu1 %v853_v56, %s2414_s28 }
 0x8b8   :  { %v983_v32 = vpop.permute.xlu1 %982 }
 0x8bc   :  { %v855_v36 = vpop.permute.xlu1 %854 }
 0x8f5   :  { %v957_v58 = vpop.f32.mrf.mxu1 }
 0x8f6   :  { %v966_v59 = vadd.f32 %v964_v57, %v957_v58 }
 0x8f7   :  { %v2199_v60 = vpop.f32.mrf.mxu1 }
 0x8f8   :  { %2326 = vtanh.f32 %v966_v59  ;;  %v2049_v15 = vmul.f32 -1.442695, %v966_v59 }
 0x8f9   :  { %v960_v61 = vpop.f32.mrf.mxu1 }
 0x8fb   :  { %v2200_v62 = vpop.f32.mrf.mxu1 }
 0x902   :  { %v832_v7 = vpop.f32.mrf.mxu0 }
 0x903   :  { %v838_v8 = vadd.f32 %v2042_v63, %v832_v7 }
 0x904   :  { %v2191_v9 = vpop.f32.mrf.mxu0 }
 0x905   :  { %v2327_v10 = vpop.eup %2326  ;;  %2328 = vtanh.f32 %v838_v8  ;;  %v2044_v17 = vmul.f32 -1.442695, %v838_v8 }
 0x906   :  { %987 = vrot.lane.b32.xlu0 %v2327_v10, %s2413_s27  ;;  %v835_v11 = vpop.f32.mrf.mxu0  ;;  %2330 = vpow2.f32 %v2049_v15 }
 0x907   :  { %2332 = vpow2.f32 %v2044_v17 }
 0x908   :  { %v2192_v13 = vpop.f32.mrf.mxu0 }
 0x912   :  { %v2329_v14 = vpop.eup %2328 }
 0x913   :  { %859 = vrot.lane.b32.xlu0 %v2329_v14, %s2413_s27  ;;  %v2331_v18 = vpop.eup %2330 }
 0x914   :  { %v970_v19 = vadd.f32 1.0, %v2331_v18  ;;  %v2333_v21 = vpop.eup %2332 }
 0x915   :  { %v842_v24 = vadd.f32 1.0, %v2333_v21 }
 0x916   :  { %2334 = vrcp.f32 %v970_v19 }
 0x917   :  { %2336 = vrcp.f32 %v842_v24 }
 0x923   :  { %v2335_v25 = vpop.eup %2334 }
 0x924   :  { %v2337_v27 = vpop.eup %2336  ;;  %v985_v33 = vmul.f32 %v2335_v25, %v983_v32 }
 0x925   :  { %v857_v16 = vmul.f32 %v2337_v27, %v855_v36 }
 0x978   :  { %v988_v6 = vpop.permute.xlu0 %987 }
 0x979   :  { %v990_v26 = vmul.f32 %v2335_v25, %v988_v6 }
 0x97b   :  { %992 = vrot.lane.b32.xlu0 %v990_v26, %s2414_s28 }
 0x985   :  { %v860_v28 = vpop.permute.xlu0 %859 }
 0x986   :  { %v862_v30 = vmul.f32 %v2337_v27, %v860_v28 }
 0x988   :  { %864 = vrot.lane.b32.xlu0 %v862_v30, %s2414_s28 }
 0x98c   :  { %1006 = vperm.xlu0 %2273, %v2050_v31  }
 0x9ed   :  { %v993_v35 = vpop.permute.xlu0 %992 }
 0x9ee   :  { %v995_v12 = vadd.f32 %v993_v35, %v985_v33 }
 0x9f0   :  { %2338 = vtanh.f32 %v995_v12  ;;  %v1036_v50 = vrot.slane %v995_v12, %v2506_v51 }
 0x9fa   :  { %v865_v38 = vpop.permute.xlu0 %864 }
 0x9fb   :  { %v867_v20 = vadd.f32 %v865_v38, %v857_v16 }
 0x9fd   :  { %v2339_v41 = vpop.eup %2338  ;;  %2340 = vtanh.f32 %v867_v20  ;;  %v908_v54 = vrot.slane %v867_v20, %v2506_v51 }
 0x9fe   :  { %998 = vrot.lane.b32.xlu1 %v2339_v41, %s2413_s27 }
 0xa02   :  { %1024 = vperm.xlu1 %2272, %v1021_v42  }
 0xa07   :  { %v1007_v49 = vpop.permute.xlu0 %1006 }
 0xa0a   :  { %v2341_v23 = vpop.eup %2340 }
 0xa0b   :  { %870 = vrot.lane.b32.xlu0 %v2341_v23, %s2413_s27 }
 0xa0f   :  { %878 = vperm.xlu0 %2273, %v2045_v43  }
 0xa70   :  { %v999_v44 = vpop.permute.xlu1 %998 }
 0xa71   :  { %v1001_v45 = vmul.f32 %v2335_v25, %v999_v44 }
 0xa73   :  { %v1016_v47 = vrot.slane %v1001_v45, %v2506_v51  ;;  %v2060_v45 = vld [vmem:[%s3049_s3 + $0x6] sm:$0x3] }
 0xa75   :  { %1017 = vrot.lane.b32.xlu1 %v1016_v47, %s2414_s28 }
 0xa79   :  { %896 = vperm.xlu1 %2272, %v893_v48  }
 0xa7d   :  { %v871_v53 = vpop.permute.xlu0 %870  ;;  %1037 = vrot.lane.b32.xlu1 %v1036_v50, %s2416_s7  ;;  %v1025_v56 = vpop.permute.xlu1 %1024 }
 0xa7e   :  { %v873_v29 = vmul.f32 %v2337_v27, %v871_v53  ;;  %v1027_v57 = vmul.f32 %v1025_v56, %v2654_v40  ;;  %v1041_v9 = vmul.f32 %v1025_v56, %v2675_v52 }
 0xa80   :  { %v888_v34 = vrot.slane %v873_v29, %v2506_v51 }
 0xa81   :  { %909 = vrot.lane.b32.xlu1 %v908_v54, %s2416_s7 }
 0xa82   :  { %889 = vrot.lane.b32.xlu0 %v888_v34, %s2414_s28 }
 0xa8a   :  { %v879_v61 = vpop.permute.xlu0 %878 }
 0xae7   :  { %v1018_v37 = vpop.permute.xlu1 %1017 }
 0xae8   :  { %v2720_v58 = vmul.f32 %v1018_v37, %v1007_v49  ;;  %v1273_v37 = vsub.f32 1.0, %v2060_v45 }
 0xaea   :  { %v2723_v59 = vadd.f32 %v1027_v57, %v2720_v58 }
 0xaec   :  { %v1172_v60 = vpack.c.bf16 %v2723_v59, %v2723_v59 }
 0xaee   :  { %2214 = vmatmul.mubr.msk.bf16.vlgmr.msra.gmra.mxu1 %vm39_vm2, %v1172_v60  ;;  %v2055_v60 = vld [vmem:[%s3049_s3 + $0x8] sm:$0x3] }
 0xaef   :  { %2226 = vmatpush3.bf16.msra.mxu1 %v2446_v1  ;;  %2229 = vmatprep.mubr.msk.bf16.mxu1 %vm2411_vm0, %v2410_v0 }
 0xaf0   :  { %2227 = vmatprep.subr.bf16.mxu1 %v2410_v0 }
 0xaf3   :  { %2228 = vmatpush3.bf16.msra.mxu1 %v2462_v3 }
 0xaf4   :  { %v890_v40 = vpop.permute.xlu0 %889  ;;  %v897_v62 = vpop.permute.xlu1 %896  ;;  %2241 = vmatprep.subr.bf16.mxu1 %v2410_v0 }
 0xaf5   :  { %v892_v63 = vmul.f32 %v890_v40, %v879_v61  ;;  %v899_v7 = vmul.f32 %v897_v62, %v2670_v46  ;;  %v913_v46 = vmul.f32 %v897_v62, %v2685_v55  ;;  %v2057_v55 = vld [vmem:[%s3048_s0 + $0xc] sm:$0xf] }
 0xaf6   :  { %v1217_v17 = vrot.slane %v2057_v55, 2 }
 0xaf7   :  { %2046 = vst.msk [vmem:[%s3050_s4 + $0x6] sm:$0x3] %vm147_vm1, %v892_v63  ;;  %v2739_v1 = vadd.f32 %v899_v7, %v892_v63  ;;  %v1148_v63 = vsub.f32 1.0, %v2055_v60 }
 0xaf8   :  { %v1038_v8 = vpop.permute.xlu1 %1037 }
 0xaf9   :  { %v1050_v3 = vpack.c.bf16 %v2739_v1, %v2739_v1  ;;  %v1040_v10 = vmul.f32 %v1038_v8, %v1007_v49 }
 0xafb   :  { %v2744_v11 = vadd.f32 %v1041_v9, %v1040_v10  ;;  %2206 = vmatmul.mubr.msk.bf16.vlgmr.msra.gmra.mxu0 %vm39_vm2, %v1050_v3 }
 0xafc   :  { %v910_v13 = vpop.permute.xlu1 %909  ;;  %2218 = vmatpush3.bf16.msra.mxu0 %v2452_v2  ;;  %2221 = vmatprep.mubr.msk.bf16.mxu0 %vm2411_vm0, %v2410_v0 }
 0xafd   :  { %v912_v14 = vmul.f32 %v910_v13, %v879_v61  ;;  %v1234_v52 = vrot.slane %v2744_v11, %v2506_v51  ;;  %2219 = vmatprep.subr.bf16.mxu0 %v2410_v0 }
 0xaff   :  { %v2754_v15 = vadd.f32 %v913_v46, %v912_v14  ;;  %1235 = vrot.lane.b32.xlu1 %v1234_v52, %s2414_s28 }
 0xb00   :  { %2220 = vmatpush3.bf16.msra.mxu0 %v2469_v5  ;;  %v2052_v5 = vld [vmem:[%s3048_s0 + $0x10] sm:$0xf] }
 0xb01   :  { %v1109_v2 = vrot.slane %v2754_v15, %v2506_v51  ;;  %2233 = vmatprep.subr.bf16.mxu0 %v2410_v0 }
 0xb03   :  { %1110 = vrot.lane.b32.xlu1 %v1109_v2, %s2414_s28 }
 0xb71   :  { %v1236_v47 = vpop.permute.xlu1 %1235 }
 0xb75   :  { %v1111_v53 = vpop.permute.xlu1 %1110 }
 0xbae   :  { %v1210_v18 = vpop.f32.mrf.mxu1 }
 0xbaf   :  { %v1219_v19 = vadd.f32 %v1217_v17, %v1210_v18  ;;  %v2800_v18 = vld [vmem:[%s3046_s2 + $0x8] sm:$0xff]  }
 0xbb0   :  { %v2215_v21 = vpop.f32.mrf.mxu1 }
 0xbb1   :  { %2342 = vtanh.f32 %v1219_v19  ;;  %v2059_v33 = vmul.f32 -1.442695, %v1219_v19  ;;  %v2809_v19 = vld [vmem:[%s3046_s2] sm:$0xff]  }
 0xbb2   :  { %v1213_v24 = vpop.f32.mrf.mxu1 }
 0xbb4   :  { %v2216_v25 = vpop.f32.mrf.mxu1 }
 0xbbb   :  { %v1088_v6 = vpop.f32.mrf.mxu0 }
 0xbbc   :  { %v1094_v26 = vadd.f32 %v2052_v5, %v1088_v6 }
 0xbbd   :  { %v2207_v27 = vpop.f32.mrf.mxu0 }
 0xbbe   :  { %v2343_v28 = vpop.eup %2342  ;;  %2344 = vtanh.f32 %v1094_v26  ;;  %v2054_v35 = vmul.f32 -1.442695, %v1094_v26 }
 0xbbf   :  { %1240 = vrot.lane.b32.xlu0 %v2343_v28, %s2413_s27  ;;  %v1091_v30 = vpop.f32.mrf.mxu0  ;;  %2346 = vpow2.f32 %v2059_v33  ;;  %v2828_v33 = vld [vmem:[%s3047_s1 + $0x8] sm:$0xff]  }
 0xbc0   :  { %2348 = vpow2.f32 %v2054_v35 }
 0xbc1   :  { %v2208_v31 = vpop.f32.mrf.mxu0 }
 0xbcb   :  { %v2345_v32 = vpop.eup %2344 }
 0xbcc   :  { %1115 = vrot.lane.b32.xlu0 %v2345_v32, %s2413_s27  ;;  %v2347_v12 = vpop.eup %2346 }
 0xbcd   :  { %v1223_v36 = vadd.f32 1.0, %v2347_v12  ;;  %v2349_v16 = vpop.eup %2348 }
 0xbce   :  { %v1098_v38 = vadd.f32 1.0, %v2349_v16  ;;  %v2067_v16 = vld [vmem:[%s3048_s0 + $0x8] sm:$0xf] }
 0xbcf   :  { %2350 = vrcp.f32 %v1223_v36  ;;  %v2843_v36 = vld [vmem:[%s3047_s1] sm:$0xff]  }
 0xbd0   :  { %2352 = vrcp.f32 %v1098_v38  ;;  %v1468_v38 = vrot.slane %v2067_v16, 2 }
 0xbdc   :  { %v2351_v20 = vpop.eup %2350 }
 0xbdd   :  { %v2353_v23 = vpop.eup %2352  ;;  %v1238_v48 = vmul.f32 %v2351_v20, %v1236_v47 }
 0xbde   :  { %v1113_v29 = vmul.f32 %v2353_v23, %v1111_v53 }
 0xc31   :  { %v1241_v41 = vpop.permute.xlu0 %1240 }
 0xc32   :  { %v1243_v42 = vmul.f32 %v2351_v20, %v1241_v41 }
 0xc34   :  { %1245 = vrot.lane.b32.xlu0 %v1243_v42, %s2414_s28 }
 0xc3e   :  { %v1116_v43 = vpop.permute.xlu0 %1115 }
 0xc3f   :  { %v1118_v44 = vmul.f32 %v2353_v23, %v1116_v43 }
 0xc41   :  { %1120 = vrot.lane.b32.xlu0 %v1118_v44, %s2414_s28  ;;  %v2062_v44 = vld [vmem:[%s3048_s0 + $0x14] sm:$0xf] }
 0xc45   :  { %1258 = vperm.xlu0 %2273, %v2060_v45  }
 0xca6   :  { %v1246_v49 = vpop.permute.xlu0 %1245 }
 0xca7   :  { %v1248_v50 = vadd.f32 %v1246_v49, %v1238_v48 }
 0xca9   :  { %2354 = vtanh.f32 %v1248_v50  ;;  %v1288_v8 = vrot.slane %v1248_v50, %v2506_v51 }
 0xcb3   :  { %v1121_v54 = vpop.permute.xlu0 %1120 }
 0xcb4   :  { %v1123_v34 = vadd.f32 %v1121_v54, %v1113_v29 }
 0xcb6   :  { %v2355_v56 = vpop.eup %2354  ;;  %2356 = vtanh.f32 %v1123_v34  ;;  %v1163_v10 = vrot.slane %v1123_v34, %v2506_v51 }
 0xcb7   :  { %1251 = vrot.lane.b32.xlu1 %v2355_v56, %s2413_s27 }
 0xcbb   :  { %1276 = vperm.xlu1 %2272, %v1273_v37  }
 0xcc0   :  { %v1259_v7 = vpop.permute.xlu0 %1258 }
 0xcc3   :  { %v2357_v57 = vpop.eup %2356 }
 0xcc4   :  { %1126 = vrot.lane.b32.xlu0 %v2357_v57, %s2413_s27 }
 0xcc8   :  { %1133 = vperm.xlu0 %2273, %v2055_v60  }
 0xd29   :  { %v1252_v61 = vpop.permute.xlu1 %1251 }
 0xd2a   :  { %v1254_v40 = vmul.f32 %v2351_v20, %v1252_v61 }
 0xd2c   :  { %v1268_v62 = vrot.slane %v1254_v40, %v2506_v51 }
 0xd2e   :  { %1269 = vrot.lane.b32.xlu1 %v1268_v62, %s2414_s28 }
 0xd32   :  { %1151 = vperm.xlu1 %2272, %v1148_v63  }
 0xd36   :  { %v1127_v9 = vpop.permute.xlu0 %1126  ;;  %1289 = vrot.lane.b32.xlu1 %v1288_v8, %s2416_s7  ;;  %v1277_v46 = vpop.permute.xlu1 %1276 }
 0xd37   :  { %v1129_v3 = vmul.f32 %v2353_v23, %v1127_v9  ;;  %v1279_v52 = vmul.f32 %v1277_v46, %v2723_v59  ;;  %v1293_v27 = vmul.f32 %v1277_v46, %v2744_v11  ;;  %v2070_v9 = vld [vmem:[%s3049_s3 + $0x4] sm:$0x3] }
 0xd39   :  { %v1143_v13 = vrot.slane %v1129_v3, %v2506_v51 }
 0xd3a   :  { %1164 = vrot.lane.b32.xlu1 %v1163_v10, %s2416_s7 }
 0xd3b   :  { %1144 = vrot.lane.b32.xlu0 %v1143_v13, %s2414_s28 }
 0xd43   :  { %v1134_v59 = vpop.permute.xlu0 %1133 }
 0xda0   :  { %v1270_v14 = vpop.permute.xlu1 %1269 }
 0xda1   :  { %v2789_v2 = vmul.f32 %v1270_v14, %v1259_v7 }
 0xda3   :  { %v2792_v55 = vadd.f32 %v1279_v52, %v2789_v2 }
 0xda5   :  { %v1423_v17 = vpack.c.bf16 %v2792_v55, %v2792_v55 }
 0xda7   :  { %2230 = vmatmul.mubr.msk.bf16.vlgmr.msra.gmra.mxu1 %vm39_vm2, %v1423_v17 }
 0xda8   :  { %2242 = vmatpush3.bf16.msra.mxu1 %v2800_v18  ;;  %2245 = vmatprep.mubr.msk.bf16.mxu1 %vm2411_vm0, %v2410_v0 }
 0xda9   :  { %2243 = vmatprep.subr.bf16.mxu1 %v2410_v0 }
 0xdac   :  { %2244 = vmatpush3.bf16.msra.mxu1 %v2809_v19 }
 0xdad   :  { %v1145_v21 = vpop.permute.xlu0 %1144  ;;  %v1152_v24 = vpop.permute.xlu1 %1151  ;;  %2257 = vmatprep.subr.bf16.mxu1 %v2410_v0 }
 0xdae   :  { %v2813_v25 = vmul.f32 %v1145_v21, %v1134_v59  ;;  %v1154_v5 = vmul.f32 %v1152_v24, %v2739_v1  ;;  %v1168_v1 = vmul.f32 %v1152_v24, %v2754_v15  ;;  %v1524_v24 = vsub.f32 1.0, %v2070_v9 }
 0xdb0   :  { %v2817_v6 = vadd.f32 %v1154_v5, %v2813_v25 }
 0xdb1   :  { %v1290_v26 = vpop.permute.xlu1 %1289 }
 0xdb2   :  { %v1301_v28 = vpack.c.bf16 %v2817_v6, %v2817_v6  ;;  %v1292_v30 = vmul.f32 %v1290_v26, %v1259_v7  ;;  %v2065_v26 = vld [vmem:[%s3049_s3 + $0xa] sm:$0x3] }
 0xdb4   :  { %v2822_v31 = vadd.f32 %v1293_v27, %v1292_v30  ;;  %2222 = vmatmul.mubr.msk.bf16.vlgmr.msra.gmra.mxu0 %vm39_vm2, %v1301_v28 }
 0xdb5   :  { %v1165_v32 = vpop.permute.xlu1 %1164  ;;  %2234 = vmatpush3.bf16.msra.mxu0 %v2828_v33  ;;  %2237 = vmatprep.mubr.msk.bf16.mxu0 %vm2411_vm0, %v2410_v0 }
 0xdb6   :  { %v1167_v11 = vmul.f32 %v1165_v32, %v1134_v59  ;;  %v1485_v35 = vrot.slane %v2822_v31, %v2506_v51  ;;  %2235 = vmatprep.subr.bf16.mxu0 %v2410_v0  ;;  %v1399_v32 = vsub.f32 1.0, %v2065_v26 }
 0xdb8   :  { %v2837_v12 = vadd.f32 %v1168_v1, %v1167_v11  ;;  %1486 = vrot.lane.b32.xlu1 %v1485_v35, %s2414_s28 }
 0xdb9   :  { %2236 = vmatpush3.bf16.msra.mxu0 %v2843_v36 }
 0xdba   :  { %v1360_v15 = vrot.slane %v2837_v12, %v2506_v51  ;;  %2249 = vmatprep.subr.bf16.mxu0 %v2410_v0 }
 0xdbc   :  { %1361 = vrot.lane.b32.xlu1 %v1360_v15, %s2414_s28 }
 0xe2a   :  { %v1487_v3 = vpop.permute.xlu1 %1486 }
 0xe2e   :  { %v1362_v14 = vpop.permute.xlu1 %1361 }
 0xe67   :  { %v1461_v20 = vpop.f32.mrf.mxu1 }
 0xe68   :  { %v1470_v41 = vadd.f32 %v1468_v38, %v1461_v20 }
 0xe69   :  { %v2231_v42 = vpop.f32.mrf.mxu1 }
 0xe6a   :  { %2358 = vtanh.f32 %v1470_v41  ;;  %v2069_v54 = vmul.f32 -1.442695, %v1470_v41 }
 0xe6b   :  { %v1464_v23 = vpop.f32.mrf.mxu1 }
 0xe6d   :  { %v2232_v43 = vpop.f32.mrf.mxu1 }
 0xe74   :  { %v1339_v45 = vpop.f32.mrf.mxu0 }
 0xe75   :  { %v1345_v47 = vadd.f32 %v2062_v44, %v1339_v45 }
 0xe76   :  { %v2223_v48 = vpop.f32.mrf.mxu0 }
 0xe77   :  { %v2359_v49 = vpop.eup %2358  ;;  %2360 = vtanh.f32 %v1345_v47  ;;  %v2064_v34 = vmul.f32 -1.442695, %v1345_v47 }
 0xe78   :  { %1491 = vrot.lane.b32.xlu0 %v2359_v49, %s2413_s27  ;;  %v1342_v50 = vpop.f32.mrf.mxu0  ;;  %2362 = vpow2.f32 %v2069_v54 }
 0xe79   :  { %2364 = vpow2.f32 %v2064_v34 }
 0xe7a   :  { %v2224_v53 = vpop.f32.mrf.mxu0 }
 0xe84   :  { %v2361_v29 = vpop.eup %2360 }
 0xe85   :  { %1366 = vrot.lane.b32.xlu0 %v2361_v29, %s2413_s27  ;;  %v2363_v56 = vpop.eup %2362 }
 0xe86   :  { %v1474_v37 = vadd.f32 1.0, %v2363_v56  ;;  %v2365_v57 = vpop.eup %2364 }
 0xe87   :  { %v1349_v60 = vadd.f32 1.0, %v2365_v57 }
 0xe88   :  { %2366 = vrcp.f32 %v1474_v37 }
 0xe89   :  { %2368 = vrcp.f32 %v1349_v60 }
 0xe95   :  { %v2367_v61 = vpop.eup %2366 }
 0xe96   :  { %v2369_v63 = vpop.eup %2368  ;;  %v1489_v10 = vmul.f32 %v2367_v61, %v1487_v3 }
 0xe97   :  { %v1364_v52 = vmul.f32 %v2369_v63, %v1362_v14 }
 0xeea   :  { %v1492_v40 = vpop.permute.xlu0 %1491 }
 0xeeb   :  { %v1494_v62 = vmul.f32 %v2367_v61, %v1492_v40 }
 0xeed   :  { %1496 = vrot.lane.b32.xlu0 %v1494_v62, %s2414_s28 }
 0xef7   :  { %v1367_v7 = vpop.permute.xlu0 %1366 }
 0xef8   :  { %v1369_v8 = vmul.f32 %v2369_v63, %v1367_v7 }
 0xefa   :  { %1371 = vrot.lane.b32.xlu0 %v1369_v8, %s2414_s28 }
 0xefe   :  { %1509 = vperm.xlu0 %2273, %v2070_v9  }
 0xf5f   :  { %v1497_v13 = vpop.permute.xlu0 %1496 }
 0xf60   :  { %v1499_v46 = vadd.f32 %v1497_v13, %v1489_v10 }
 0xf62   :  { %2370 = vtanh.f32 %v1499_v46  ;;  %v1539_v11 = vrot.slane %v1499_v46, %v2506_v51 }
 0xf6c   :  { %v1372_v17 = vpop.permute.xlu0 %1371 }
 0xf6d   :  { %v1374_v59 = vadd.f32 %v1372_v17, %v1364_v52 }
 0xf6f   :  { %v2371_v21 = vpop.eup %2370  ;;  %2372 = vtanh.f32 %v1374_v59  ;;  %v1414_v16 = vrot.slane %v1374_v59, %v2506_v51 }
 0xf70   :  { %1502 = vrot.lane.b32.xlu1 %v2371_v21, %s2413_s27 }
 0xf74   :  { %1527 = vperm.xlu1 %2272, %v1524_v24  }
 0xf79   :  { %v1510_v1 = vpop.permute.xlu0 %1509 }
 0xf7c   :  { %v2373_v5 = vpop.eup %2372 }
 0xf7d   :  { %1377 = vrot.lane.b32.xlu0 %v2373_v5, %s2413_s27 }
 0xf81   :  { %1384 = vperm.xlu0 %2273, %v2065_v26  }
 0xfe2   :  { %v1503_v27 = vpop.permute.xlu1 %1502 }
 0xfe3   :  { %v1505_v28 = vmul.f32 %v2367_v61, %v1503_v27 }
 0xfe5   :  { %v1519_v30 = vrot.slane %v1505_v28, %v2506_v51 }
 0xfe7   :  { %1520 = vrot.lane.b32.xlu1 %v1519_v30, %s2414_s28 }
 0xfeb   :  { %1402 = vperm.xlu1 %2272, %v1399_v32   ;;  %v2080_v32 = vld [vmem:[%s3049_s3 + $0x2] sm:$0x3] }
 0xfef   :  { %v1378_v35 = vpop.permute.xlu0 %1377  ;;  %1540 = vrot.lane.b32.xlu1 %v1539_v11, %s2416_s7  ;;  %v1528_v20 = vpop.permute.xlu1 %1527 }
 0xff0   :  { %v1380_v15 = vmul.f32 %v2369_v63, %v1378_v35  ;;  %v1530_v42 = vmul.f32 %v1528_v20, %v2792_v55 }
 0xff2   :  { %v1394_v38 = vrot.slane %v1380_v15, %v2506_v51 }
 0xff3   :  { %1415 = vrot.lane.b32.xlu1 %v1414_v16, %s2416_s7 }
 0xff4   :  { %1395 = vrot.lane.b32.xlu0 %v1394_v38, %s2414_s28 }
 0xffc   :  { %v1385_v45 = vpop.permute.xlu0 %1384 }
0x1059   :  { %v1521_v41 = vpop.permute.xlu1 %1520 }
0x105a   :  { %v2877_v23 = vmul.f32 %v1521_v41, %v1510_v1 }
0x105c   :  { %v2880_v43 = vadd.f32 %v1530_v42, %v2877_v23 }
0x105e   :  { %v1674_v44 = vpack.c.bf16 %v2880_v43, %v2880_v43 }
0x1060   :  { %2246 = vmatmul.mubr.msk.bf16.vlgmr.msra.gmra.mxu1 %vm39_vm2, %v1674_v44  ;;  %v1775_v44 = vsub.f32 1.0, %v2080_v32 }
0x1061   :  { %2258 = vmatpush3.bf16.msra.mxu1 %v2800_v18  ;;  %2261 = vmatprep.mubr.msk.bf16.mxu1 %vm2411_vm0, %v2410_v0  ;;  %v1544_v18 = vmul.f32 %v1528_v20, %v2822_v31 }
0x1062   :  { %2259 = vmatprep.subr.bf16.mxu1 %v2410_v0 }
0x1065   :  { %2260 = vmatpush3.bf16.msra.mxu1 %v2809_v19 }
0x1066   :  { %v1396_v55 = vpop.permute.xlu0 %1395  ;;  %v1403_v47 = vpop.permute.xlu1 %1402 }
0x1067   :  { %v2890_v48 = vmul.f32 %v1396_v55, %v1385_v45  ;;  %v1405_v49 = vmul.f32 %v1403_v47, %v2817_v6  ;;  %v1419_v6 = vmul.f32 %v1403_v47, %v2837_v12  ;;  %v2077_v12 = vld [vmem:[%s3048_s0 + $0x4] sm:$0xf]  ;;  %v2075_v55 = vld [vmem:[%s3049_s3 + $0xc] sm:$0x3] }
0x1068   :  { %v1719_v57 = vrot.slane %v2077_v12, 2 }
0x1069   :  { %v2894_v50 = vadd.f32 %v1405_v49, %v2890_v48 }
0x106a   :  { %v1541_v53 = vpop.permute.xlu1 %1540 }
0x106b   :  { %v1552_v29 = vpack.c.bf16 %v2894_v50, %v2894_v50  ;;  %v1543_v54 = vmul.f32 %v1541_v53, %v1510_v1 }
0x106d   :  { %v2899_v34 = vadd.f32 %v1544_v18, %v1543_v54  ;;  %2238 = vmatmul.mubr.msk.bf16.vlgmr.msra.gmra.mxu0 %vm39_vm2, %v1552_v29  ;;  %v1650_v18 = vsub.f32 1.0, %v2075_v55 }
0x106e   :  { %v1416_v19 = vpop.permute.xlu1 %1415  ;;  %2250 = vmatpush3.bf16.msra.mxu0 %v2828_v33  ;;  %2253 = vmatprep.mubr.msk.bf16.mxu0 %vm2411_vm0, %v2410_v0 }
0x106f   :  { %v1418_v56 = vmul.f32 %v1416_v19, %v1385_v45  ;;  %v1736_v31 = vrot.slane %v2899_v34, %v2506_v51  ;;  %2251 = vmatprep.subr.bf16.mxu0 %v2410_v0 }
0x1071   :  { %v2909_v37 = vadd.f32 %v1419_v6, %v1418_v56  ;;  %1737 = vrot.lane.b32.xlu1 %v1736_v31, %s2414_s28 }
0x1072   :  { %2252 = vmatpush3.bf16.msra.mxu0 %v2843_v36  ;;  %v2072_v36 = vld [vmem:[%s3048_s0 + $0x18] sm:$0xf] }
0x1073   :  { %v1611_v33 = vrot.slane %v2909_v37, %v2506_v51 }
0x1075   :  { %1612 = vrot.lane.b32.xlu1 %v1611_v33, %s2414_s28 }
0x10e3   :  { %v1738_v1 = vpop.permute.xlu1 %1737 }
0x10e7   :  { %v1613_v16 = vpop.permute.xlu1 %1612 }
0x1120   :  { %v1712_v60 = vpop.f32.mrf.mxu1 }
0x1121   :  { %v1721_v61 = vadd.f32 %v1719_v57, %v1712_v60 }
0x1122   :  { %v2247_v40 = vpop.f32.mrf.mxu1 }
0x1123   :  { %2374 = vtanh.f32 %v1721_v61  ;;  %v2079_v46 = vmul.f32 -1.442695, %v1721_v61 }
0x1124   :  { %v1715_v0 = vpop.f32.mrf.mxu1 }
0x1126   :  { %v2248_v62 = vpop.f32.mrf.mxu1 }
0x112d   :  { %v1590_v63 = vpop.f32.mrf.mxu0 }
0x112e   :  { %v1596_v7 = vadd.f32 %v2072_v36, %v1590_v63 }
0x112f   :  { %v2239_v8 = vpop.f32.mrf.mxu0 }
0x1130   :  { %v2375_v9 = vpop.eup %2374  ;;  %2376 = vtanh.f32 %v1596_v7  ;;  %v2074_v14 = vmul.f32 -1.442695, %v1596_v7 }
0x1131   :  { %1742 = vrot.lane.b32.xlu0 %v2375_v9, %s2413_s27  ;;  %v1593_v3 = vpop.f32.mrf.mxu0  ;;  %2378 = vpow2.f32 %v2079_v46 }
0x1132   :  { %2380 = vpow2.f32 %v2074_v14 }
0x1133   :  { %v2240_v10 = vpop.f32.mrf.mxu0 }
0x113d   :  { %v2377_v13 = vpop.eup %2376 }
0x113e   :  { %1617 = vrot.lane.b32.xlu0 %v2377_v13, %s2413_s27  ;;  %v2379_v52 = vpop.eup %2378 }
0x113f   :  { %v1725_v17 = vadd.f32 1.0, %v2379_v52  ;;  %v2381_v59 = vpop.eup %2380 }
0x1140   :  { %v1600_v21 = vadd.f32 1.0, %v2381_v59 }
0x1141   :  { %2382 = vrcp.f32 %v1725_v17 }
0x1142   :  { %2384 = vrcp.f32 %v1600_v21 }
0x114e   :  { %v2383_v24 = vpop.eup %2382 }
0x114f   :  { %v2385_v27 = vpop.eup %2384  ;;  %v1740_v11 = vmul.f32 %v2383_v24, %v1738_v1 }
0x1150   :  { %v1615_v38 = vmul.f32 %v2385_v27, %v1613_v16 }
0x11a3   :  { %v1743_v5 = vpop.permute.xlu0 %1742 }
0x11a4   :  { %v1745_v26 = vmul.f32 %v2383_v24, %v1743_v5 }
0x11a6   :  { %1747 = vrot.lane.b32.xlu0 %v1745_v26, %s2414_s28 }
0x11b0   :  { %v1618_v28 = vpop.permute.xlu0 %1617 }
0x11b1   :  { %v1620_v30 = vmul.f32 %v2385_v27, %v1618_v28  ;;  %v2082_v28 = vld [vmem:[%s3048_s0 + $0x1c] sm:$0xf] }
0x11b3   :  { %1622 = vrot.lane.b32.xlu0 %v1620_v30, %s2414_s28 }
0x11b7   :  { %1760 = vperm.xlu0 %2273, %v2080_v32  }
0x1218   :  { %v1748_v35 = vpop.permute.xlu0 %1747 }
0x1219   :  { %v1750_v15 = vadd.f32 %v1748_v35, %v1740_v11 }
0x121b   :  { %2386 = vtanh.f32 %v1750_v15  ;;  %v1790_v54 = vrot.slane %v1750_v15, %v2506_v51 }
0x1225   :  { %v1623_v20 = vpop.permute.xlu0 %1622 }
0x1226   :  { %v1625_v41 = vadd.f32 %v1623_v20, %v1615_v38 }
0x1228   :  { %v2387_v42 = vpop.eup %2386  ;;  %2388 = vtanh.f32 %v1625_v41  ;;  %v1665_v56 = vrot.slane %v1625_v41, %v2506_v51 }
0x1229   :  { %1753 = vrot.lane.b32.xlu1 %v2387_v42, %s2413_s27 }
0x122d   :  { %1778 = vperm.xlu1 %2272, %v1775_v44  }
0x1232   :  { %v1761_v29 = vpop.permute.xlu0 %1760 }
0x1235   :  { %v2389_v45 = vpop.eup %2388 }
0x1236   :  { %1628 = vrot.lane.b32.xlu0 %v2389_v45, %s2413_s27 }
0x123a   :  { %1635 = vperm.xlu0 %2273, %v2075_v55  }
0x129b   :  { %v1754_v47 = vpop.permute.xlu1 %1753 }
0x129c   :  { %v1756_v49 = vmul.f32 %v2383_v24, %v1754_v47 }
0x129e   :  { %v1770_v53 = vrot.slane %v1756_v49, %v2506_v51 }
0x12a0   :  { %1771 = vrot.lane.b32.xlu1 %v1770_v53, %s2414_s28 }
0x12a4   :  { %1653 = vperm.xlu1 %2272, %v1650_v18  }
0x12a8   :  { %v1629_v19 = vpop.permute.xlu0 %1628  ;;  %1791 = vrot.lane.b32.xlu1 %v1790_v54, %s2416_s7  ;;  %v1779_v33 = vpop.permute.xlu1 %1778  ;;  %v1986_v54 = vld [vmem:[%s3049_s3] sm:$0x3] }
0x12a9   :  { %v1631_v6 = vmul.f32 %v2385_v27, %v1629_v19  ;;  %v1781_v57 = vmul.f32 %v1779_v33, %v2880_v43  ;;  %v1795_v3 = vmul.f32 %v1779_v33, %v2899_v34  ;;  %v1902_v34 = vld [vmem:[%s3048_s0] sm:$0xf] }
0x12aa   :  { %v1948_v21 = vrot.slane %v1902_v34, 2 }
0x12ab   :  { %v1645_v31 = vrot.slane %v1631_v6, %v2506_v51 }
0x12ac   :  { %1666 = vrot.lane.b32.xlu1 %v1665_v56, %s2416_s7 }
0x12ad   :  { %1646 = vrot.lane.b32.xlu0 %v1645_v31, %s2414_s28 }
0x12b5   :  { %v1636_v0 = vpop.permute.xlu0 %1635 }
0x1312   :  { %v1772_v12 = vpop.permute.xlu1 %1771 }
0x1313   :  { %v2943_v60 = vmul.f32 %v1772_v12, %v1761_v29 }
0x1315   :  { %v1782_v61 = vadd.f32 %v1781_v57, %v2943_v60 }
0x1317   :  { %v1903_v40 = vpack.c.bf16 %v1782_v61, %v1782_v61 }
0x1319   :  { %2262 = vmatmul.mubr.msk.bf16.vlgmr.msra.gmra.mxu1 %vm39_vm2, %v1903_v40 }
0x131f   :  { %v1647_v62 = vpop.permute.xlu0 %1646  ;;  %v1654_v36 = vpop.permute.xlu1 %1653 }
0x1320   :  { %v2947_v63 = vmul.f32 %v1647_v62, %v1636_v0  ;;  %v1656_v7 = vmul.f32 %v1654_v36, %v2894_v50  ;;  %v1670_v14 = vmul.f32 %v1654_v36, %v2909_v37  ;;  %v2085_v62 = vld [vmem:[%s3049_s3 + $0xe] sm:$0x3] }
0x1322   :  { %v1657_v8 = vadd.f32 %v1656_v7, %v2947_v63 }
0x1323   :  { %v1792_v9 = vpop.permute.xlu1 %1791 }
0x1324   :  { %v1803_v43 = vpack.c.bf16 %v1657_v8, %v1657_v8  ;;  %v1794_v10 = vmul.f32 %v1792_v9, %v1761_v29 }
0x1326   :  { %v1796_v13 = vadd.f32 %v1795_v3, %v1794_v10  ;;  %2254 = vmatmul.mubr.msk.bf16.vlgmr.msra.gmra.mxu0 %vm39_vm2, %v1803_v43 }
0x1327   :  { %v1667_v46 = vpop.permute.xlu1 %1666 }
0x1328   :  { %v1965_v52 = vrot.slane %v1796_v13, %v2506_v51  ;;  %v1669_v17 = vmul.f32 %v1667_v46, %v1636_v0 }
0x132a   :  { %v1671_v59 = vadd.f32 %v1670_v14, %v1669_v17  ;;  %1966 = vrot.lane.b32.xlu1 %v1965_v52, %s2414_s28 }
0x132c   :  { %v1862_v50 = vrot.slane %v1671_v59, %v2506_v51 }
0x132e   :  { %1863 = vrot.lane.b32.xlu1 %v1862_v50, %s2414_s28 }
0x139c   :  { %v1967_v19 = vpop.permute.xlu1 %1966 }
0x13a0   :  { %v1864_v33 = vpop.permute.xlu1 %1863 }
0x13d9   :  { %v1941_v24 = vpop.f32.mrf.mxu1 }
0x13da   :  { %v1950_v5 = vadd.f32 %v1948_v21, %v1941_v24 }
0x13db   :  { %v2263_v26 = vpop.f32.mrf.mxu1 }
0x13dc   :  { %2390 = vtanh.f32 %v1950_v5  ;;  %v2088_v38 = vmul.f32 -1.442695, %v1950_v5 }
0x13dd   :  { %v1944_v37 = vpop.f32.mrf.mxu1 }
0x13df   :  { %v2264_v27 = vpop.f32.mrf.mxu1 }
0x13e6   :  { %v1841_v30 = vpop.f32.mrf.mxu0 }
0x13e7   :  { %v1847_v32 = vadd.f32 %v2082_v28, %v1841_v30 }
0x13e8   :  { %v2255_v1 = vpop.f32.mrf.mxu0 }
0x13e9   :  { %v2391_v11 = vpop.eup %2390  ;;  %2392 = vtanh.f32 %v1847_v32  ;;  %v2084_v20 = vmul.f32 -1.442695, %v1847_v32 }
0x13ea   :  { %1971 = vrot.lane.b32.xlu0 %v2391_v11, %s2413_s27  ;;  %v1844_v35 = vpop.f32.mrf.mxu0  ;;  %2394 = vpow2.f32 %v2088_v38 }
0x13eb   :  { %2396 = vpow2.f32 %v2084_v20 }
0x13ec   :  { %v2256_v15 = vpop.f32.mrf.mxu0 }
0x13f6   :  { %v2393_v16 = vpop.eup %2392 }
0x13f7   :  { %1868 = vrot.lane.b32.xlu0 %v2393_v16, %s2413_s27  ;;  %v2395_v41 = vpop.eup %2394 }
0x13f8   :  { %v1954_v42 = vadd.f32 1.0, %v2395_v41  ;;  %v2397_v44 = vpop.eup %2396 }
0x13f9   :  { %v1851_v45 = vadd.f32 1.0, %v2397_v44 }
0x13fa   :  { %2398 = vrcp.f32 %v1954_v42 }
0x13fb   :  { %2400 = vrcp.f32 %v1851_v45 }
0x1407   :  { %v2399_v55 = vpop.eup %2398 }
0x1408   :  { %v2401_v53 = vpop.eup %2400  ;;  %v1969_v6 = vmul.f32 %v2399_v55, %v1967_v19 }
0x1409   :  { %v1866_v12 = vmul.f32 %v2401_v53, %v1864_v33 }
0x145c   :  { %v1972_v47 = vpop.permute.xlu0 %1971 }
0x145d   :  { %v1974_v49 = vmul.f32 %v2399_v55, %v1972_v47 }
0x145f   :  { %1976 = vrot.lane.b32.xlu0 %v1974_v49, %s2414_s28 }
0x1469   :  { %v1869_v18 = vpop.permute.xlu0 %1868 }
0x146a   :  { %v1871_v29 = vmul.f32 %v2401_v53, %v1869_v18 }
0x146c   :  { %1873 = vrot.lane.b32.xlu0 %v1871_v29, %s2414_s28 }
0x1470   :  { %1989 = vperm.xlu0 %2273, %v1986_v54  }
0x14d1   :  { %v1977_v56 = vpop.permute.xlu0 %1976 }
0x14d2   :  { %v1979_v31 = vadd.f32 %v1977_v56, %v1969_v6 }
0x14d4   :  { %2402 = vtanh.f32 %v1979_v31 }
0x14de   :  { %v1874_v57 = vpop.permute.xlu0 %1873 }
0x14df   :  { %v1876_v61 = vadd.f32 %v1874_v57, %v1866_v12 }
0x14e1   :  { %v2403_v40 = vpop.eup %2402  ;;  %2404 = vtanh.f32 %v1876_v61 }
0x14e2   :  { %1982 = vrot.lane.b32.xlu1 %v2403_v40, %s2413_s27 }
0x14ee   :  { %v2405_v0 = vpop.eup %2404 }
0x14ef   :  { %1879 = vrot.lane.b32.xlu1 %v2405_v0, %s2413_s27 }
0x14f3   :  { %1886 = vperm.xlu1 %2272, %v2085_v62  }
0x14f7   :  { %272 = vrot.lane.b32.xlu1 %v2516_v4, %s2414_s28 }
0x14fb   :  { %787 = vrot.lane.b32.xlu1 %v2651_v39, %s2414_s28 }
0x14ff   :  { %1296 = vrot.lane.b32.xlu1 %v2789_v2, %s2414_s28 }
0x1503   :  { %1798 = vrot.lane.b32.xlu1 %v2943_v60, %s2414_s28 }
0x1554   :  { %v1983_v36 = vpop.permute.xlu1 %1982 }
0x1555   :  { %v1985_v7 = vmul.f32 %v2399_v55, %v1983_v36 }
0x1557   :  { %v1999_v8 = vrot.slane %v1985_v7, %v2506_v51 }
0x1559   :  { %2000 = vrot.lane.b32.xlu0 %v1999_v8, %s2414_s28 }
0x155d   :  { %530 = vrot.lane.b32.xlu0 %v2582_v22, %s2414_s28 }
0x1561   :  { %1044 = vrot.lane.b32.xlu0 %v2720_v58, %s2414_s28  ;;  %v1880_v4 = vpop.permute.xlu1 %1879 }
0x1562   :  { %v1882_v39 = vmul.f32 %v2401_v53, %v1880_v4 }
0x1564   :  { %v1896_v2 = vrot.slane %v1882_v39, %v2506_v51 }
0x1565   :  { %1547 = vrot.lane.b32.xlu0 %v2877_v23, %s2414_s28  ;;  %v1990_v23 = vpop.permute.xlu0 %1989 }
0x1569   :  { %1897 = vrot.lane.b32.xlu0 %v1896_v2, %s2414_s28 }
0x156e   :  { %v1887_v60 = vpop.permute.xlu1 %1886 }
0x1572   :  { %v273_v9 = vpop.permute.xlu1 %272 }
0x1573   :  { %2021 = vst.msk [vmem:[%s3050_s4 + $0xe] sm:$0x3] %vm276_vm3, %v273_v9 }
0x1576   :  { %v788_v22 = vpop.permute.xlu1 %787 }
0x1577   :  { %2041 = vst.msk [vmem:[%s3050_s4 + $0xa] sm:$0x3] %vm276_vm3, %v788_v22 }
0x1578   :  { %2066 = vst.msk [vmem:[%s3050_s4 + $0xa] sm:$0x3] %vm147_vm1, %v2890_v48 }
0x157a   :  { %v1297_v51 = vpop.permute.xlu1 %1296 }
0x157b   :  { %2061 = vst.msk [vmem:[%s3050_s4 + $0x6] sm:$0x3] %vm276_vm3, %v1297_v51 }
0x157e   :  { %v1799_v58 = vpop.permute.xlu1 %1798 }
0x157f   :  { %2081 = vst.msk [vmem:[%s3050_s4 + $0x2] sm:$0x3] %vm276_vm3, %v1799_v58 }
0x15cb   :  { %v2001_v3 = vpop.permute.xlu0 %2000 }
0x15cc   :  { %v2003_v43 = vmul.f32 %v2001_v3, %v1990_v23 }
0x15ce   :  { %2005 = vrot.lane.b32.xlu0 %v2003_v43, %s2414_s28 }
0x15cf   :  { %v531_v10 = vpop.permute.xlu0 %530 }
0x15d0   :  { %2031 = vst.msk [vmem:[%s3050_s4 + $0xc] sm:$0x3] %vm276_vm3, %v531_v10 }
0x15d1   :  { %2076 = vst.msk [vmem:[%s3050_s4 + $0xc] sm:$0x3] %vm147_vm1, %v2947_v63 }
0x15d3   :  { %v1045_v48 = vpop.permute.xlu0 %1044 }
0x15d4   :  { %2051 = vst.msk [vmem:[%s3050_s4 + $0x8] sm:$0x3] %vm276_vm3, %v1045_v48 }
0x15d5   :  { %2056 = vst.msk [vmem:[%s3050_s4 + $0x8] sm:$0x3] %vm147_vm1, %v2813_v25 }
0x15d7   :  { %v1548_v13 = vpop.permute.xlu0 %1547 }
0x15d8   :  { %2071 = vst.msk [vmem:[%s3050_s4 + $0x4] sm:$0x3] %vm276_vm3, %v1548_v13 }
0x15db   :  { %v1898_v46 = vpop.permute.xlu0 %1897 }
0x15dc   :  { %v1900_v63 = vmul.f32 %v1898_v46, %v1887_v60 }
0x15de   :  { %2086 = vst.msk [vmem:[%s3050_s4 + $0xe] sm:$0x3] %vm147_vm1, %v1900_v63 }
0x1640   :  { %v2006_v14 = vpop.permute.xlu0 %2005 }
0x1641   :  { %2008 = vst.msk [vmem:[%s3050_s4] sm:$0x3] %vm276_vm3, %v2006_v14 }

</bundles_post_ra>
